<compile_context>
chip_gen: v7x
topology: tpu7x:2x2x1
jax: 0.10.0
libtpu: 0.0.40
codegen_flags: <defaults>
</compile_context>

<pallas_src>
import functools
import math

import jax
import jax.numpy as jnp
from jax import lax
from jax.experimental import pallas as pl
from jax.experimental.pallas import tpu as pltpu


def _round_up(x, m):
    return ((x + m - 1) // m) * m


def _cdiv(a, b):
    return -(-a // b)


# ----------------------------- Squash epilogue (in-kernel) -----------------------------

def _squash_rows(acc, group):
    """squash(acc) where consecutive row-blocks of size `group` form the squash vectors.

    acc: [tm, n] f32.  Squash is applied per (group, column) independently, matching
    torch.norm(s, dim=-1) with dim=-1 == the output-W spatial axis.
    """
    tm, n = acc.shape
    ngroups = tm // group
    if group % 8 == 0:
        # Sublane-aligned: cheap reshape + cross-sublane (XLU) reduction.
        g = acc.reshape(ngroups, group, n)
        sq = jnp.sum(g * g, axis=1, keepdims=True)              # [ngroups, 1, n]
        scale = (sq * pl.reciprocal(1.0 + sq, approx=True)      # EUP
                 * lax.rsqrt(sq + 1e-16))                       # EUP
        return (g * scale).reshape(tm, n)
    # Non-sublane-aligned group: do the per-group reduction and the broadcast back on the
    # MXU via 0/1 segment matrices (avoids masked cross-sublane reductions / relayouts).
    seg = (lax.broadcasted_iota(jnp.int32, (ngroups, tm), 1) // group
           == lax.broadcasted_iota(jnp.int32, (ngroups, tm), 0)).astype(jnp.float32)
    sq = jnp.dot(seg, acc * acc, preferred_element_type=jnp.float32)       # [ngroups, n]
    scale = sq * pl.reciprocal(1.0 + sq, approx=True) * lax.rsqrt(sq + 1e-16)
    seg_t = (lax.broadcasted_iota(jnp.int32, (tm, ngroups), 0) // group
             == lax.broadcasted_iota(jnp.int32, (tm, ngroups), 1)).astype(jnp.float32)
    scale_full = jnp.dot(seg_t, scale, preferred_element_type=jnp.float32)  # [tm, n]
    return acc * scale_full


# ----------------------------- Pallas kernels ---------------------------------

def _caps_kernel_single(p_ref, w_ref, b_ref, o_ref, *, group):
    """Single-K-tile: one matmul + fused bias + squash.  No accumulator scratch."""
    acc = jnp.dot(p_ref[...], w_ref[...], preferred_element_type=jnp.float32)
    acc = acc + b_ref[...]
    o_ref[...] = _squash_rows(acc, group).astype(o_ref.dtype)


def _caps_kernel_ktiled(p_ref, w_ref, b_ref, o_ref, acc_ref, *, group):
    """K-tiled fallback: f32 VMEM accumulator, init/finalize via pl.when."""
    k = pl.program_id(1)

    @pl.when(k == 0)
    def _():
        acc_ref[...] = jnp.zeros_like(acc_ref)

    acc_ref[...] += jnp.dot(p_ref[...], w_ref[...],
                            preferred_element_type=jnp.float32)

    @pl.when(k == pl.num_programs(1) - 1)
    def _():
        acc = acc_ref[...] + b_ref[...]
        o_ref[...] = _squash_rows(acc, group).astype(o_ref.dtype)


# ----------------------------- Tiling / dispatch --------------------------------

def _choose_m_tiling(M, group):
    unit = group * 8 // math.gcd(group, 8)            # lcm(group, 8)
    tm_cap = max(unit, (2048 // unit) * unit)         # up to ~2048 rows per tile
    m_units = _cdiv(M, unit)
    if m_units >= 2:
        tiles = max(2, _cdiv(m_units * unit, tm_cap))
        if tiles % 2:
            tiles += 1                                # even tile count -> v7x 2-TC balance
        tm = unit * _cdiv(m_units, tiles)
    else:
        tiles, tm = 1, unit
    return tm, tm * tiles


def _choose_k_tiling(K, tk_max=2048):
    k_pad = _round_up(K, 128)
    if k_pad <= tk_max:
        return k_pad, k_pad, 1
    nk = _cdiv(k_pad, tk_max)
    tk = _round_up(_cdiv(k_pad, nk), 128)
    return tk * nk, tk, nk


def _capsule_matmul_squash(patches, w_mat, bias, group):
    """squash(patches @ w_mat + bias), squash over consecutive row-groups of size `group`.

    patches:[M,K] bf16, w_mat:[K,N] bf16, bias:[N] f32  ->  [M,N] f32.
    """
    M, K = patches.shape
    K2, N = w_mat.shape
    assert K == K2, (patches.shape, w_mat.shape)
    assert M % group == 0, (M, group)                 # real rows form whole squash groups

    n_pad = _round_up(N, 128)
    tm, m_pad = _choose_m_tiling(M, group)
    k_pad, tk, nk = _choose_k_tiling(K)
    assert tm % group == 0 and m_pad % group == 0     # padded rows form whole groups too

    p = jnp.pad(patches, ((0, m_pad - M), (0, k_pad - K)))
    w = jnp.pad(w_mat, ((0, k_pad - K), (0, n_pad - N)))
    b = jnp.pad(bias.astype(jnp.float32), (0, n_pad - N)).reshape(1, n_pad)

    # Advisory cost for the XLA scheduler around the custom call.
    cost = pl.CostEstimate(
        flops=2 * m_pad * k_pad * n_pad,
        transcendentals=2 * (m_pad // group) * n_pad,
        bytes_accessed=m_pad * k_pad * 2 + k_pad * n_pad * 2 + n_pad * 4 + m_pad * n_pad * 4)

    # Raise the scoped-VMEM limit only if the double-buffered working set needs it.
    vmem_need = (2 * tm * tk * 2 + 2 * tk * n_pad * 2 + 2 * n_pad * 4
                 + 2 * tm * n_pad * 4 + (tm * n_pad * 4 if nk > 1 else 0))
    vmem_limit = None
    if vmem_need > (12 << 20):
        vmem_limit = min(_round_up(vmem_need + (4 << 20), 1 << 20), 64 << 20)

    if nk == 1:
        # Single K tile: no K grid axis, no accumulator scratch.
        out = pl.pallas_call(
            functools.partial(_caps_kernel_single, group=group),
            out_shape=jax.ShapeDtypeStruct((m_pad, n_pad), jnp.float32),
            grid_spec=pltpu.PrefetchScalarGridSpec(
                num_scalar_prefetch=0,
                grid=(m_pad // tm,),
                in_specs=[
                    pl.BlockSpec((tm, k_pad), lambda i: (i, 0)),
                    pl.BlockSpec((k_pad, n_pad), lambda i: (0, 0)),
                    pl.BlockSpec((1, n_pad), lambda i: (0, 0)),
                ],
                out_specs=pl.BlockSpec((tm, n_pad), lambda i: (i, 0)),
            ),
            compiler_params=pltpu.CompilerParams(
                dimension_semantics=("parallel",),
                vmem_limit_bytes=vmem_limit),
            cost_estimate=cost,
        )(p, w, b)
    else:
        out = pl.pallas_call(
            functools.partial(_caps_kernel_ktiled, group=group),
            out_shape=jax.ShapeDtypeStruct((m_pad, n_pad), jnp.float32),
            grid_spec=pltpu.PrefetchScalarGridSpec(
                num_scalar_prefetch=0,
                grid=(m_pad // tm, nk),                       # reduction axis last
                in_specs=[
                    pl.BlockSpec((tm, tk), lambda i, k: (i, k)),
                    pl.BlockSpec((tk, n_pad), lambda i, k: (k, 0)),
                    pl.BlockSpec((1, n_pad), lambda i, k: (0, 0)),
                ],
                out_specs=pl.BlockSpec((tm, n_pad), lambda i, k: (i, 0)),
                scratch_shapes=[pltpu.VMEM((tm, n_pad), jnp.float32)],
            ),
            compiler_params=pltpu.CompilerParams(
                dimension_semantics=("parallel", "arbitrary"),
                vmem_limit_bytes=vmem_limit),
            cost_estimate=cost,
        )(p, w, b)
    return out[:M, :N]


# --------------------------- im2col (plain-JAX glue, channels-last) ---------------------------

def _im2col_cl(x_cl, k, stride, Do, Ho, Wo):
    """x_cl: [B, Dp, Hp, Wp, Cin] (spatially padded, channels-last, bf16)
    -> [B*Do*Ho*Wo, k^3*Cin] with rows ordered (b, do, ho, wo), wo fastest, and features
    ordered (kd, kh, kw, cin)."""
    B, Cin = x_cl.shape[0], x_cl.shape[-1]
    pats = []
    for kd in range(k):
        for kh in range(k):
            for kw in range(k):
                pats.append(x_cl[:, kd:kd + stride * Do:stride,
                                    kh:kh + stride * Ho:stride,
                                    kw:kw + stride * Wo:stride, :])
    p = jnp.stack(pats, axis=4)                       # [B, Do, Ho, Wo, k^3, Cin]
    return p.reshape(B * Do * Ho * Wo, k ** 3 * Cin)


# ------------------------------ Module forward ---------------------------------

def capsule_layer3d_forward(params, x, *, out_caps, out_dim,
                            kernel_size=3, stride=2, padding=1):
    """x: [B, in_caps, in_dim, D, H, W] -> [B, out_caps, out_dim, d, h, w]."""
    B, in_caps, in_dim, D, H, W = x.shape
    cin = in_caps * in_dim
    x = x.reshape(B, cin, D, H, W)

    w = params["conv_w"]                              # [Cout, Cin, k, k, k]
    b = params["conv_b"]                              # [Cout]
    cout = w.shape[0]
    assert cout == out_caps * out_dim
    k = kernel_size

    # Spatial pad + channels-last + bf16 BEFORE the k^3 patch amplification.
    xp = jnp.pad(x, ((0, 0), (0, 0), (padding, padding),
                     (padding, padding), (padding, padding)))
    xp = xp.transpose(0, 2, 3, 4, 1).astype(jnp.bfloat16)     # [B, Dp, Hp, Wp, Cin]
    Dp, Hp, Wp = xp.shape[1:4]
    Do = (Dp - k) // stride + 1
    Ho = (Hp - k) // stride + 1
    Wo = (Wp - k) // stride + 1

    patches = _im2col_cl(xp, k, stride, Do, Ho, Wo)           # [M, k^3*Cin] bf16
    # Reorder the (tiny) weight to the (kd,kh,kw,cin) feature order used by the patches.
    w_mat = w.transpose(2, 3, 4, 1, 0).reshape(k ** 3 * cin, cout).astype(jnp.bfloat16)

    out = _capsule_matmul_squash(patches, w_mat, b, group=Wo)  # [B*d*h*w, Cout] f32
    out = out.reshape(B, Do, Ho, Wo, out_caps, out_dim)
    out = out.transpose(0, 4, 5, 1, 2, 3)                      # [B, out_caps, out_dim, d, h, w]
    return out


# ------------------------------ Plain-JAX reference -----------------------------

def capsule_layer3d_reference(params, x, *, out_caps, out_dim,
                              kernel_size=3, stride=2, padding=1):
    B, in_caps, in_dim, D, H, W = x.shape
    xc = x.reshape(B, in_caps * in_dim, D, H, W)
    y = lax.conv_general_dilated(
        xc, params["conv_w"],
        window_strides=(stride,) * 3,
        padding=[(padding, padding)] * 3,
        dimension_numbers=("NCDHW", "OIDHW", "NCDHW"))
    y = y + params["conv_b"].reshape(1, -1, 1, 1, 1)
    d, h, w = y.shape[2:]
    y = y.reshape(B, out_caps, out_dim, d, h, w)
    sq = jnp.sum(y * y, axis=-1, keepdims=True)
    norm = jnp.sqrt(sq)
    return (sq / (1.0 + sq)) * (y / (norm + 1e-8))


# ------------------------------ Parameter init ---------------------------------

def init_params(key, in_caps, in_dim, out_caps, out_dim, k):
    cin = in_caps * in_dim
    cout = out_caps * out_dim
    kw, kb = jax.random.split(key)
    bound = 1.0 / math.sqrt(cin * k ** 3)
    w = jax.random.uniform(kw, (cout, cin, k, k, k), jnp.float32, -bound, bound)
    b = jax.random.uniform(kb, (cout,), jnp.float32, -bound, bound)
    return {"conv_w": w, "conv_b": b}


# ----------------------------------- Main ---------------------------------------

if __name__ == "__main__":
    key = jax.random.PRNGKey(0)
    pkey, xkey = jax.random.split(key)

    # CapsuleLayer3D(in_caps=4, out_caps=8, in_dim=8, out_dim=16, k=3, stride=2, padding=1)
    # on a 16^3 volume.
    B, in_caps, in_dim = 2, 4, 8
    out_caps, out_dim = 8, 16
    D = H = W = 16
    ksz, stride, padding = 3, 2, 1

    params = init_params(pkey, in_caps, in_dim, out_caps, out_dim, ksz)
    x = jax.random.normal(xkey, (B, in_caps, in_dim, D, H, W), jnp.float32)

    fwd = jax.jit(functools.partial(capsule_layer3d_forward,
                                    out_caps=out_caps, out_dim=out_dim,
                                    kernel_size=ksz, stride=stride, padding=padding))
    out = jax.block_until_ready(fwd(params, x))

    assert out.shape == (B, out_caps, out_dim, 8, 8, 8), out.shape
    assert bool(jnp.all(jnp.isfinite(out)))

    ref = capsule_layer3d_reference(params, x, out_caps=out_caps, out_dim=out_dim,
                                    kernel_size=ksz, stride=stride, padding=padding)
    max_err = float(jnp.max(jnp.abs(out - ref)))
    assert max_err < 5e-2, f"max abs error vs reference: {max_err}"

    print("KERNEL_OK")
</pallas_src>

<mosaic_0001>
module attributes {stable_mosaic.version = 11 : i64} {
  func.func @_caps_kernel_single(%arg0: i32, %arg1: memref<512x896xbf16, #tpu.memory_space<vmem>>, %arg2: memref<896x128xbf16, #tpu.memory_space<vmem>>, %arg3: memref<1x128xf32, #tpu.memory_space<vmem>>, %arg4: memref<512x128xf32, #tpu.memory_space<vmem>>) attributes {dimension_semantics = [#tpu.dimension_semantics<parallel>], iteration_bounds = array<i64: 2>, scalar_prefetch = 0 : i64, scratch_operands = 0 : i64, tpu.core_type = #tpu.core_type<tc>, window_params = [{transform_indices = @transform_0, window_bounds = array<i64: 512, 896>}, {pipeline_mode = #tpu.pipeline_mode<synchronous>, transform_indices = @transform_1, window_bounds = array<i64: 896, 128>}, {pipeline_mode = #tpu.pipeline_mode<synchronous>, transform_indices = @transform_2, window_bounds = array<i64: 1, 128>}, {transform_indices = @transform_3, window_bounds = array<i64: 512, 128>}]} {
    %c0 = arith.constant 0 : index
    %c0_0 = arith.constant 0 : index
    %0 = vector.load %arg1[%c0, %c0_0] : memref<512x896xbf16, #tpu.memory_space<vmem>>, vector<512x896xbf16>
    %c0_1 = arith.constant 0 : index
    %c0_2 = arith.constant 0 : index
    %1 = vector.load %arg2[%c0_1, %c0_2] : memref<896x128xbf16, #tpu.memory_space<vmem>>, vector<896x128xbf16>
    %cst = arith.constant dense<0.000000e+00> : vector<512x128xf32>
    %2 = tpu.matmul %0, %1, %cst {dimension_numbers = #tpu.dot_dimension_numbers<[1], [0], [0], [1], [0, 0, 1, 1], [], []>} : vector<512x896xbf16>, vector<896x128xbf16>, vector<512x128xf32> -> vector<512x128xf32>
    %c0_3 = arith.constant 0 : index
    %c0_4 = arith.constant 0 : index
    %3 = vector.load %arg3[%c0_3, %c0_4] : memref<1x128xf32, #tpu.memory_space<vmem>>, vector<1x128xf32>
    %4 = vector.broadcast %3 : vector<1x128xf32> to vector<512x128xf32>
    %5 = arith.addf %2, %4 : vector<512x128xf32>
    %6 = vector.shape_cast %5 : vector<512x128xf32> to vector<64x8x128xf32>
    %7 = arith.mulf %6, %6 : vector<64x8x128xf32>
    %cst_5 = arith.constant dense<0.000000e+00> : vector<64x128xf32>
    %8 = vector.multi_reduction <add>, %7, %cst_5 [1] : vector<64x8x128xf32> to vector<64x128xf32>
    %9 = vector.shape_cast %8 : vector<64x128xf32> to vector<64x1x128xf32>
    %cst_6 = arith.constant 1.000000e+00 : f32
    %10 = vector.broadcast %cst_6 : f32 to vector<64x1x128xf32>
    %11 = arith.addf %10, %9 : vector<64x1x128xf32>
    %12 = tpu.reciprocal %11 {approx = true} : vector<64x1x128xf32> -> vector<64x1x128xf32>
    %13 = arith.mulf %9, %12 : vector<64x1x128xf32>
    %cst_7 = arith.constant 1.000000e-16 : f32
    %14 = vector.broadcast %cst_7 : f32 to vector<64x1x128xf32>
    %15 = arith.addf %9, %14 : vector<64x1x128xf32>
    %16 = math.rsqrt %15 : vector<64x1x128xf32>
    %17 = arith.mulf %13, %16 : vector<64x1x128xf32>
    %18 = vector.broadcast %17 : vector<64x1x128xf32> to vector<64x8x128xf32>
    %19 = arith.mulf %6, %18 : vector<64x8x128xf32>
    %20 = vector.shape_cast %19 : vector<64x8x128xf32> to vector<512x128xf32>
    %c0_8 = arith.constant 0 : index
    %c0_9 = arith.constant 0 : index
    %21 = vector.load %arg4[%c0_8, %c0_9] : memref<512x128xf32, #tpu.memory_space<vmem>>, vector<512x128xf32>
    tpu.vector_store %arg4[%c0_8, %c0_9], %20 {strides = array<i32>} : memref<512x128xf32, #tpu.memory_space<vmem>>, vector<512x128xf32>,
    return
  }
  func.func @transform_0(%arg0: i32) -> (i32, i32) {
    %c0_i32 = arith.constant 0 : i32
    %c0_i32_0 = arith.constant 0 : i32
    return %arg0, %c0_i32 : i32, i32
  }
  func.func @transform_1(%arg0: i32) -> (i32, i32) {
    %c0_i32 = arith.constant 0 : i32
    %c0_i32_0 = arith.constant 0 : i32
    %c0_i32_1 = arith.constant 0 : i32
    return %c0_i32, %c0_i32_0 : i32, i32
  }
  func.func @transform_2(%arg0: i32) -> (i32, i32) {
    %c0_i32 = arith.constant 0 : i32
    %c0_i32_0 = arith.constant 0 : i32
    %c0_i32_1 = arith.constant 0 : i32
    return %c0_i32, %c0_i32_0 : i32, i32
  }
  func.func @transform_3(%arg0: i32) -> (i32, i32) {
    %c0_i32 = arith.constant 0 : i32
    %c0_i32_0 = arith.constant 0 : i32
    return %arg0, %c0_i32 : i32, i32
  }
}

</mosaic_0001>

<bundles_post_ra>
// kernel: capsule_layer3d_forward.1
= control target key start
LH: loop header
LB: loop body
LE: loop exit
PB: predicated region body
PF: predicated region fallthrough
CT: control target
= control target key end

     0   :  { %s5584_s12 = smov 0   ;;  %s7579_s0 = inlined_call_operand.vmem [shape: bf16[1024,896], index: 0, kind: input, shape index: {}]   ;;  %s7580_s1 = inlined_call_operand.vmem [shape: bf16[896,128], index: 1, kind: input, shape index: {}]   ;;  %s7581_s2 = inlined_call_operand.vmem [shape: f32[1,128], index: 2, kind: input, shape index: {}]   ;;  %s7582_s3 = inlined_call_operand.vmem [shape: f32[1024,128], index: 3, kind: output, shape index: {}]  }
   0x1 LB: > { %s4213_s13 = sadd.s32 4294967295, %s5561_s12   ;;  %p4217_p0 = scmp.ge.s32.totalorder %s5561_s12, 1  ;;  %s5561_s12 = sphi %s5584_s12, %s13_s12  }
   0x2   : > { %p139_p1 = scmp.lt.s32.totalorder %s5561_s12, 3 }
   0x4   : > { %p140_p2 = pnand %p4217_p0, %p139_p1 }
   0x6   : > { %143 = sbr.rel (%p140_p2) target bundleno = 883 (0x373), region = 32 }
   0xd   : > { %v4923_v0 = vld [vmem:[%s7580_s1] sm:$0xff]   ;;  %v5563_v1 = vmov 0   ;;  %v4925_v3 = vld [vmem:[%s7580_s1 + $0x8] sm:$0xff]   ;;  %v4927_v5 = vld [vmem:[%s7580_s1 + $0x10] sm:$0xff]   ;;  %s4218_s7 = sshll.u32 %s4213_s13, 6 }
   0xe   : > { %2041 = vmatprep.subr.bf16.mxu1 %v5563_v1  ;;  %2330 = vmatprep.subr.bf16.mxu0 %v5563_v1  ;;  %v5600_v2 = vld [vmem:[%s7580_s1 + $0x80] sm:$0xff]   ;;  %v5610_v4 = vld [vmem:[%s7580_s1 + $0x88] sm:$0xff]   ;;  %v5621_v6 = vld [vmem:[%s7580_s1 + $0x90] sm:$0xff]   ;;  %p165_p3 = scmp.lt.s32.totalorder %s4218_s7, 127 }
   0xf   : > { %2042 = vmatpush1.bf16.msra.mxu1 %v4923_v0  ;;  %2331 = vmatpush1.bf16.msra.mxu0 %v5600_v2  ;;  %v4929_v7 = vld [vmem:[%s7580_s1 + $0x18] sm:$0xff]   ;;  %v4931_v9 = vld [vmem:[%s7580_s1 + $0x20] sm:$0xff]   ;;  %v4933_v11 = vld [vmem:[%s7580_s1 + $0x28] sm:$0xff]  }
  0x10   : > { %2043 = vmatprep.subr.bf16.mxu1 %v5563_v1  ;;  %2332 = vmatprep.subr.bf16.mxu0 %v5563_v1  ;;  %v5632_v8 = vld [vmem:[%s7580_s1 + $0x98] sm:$0xff]   ;;  %v5643_v10 = vld [vmem:[%s7580_s1 + $0xa0] sm:$0xff]   ;;  %v5656_v12 = vld [vmem:[%s7580_s1 + $0xa8] sm:$0xff]   ;;  %s7724_s7 = smov (!%p165_p3, %s4218_s7), 127 }
  0x11   : > { %v4935_v13 = vld [vmem:[%s7580_s1 + $0x30] sm:$0xff]   ;;  %v4937_v15 = vld [vmem:[%s7580_s1 + $0x38] sm:$0xff]   ;;  %s4913_s19 = smul.u32 28, %s7724_s7  ;;  %v4939_v17 = vld [vmem:[%s7580_s1 + $0x40] sm:$0xff]  }
  0x12   : > { %v5669_v14 = vld [vmem:[%s7580_s1 + $0xb0] sm:$0xff]   ;;  %v5681_v16 = vld [vmem:[%s7580_s1 + $0xb8] sm:$0xff]   ;;  %v5697_v18 = vld [vmem:[%s7580_s1 + $0xc0] sm:$0xff]  }
  0x13   : > { %2044 = vmatpush1.bf16.msra.mxu1 %v4925_v3  ;;  %2333 = vmatpush1.bf16.msra.mxu0 %v5610_v4  ;;  %s5690_s26 = scalar_lea.vmem %s7579_s0, %s4913_s19  ;;  %v4941_v20 = vld [vmem:[%s7580_s1 + $0x48] sm:$0xff]   ;;  %v4943_v23 = vld [vmem:[%s7580_s1 + $0x50] sm:$0xff]   ;;  %v4945_v25 = vld [vmem:[%s7580_s1 + $0x58] sm:$0xff]  }
  0x14   : > { %2045 = vmatprep.subr.bf16.mxu1 %v5563_v1  ;;  %2334 = vmatprep.subr.bf16.mxu0 %v5563_v1  ;;  %v4957_v19 = vld [vmem:[%s5690_s26 + $0x4] ss:$28 sps:$4 sm:$0xff]   ;;  %v4960_v21 = vld [vmem:[%s5690_s26 + $0xc] ss:$28 sps:$4 sm:$0xff]   ;;  %v5721_v24 = vld [vmem:[%s7580_s1 + $0xd0] sm:$0xff]  }
  0x15   : > { %v5710_v22 = vld [vmem:[%s7580_s1 + $0xc8] sm:$0xff]   ;;  %2073 = vmatprep.mubr.bf16.mxu1 %v4957_v19  ;;  %2362 = vmatprep.mubr.bf16.mxu0 %v4960_v21  ;;  %v5732_v26 = vld [vmem:[%s7580_s1 + $0xd8] sm:$0xff]   ;;  %v4947_v27 = vld [vmem:[%s7580_s1 + $0x60] sm:$0xff]  }
  0x16   : > { %v5743_v28 = vld [vmem:[%s7580_s1 + $0xe0] sm:$0xff]   ;;  %v4949_v29 = vld [vmem:[%s7580_s1 + $0x68] sm:$0xff]   ;;  %v4951_v31 = vld [vmem:[%s7580_s1 + $0x70] sm:$0xff]  }
  0x17   : > { %2046 = vmatpush1.bf16.msra.mxu1 %v4927_v5  ;;  %2335 = vmatpush1.bf16.msra.mxu0 %v5621_v6  ;;  %v5754_v30 = vld [vmem:[%s7580_s1 + $0xe8] sm:$0xff]   ;;  %v5765_v32 = vld [vmem:[%s7580_s1 + $0xf0] sm:$0xff]   ;;  %v4953_v33 = vld [vmem:[%s7580_s1 + $0x78] sm:$0xff]  }
  0x18   : > { %2047 = vmatprep.subr.bf16.mxu1 %v5563_v1  ;;  %2336 = vmatprep.subr.bf16.mxu0 %v5563_v1  ;;  %v5776_v34 = vld [vmem:[%s7580_s1 + $0xf8] sm:$0xff]   ;;  %v4958_v36 = vld [vmem:[%s5690_s26 + $0x8] ss:$28 sps:$4 sm:$0xff]   ;;  %v4969_v43 = vld [vmem:[%s5690_s26 + $0x74] ss:$28 sps:$4 sm:$0xff]  }
  0x19   : > { %v4955_v35 = vld [vmem:[%s5690_s26] ss:$28 sps:$4 sm:$0xff]   ;;  %v4968_v40 = vld [vmem:[%s7580_s1 + $0x108] sm:$0xff]   ;;  %v4966_v41 = vld [vmem:[%s5690_s26 + $0x38] ss:$28 sps:$4 sm:$0xff]  }
  0x1a   : > { %v4961_v37 = vld [vmem:[%s7580_s1 + $0x100] sm:$0xff]   ;;  %v4962_v38 = vld [vmem:[%s5690_s26 + $0x3c] ss:$28 sps:$4 sm:$0xff]   ;;  %v4981_v45 = vld [vmem:[%s7580_s1 + $0x110] sm:$0xff]  }
  0x1b   : > { %2048 = vmatpush1.bf16.msra.mxu1 %v4929_v7  ;;  %2337 = vmatpush1.bf16.msra.mxu0 %v5632_v8  ;;  %v4964_v39 = vld [vmem:[%s5690_s26 + $0x44] ss:$28 sps:$4 sm:$0xff]   ;;  %v4971_v44 = vld [vmem:[%s5690_s26 + $0x7c] ss:$28 sps:$4 sm:$0xff]   ;;  %v4973_v47 = vld [vmem:[%s5690_s26 + $0x70] ss:$28 sps:$4 sm:$0xff]  }
  0x1c   : > { %2049 = vmatprep.subr.bf16.mxu1 %v5563_v1  ;;  %2338 = vmatprep.subr.bf16.mxu0 %v5563_v1  ;;  %v4967_v42 = vld [vmem:[%s5690_s26 + $0x40] ss:$28 sps:$4 sm:$0xff]   ;;  %v4974_v48 = vld [vmem:[%s5690_s26 + $0x78] ss:$28 sps:$4 sm:$0xff]   ;;  %v4975_v49 = vld [vmem:[%s5690_s26 + $0xac] ss:$28 sps:$4 sm:$0xff]  }
  0x1d   : > { %v4988_v46 = vld [vmem:[%s7580_s1 + $0x118] sm:$0xff]   ;;  %v4977_v50 = vld [vmem:[%s5690_s26 + $0xb4] ss:$28 sps:$4 sm:$0xff]   ;;  %v5001_v51 = vld [vmem:[%s7580_s1 + $0x120] sm:$0xff]  }
  0x1e   : > { %v5008_v52 = vld [vmem:[%s7580_s1 + $0x128] sm:$0xff]   ;;  %v4982_v55 = vld [vmem:[%s5690_s26 + $0xe4] ss:$28 sps:$4 sm:$0xff]   ;;  %v5021_v57 = vld [vmem:[%s7580_s1 + $0x130] sm:$0xff]  }
  0x1f   : > { %2050 = vmatpush1.bf16.msra.mxu1 %v4931_v9  ;;  %2339 = vmatpush1.bf16.msra.mxu0 %v5643_v10  ;;  %v4979_v53 = vld [vmem:[%s5690_s26 + $0xa8] ss:$28 sps:$4 sm:$0xff]   ;;  %v4980_v54 = vld [vmem:[%s5690_s26 + $0xb0] ss:$28 sps:$4 sm:$0xff]   ;;  %v5028_v58 = vld [vmem:[%s7580_s1 + $0x138] sm:$0xff]  }
  0x20   : > { %2051 = vmatprep.subr.bf16.mxu1 %v5563_v1  ;;  %2340 = vmatprep.subr.bf16.mxu0 %v5563_v1  ;;  %v4984_v56 = vld [vmem:[%s5690_s26 + $0xec] ss:$28 sps:$4 sm:$0xff]   ;;  %v4986_v59 = vld [vmem:[%s5690_s26 + $0xe0] ss:$28 sps:$4 sm:$0xff]   ;;  %v5000_v9 = vld [vmem:[%s5690_s26 + $0x158] ss:$28 sps:$4 sm:$0xff]  }
  0x21   : > { %v4987_v60 = vld [vmem:[%s5690_s26 + $0xe8] ss:$28 sps:$4 sm:$0xff]   ;;  %v4989_v61 = vld [vmem:[%s5690_s26 + $0x11c] ss:$28 sps:$4 sm:$0xff]   ;;  %v4999_v7 = vld [vmem:[%s5690_s26 + $0x150] ss:$28 sps:$4 sm:$0xff]  }
  0x22   : > { %v4991_v62 = vld [vmem:[%s5690_s26 + $0x124] ss:$28 sps:$4 sm:$0xff]   ;;  %v5048_v0 = vld [vmem:[%s7580_s1 + $0x148] sm:$0xff]   ;;  %v4997_v5 = vld [vmem:[%s5690_s26 + $0x15c] ss:$28 sps:$4 sm:$0xff]  }
  0x23   : > { %2052 = vmatpush1.bf16.msra.mxu1 %v4933_v11  ;;  %2341 = vmatpush1.bf16.msra.mxu0 %v5656_v12  ;;  %v5041_v63 = vld [vmem:[%s7580_s1 + $0x140] sm:$0xff]   ;;  %v5004_v11 = vld [vmem:[%s5690_s26 + $0x194] ss:$28 sps:$4 sm:$0xff]  }
  0x24   : > { %2053 = vmatprep.subr.bf16.mxu1 %v5563_v1  ;;  %2342 = vmatprep.subr.bf16.mxu0 %v5563_v1  ;;  %v4994_v3 = vld [vmem:[%s5690_s26 + $0x120] ss:$28 sps:$4 sm:$0xff]   ;;  %v5014_v21 = vld [vmem:[%s5690_s26 + $0x1c8] ss:$28 sps:$4 sm:$0xff]  }
  0x25   : > { %v5013_v19 = vld [vmem:[%s5690_s26 + $0x1c0] ss:$28 sps:$4 sm:$0xff]  }
  0x27   : > { %2054 = vmatpush1.bf16.msra.mxu1 %v4935_v13  ;;  %2343 = vmatpush1.bf16.msra.mxu0 %v5669_v14  ;;  %v5006_v13 = vld [vmem:[%s5690_s26 + $0x188] ss:$28 sps:$4 sm:$0xff]  }
  0x28   : > { %2055 = vmatprep.subr.bf16.mxu1 %v5563_v1  ;;  %2344 = vmatprep.subr.bf16.mxu0 %v5563_v1 }
  0x2b   : > { %2056 = vmatpush1.bf16.msra.mxu1 %v4937_v15  ;;  %2345 = vmatpush1.bf16.msra.mxu0 %v5681_v16  ;;  %v5007_v15 = vld [vmem:[%s5690_s26 + $0x190] ss:$28 sps:$4 sm:$0xff]  }
  0x2c   : > { %2057 = vmatprep.subr.bf16.mxu1 %v5563_v1  ;;  %2346 = vmatprep.subr.bf16.mxu0 %v5563_v1 }
  0x2f   : > { %2058 = vmatpush1.bf16.msra.mxu1 %v4939_v17  ;;  %2347 = vmatpush1.bf16.msra.mxu0 %v5697_v18  ;;  %v5011_v17 = vld [vmem:[%s5690_s26 + $0x1cc] ss:$28 sps:$4 sm:$0xff]  }
  0x30   : > { %2059 = vmatprep.subr.bf16.mxu1 %v5563_v1  ;;  %2348 = vmatprep.subr.bf16.mxu0 %v5563_v1 }
  0x33   : > { %2060 = vmatpush1.bf16.msra.mxu1 %v4941_v20  ;;  %2349 = vmatpush1.bf16.msra.mxu0 %v5710_v22  ;;  %v5108_v20 = vld [vmem:[%s7580_s1 + $0x178] sm:$0xff]  }
  0x34   : > { %2061 = vmatprep.subr.bf16.mxu1 %v5563_v1  ;;  %2350 = vmatprep.subr.bf16.mxu0 %v5563_v1 }
  0x37   : > { %2062 = vmatpush1.bf16.msra.mxu1 %v4943_v23  ;;  %2351 = vmatpush1.bf16.msra.mxu0 %v5721_v24  ;;  %v5017_v23 = vld [vmem:[%s5690_s26 + $0x204] ss:$28 sps:$4 sm:$0xff]  }
  0x38   : > { %2063 = vmatprep.subr.bf16.mxu1 %v5563_v1  ;;  %2352 = vmatprep.subr.bf16.mxu0 %v5563_v1 }
  0x3b   : > { %2064 = vmatpush1.bf16.msra.mxu1 %v4945_v25  ;;  %2353 = vmatpush1.bf16.msra.mxu0 %v5732_v26  ;;  %v5020_v25 = vld [vmem:[%s5690_s26 + $0x200] ss:$28 sps:$4 sm:$0xff]  }
  0x3c   : > { %2065 = vmatprep.subr.bf16.mxu1 %v5563_v1  ;;  %2354 = vmatprep.subr.bf16.mxu0 %v5563_v1 }
  0x3f   : > { %2066 = vmatpush1.bf16.msra.mxu1 %v4947_v27  ;;  %2355 = vmatpush1.bf16.msra.mxu0 %v5743_v28  ;;  %v5024_v27 = vld [vmem:[%s5690_s26 + $0x23c] ss:$28 sps:$4 sm:$0xff]  }
  0x40   : > { %2067 = vmatprep.subr.bf16.mxu1 %v5563_v1  ;;  %2356 = vmatprep.subr.bf16.mxu0 %v5563_v1 }
  0x43   : > { %2068 = vmatpush1.bf16.msra.mxu1 %v4949_v29  ;;  %2357 = vmatpush1.bf16.msra.mxu0 %v5754_v30  ;;  %v5029_v29 = vld [vmem:[%s5690_s26 + $0x26c] ss:$28 sps:$4 sm:$0xff]  }
  0x44   : > { %2069 = vmatprep.subr.bf16.mxu1 %v5563_v1  ;;  %2358 = vmatprep.subr.bf16.mxu0 %v5563_v1 }
  0x47   : > { %2070 = vmatpush1.bf16.msra.mxu1 %v4951_v31  ;;  %2359 = vmatpush1.bf16.msra.mxu0 %v5765_v32  ;;  %v5033_v31 = vld [vmem:[%s5690_s26 + $0x268] ss:$28 sps:$4 sm:$0xff]  }
  0x48   : > { %2071 = vmatprep.subr.bf16.mxu1 %v5563_v1  ;;  %2360 = vmatprep.subr.bf16.mxu0 %v5563_v1 }
  0x4b   : > { %2072 = vmatpush1.bf16.msra.mxu1 %v4953_v33  ;;  %2361 = vmatpush1.bf16.msra.mxu0 %v5776_v34  ;;  %v5035_v33 = vld [vmem:[%s5690_s26 + $0x2a4] ss:$28 sps:$4 sm:$0xff]  }
  0x4c   : > { %4625 = vmatprep.subr.bf16.mxu1 %v5563_v1  ;;  %2619 = vmatprep.subr.bf16.mxu0 %v5563_v1 }
  0x4e   : > { %2074 = vmatmul.mubr.bf16.vlgmr.msra.gmra.mrb[0].mxu1 %v4955_v35  ;;  %2363 = vmatmul.mubr.bf16.vlgmr.msra.gmra.mrb[0].mxu0 %v4958_v36  ;;  %v5039_v35 = vld [vmem:[%s5690_s26 + $0x2a0] ss:$28 sps:$4 sm:$0xff]   ;;  %v5040_v36 = vld [vmem:[%s5690_s26 + $0x2a8] ss:$28 sps:$4 sm:$0xff]  }
  0x4f   : > { %4641 = vmatpush1.bf16.msra.mxu1 %v5600_v2  ;;  %2620 = vmatpush1.bf16.msra.mxu0 %v4961_v37  ;;  %v4993_v2 = vld [vmem:[%s5690_s26 + $0x118] ss:$28 sps:$4 sm:$0xff]  }
  0x50   : > { %2081 = vmatprep.mubr.bf16.mxu1 %v4962_v38  ;;  %2370 = vmatprep.mubr.bf16.mxu0 %v4964_v39  ;;  %v5042_v37 = vld [vmem:[%s5690_s26 + $0x2dc] ss:$28 sps:$4 sm:$0xff]   ;;  %v5044_v38 = vld [vmem:[%s5690_s26 + $0x2e4] ss:$28 sps:$4 sm:$0xff]  }
  0x51   : > { %2621 = vmatprep.subr.bf16.mxu0 %v5563_v1  ;;  %4626 = vmatprep.subr.bf16.mxu1 %v5563_v1  ;;  %v5046_v39 = vld [vmem:[%s5690_s26 + $0x2d8] ss:$28 sps:$4 sm:$0xff]  }
  0x53   : > { %4642 = vmatpush1.bf16.msra.mxu1 %v5610_v4  ;;  %2622 = vmatpush1.bf16.msra.mxu0 %v4968_v40  ;;  %v4995_v4 = vld [vmem:[%s5690_s26 + $0x154] ss:$28 sps:$4 sm:$0xff]   ;;  %v5047_v40 = vld [vmem:[%s5690_s26 + $0x2e0] ss:$28 sps:$4 sm:$0xff]  }
  0x54   : > { %4627 = vmatprep.subr.bf16.mxu1 %v5563_v1  ;;  %2623 = vmatprep.subr.bf16.mxu0 %v5563_v1 }
  0x56   : > { %2082 = vmatmul.mubr.bf16.gmra.mrb[4].mxu1 %v4966_v41  ;;  %2371 = vmatmul.mubr.bf16.gmra.mrb[4].mxu0 %v4967_v42  ;;  %v5049_v41 = vld [vmem:[%s5690_s26 + $0x314] ss:$28 sps:$4 sm:$0xff]   ;;  %v5051_v42 = vld [vmem:[%s5690_s26 + $0x31c] ss:$28 sps:$4 sm:$0xff]  }
  0x57   : > { %2089 = vmatprep.mubr.bf16.mxu1 %v4969_v43  ;;  %2378 = vmatprep.mubr.bf16.mxu0 %v4971_v44  ;;  %v5053_v43 = vld [vmem:[%s5690_s26 + $0x310] ss:$28 sps:$4 sm:$0xff]   ;;  %v5054_v44 = vld [vmem:[%s5690_s26 + $0x318] ss:$28 sps:$4 sm:$0xff]  }
  0x58   : > { %2624 = vmatpush1.bf16.msra.mxu0 %v4981_v45  ;;  %4643 = vmatpush1.bf16.msra.mxu1 %v5621_v6  ;;  %v5061_v6 = vld [vmem:[%s7580_s1 + $0x150] sm:$0xff]   ;;  %v5055_v45 = vld [vmem:[%s5690_s26 + $0x34c] ss:$28 sps:$4 sm:$0xff]  }
  0x59   : > { %2625 = vmatprep.subr.bf16.mxu0 %v5563_v1  ;;  %4628 = vmatprep.subr.bf16.mxu1 %v5563_v1 }
  0x5c   : > { %2626 = vmatpush1.bf16.msra.mxu0 %v4988_v46  ;;  %4644 = vmatpush1.bf16.msra.mxu1 %v5632_v8  ;;  %v5068_v8 = vld [vmem:[%s7580_s1 + $0x158] sm:$0xff]   ;;  %v5057_v46 = vld [vmem:[%s5690_s26 + $0x354] ss:$28 sps:$4 sm:$0xff]  }
  0x5d   : > { %2627 = vmatprep.subr.bf16.mxu0 %v5563_v1  ;;  %4629 = vmatprep.subr.bf16.mxu1 %v5563_v1 }
  0x5e   : > { %2090 = vmatmul.mubr.bf16.gmra.mrb[8].mxu1 %v4973_v47  ;;  %2379 = vmatmul.mubr.bf16.gmra.mrb[8].mxu0 %v4974_v48  ;;  %v5059_v47 = vld [vmem:[%s5690_s26 + $0x348] ss:$28 sps:$4 sm:$0xff]   ;;  %v5060_v48 = vld [vmem:[%s5690_s26 + $0x350] ss:$28 sps:$4 sm:$0xff]  }
  0x5f   : > { %2097 = vmatprep.mubr.bf16.mxu1 %v4975_v49  ;;  %2386 = vmatprep.mubr.bf16.mxu0 %v4977_v50  ;;  %v5062_v49 = vld [vmem:[%s5690_s26 + $0x384] ss:$28 sps:$4 sm:$0xff]   ;;  %v5064_v50 = vld [vmem:[%s5690_s26 + $0x38c] ss:$28 sps:$4 sm:$0xff]  }
  0x60   : > { %2628 = vmatpush1.bf16.msra.mxu0 %v5001_v51  ;;  %4645 = vmatpush1.bf16.msra.mxu1 %v5643_v10  ;;  %v5002_v10 = vld [vmem:[%s5690_s26 + $0x18c] ss:$28 sps:$4 sm:$0xff]   ;;  %v5066_v51 = vld [vmem:[%s5690_s26 + $0x380] ss:$28 sps:$4 sm:$0xff]  }
  0x61   : > { %2629 = vmatprep.subr.bf16.mxu0 %v5563_v1  ;;  %4630 = vmatprep.subr.bf16.mxu1 %v5563_v1 }
  0x64   : > { %2630 = vmatpush1.bf16.msra.mxu0 %v5008_v52  ;;  %4646 = vmatpush1.bf16.msra.mxu1 %v5656_v12  ;;  %v5081_v12 = vld [vmem:[%s7580_s1 + $0x160] sm:$0xff]  }
  0x65   : > { %2631 = vmatprep.subr.bf16.mxu0 %v5563_v1  ;;  %4631 = vmatprep.subr.bf16.mxu1 %v5563_v1  ;;  %v5067_v52 = vld [vmem:[%s5690_s26 + $0x388] ss:$28 sps:$4 sm:$0xff]  }
  0x66   : > { %2098 = vmatmul.mubr.bf16.gmra.mrb[12].mxu1 %v4979_v53  ;;  %2387 = vmatmul.mubr.bf16.gmra.mrb[12].mxu0 %v4980_v54  ;;  %v5069_v53 = vld [vmem:[%s5690_s26 + $0x3bc] ss:$28 sps:$4 sm:$0xff]   ;;  %v5071_v54 = vld [vmem:[%s5690_s26 + $0x3c4] ss:$28 sps:$4 sm:$0xff]  }
  0x67   : > { %2105 = vmatprep.mubr.bf16.mxu1 %v4982_v55  ;;  %2394 = vmatprep.mubr.bf16.mxu0 %v4984_v56  ;;  %v5947_v55 = vld [vmem:[%s7580_s1 + $0x180] sm:$0xff]   ;;  %v5073_v56 = vld [vmem:[%s5690_s26 + $0x3b8] ss:$28 sps:$4 sm:$0xff]  }
  0x68   : > { %2632 = vmatpush1.bf16.msra.mxu0 %v5021_v57  ;;  %4647 = vmatpush1.bf16.msra.mxu1 %v5669_v14  ;;  %v5088_v14 = vld [vmem:[%s7580_s1 + $0x168] sm:$0xff]   ;;  %v5074_v57 = vld [vmem:[%s5690_s26 + $0x3c0] ss:$28 sps:$4 sm:$0xff]  }
  0x69   : > { %2633 = vmatprep.subr.bf16.mxu0 %v5563_v1  ;;  %4632 = vmatprep.subr.bf16.mxu1 %v5563_v1 }
  0x6c   : > { %2634 = vmatpush1.bf16.msra.mxu0 %v5028_v58  ;;  %4648 = vmatpush1.bf16.msra.mxu1 %v5681_v16  ;;  %v5009_v16 = vld [vmem:[%s5690_s26 + $0x1c4] ss:$28 sps:$4 sm:$0xff]   ;;  %v5075_v58 = vld [vmem:[%s5690_s26 + $0x3f4] ss:$28 sps:$4 sm:$0xff]  }
  0x6d   : > { %2635 = vmatprep.subr.bf16.mxu0 %v5563_v1  ;;  %4633 = vmatprep.subr.bf16.mxu1 %v5563_v1 }
  0x6e   : > { %2106 = vmatmul.mubr.bf16.gmra.mrb[16].mxu1 %v4986_v59  ;;  %2395 = vmatmul.mubr.bf16.gmra.mrb[16].mxu0 %v4987_v60  ;;  %v5077_v59 = vld [vmem:[%s5690_s26 + $0x3fc] ss:$28 sps:$4 sm:$0xff]   ;;  %v5079_v60 = vld [vmem:[%s5690_s26 + $0x3f0] ss:$28 sps:$4 sm:$0xff]  }
  0x6f   : > { %2113 = vmatprep.mubr.bf16.mxu1 %v4989_v61  ;;  %2402 = vmatprep.mubr.bf16.mxu0 %v4991_v62  ;;  %v5080_v61 = vld [vmem:[%s5690_s26 + $0x3f8] ss:$28 sps:$4 sm:$0xff]   ;;  %v5082_v62 = vld [vmem:[%s5690_s26 + $0x42c] ss:$28 sps:$4 sm:$0xff]  }
  0x70   : > { %2636 = vmatpush1.bf16.msra.mxu0 %v5041_v63  ;;  %4649 = vmatpush1.bf16.msra.mxu1 %v5697_v18  ;;  %v5101_v18 = vld [vmem:[%s7580_s1 + $0x170] sm:$0xff]  }
  0x71   : > { %2637 = vmatprep.subr.bf16.mxu0 %v5563_v1  ;;  %4634 = vmatprep.subr.bf16.mxu1 %v5563_v1  ;;  %v5084_v63 = vld [vmem:[%s5690_s26 + $0x434] ss:$28 sps:$4 sm:$0xff]  }
  0x74   : > { %2638 = vmatpush1.bf16.msra.mxu0 %v5048_v0  ;;  %4650 = vmatpush1.bf16.msra.mxu1 %v5710_v22  ;;  %v5015_v22 = vld [vmem:[%s5690_s26 + $0x1fc] ss:$28 sps:$4 sm:$0xff]   ;;  %v5086_v0 = vld [vmem:[%s5690_s26 + $0x428] ss:$28 sps:$4 sm:$0xff]  }
  0x75   : > { %2639 = vmatprep.subr.bf16.mxu0 %v5563_v1  ;;  %4635 = vmatprep.subr.bf16.mxu1 %v5563_v1 }
  0x76   : > { %2114 = vmatmul.mubr.bf16.gmra.mrb[20].mxu1 %v4993_v2  ;;  %2403 = vmatmul.mubr.bf16.gmra.mrb[20].mxu0 %v4994_v3  ;;  %v5087_v2 = vld [vmem:[%s5690_s26 + $0x430] ss:$28 sps:$4 sm:$0xff]   ;;  %v5089_v3 = vld [vmem:[%s5690_s26 + $0x464] ss:$28 sps:$4 sm:$0xff]  }
  0x77   : > { %2121 = vmatprep.mubr.bf16.mxu1 %v4995_v4  ;;  %2410 = vmatprep.mubr.bf16.mxu0 %v4997_v5  ;;  %v5091_v4 = vld [vmem:[%s5690_s26 + $0x46c] ss:$28 sps:$4 sm:$0xff]   ;;  %v5093_v5 = vld [vmem:[%s5690_s26 + $0x460] ss:$28 sps:$4 sm:$0xff]  }
  0x78   : > { %2640 = vmatpush1.bf16.msra.mxu0 %v5061_v6  ;;  %4651 = vmatpush1.bf16.msra.mxu1 %v5721_v24  ;;  %v5019_v24 = vld [vmem:[%s5690_s26 + $0x1f8] ss:$28 sps:$4 sm:$0xff]   ;;  %v5094_v6 = vld [vmem:[%s5690_s26 + $0x468] ss:$28 sps:$4 sm:$0xff]  }
  0x79   : > { %2641 = vmatprep.subr.bf16.mxu0 %v5563_v1  ;;  %4636 = vmatprep.subr.bf16.mxu1 %v5563_v1 }
  0x7c   : > { %2642 = vmatpush1.bf16.msra.mxu0 %v5068_v8  ;;  %4652 = vmatpush1.bf16.msra.mxu1 %v5732_v26  ;;  %v5022_v26 = vld [vmem:[%s5690_s26 + $0x234] ss:$28 sps:$4 sm:$0xff]   ;;  %v5097_v8 = vld [vmem:[%s5690_s26 + $0x4a4] ss:$28 sps:$4 sm:$0xff]  }
  0x7d   : > { %2643 = vmatprep.subr.bf16.mxu0 %v5563_v1  ;;  %4637 = vmatprep.subr.bf16.mxu1 %v5563_v1 }
  0x7e   : > { %2122 = vmatmul.mubr.bf16.gmra.mrb[24].mxu1 %v4999_v7  ;;  %2411 = vmatmul.mubr.bf16.gmra.mrb[24].mxu0 %v5000_v9  ;;  %v5095_v7 = vld [vmem:[%s5690_s26 + $0x49c] ss:$28 sps:$4 sm:$0xff]  }
  0x7f   : > { %2129 = vmatprep.mubr.bf16.mxu1 %v5002_v10  ;;  %2418 = vmatprep.mubr.bf16.mxu0 %v5004_v11  ;;  %v5099_v9 = vld [vmem:[%s5690_s26 + $0x498] ss:$28 sps:$4 sm:$0xff]   ;;  %v5100_v10 = vld [vmem:[%s5690_s26 + $0x4a0] ss:$28 sps:$4 sm:$0xff]  }
  0x80   : > { %2644 = vmatpush1.bf16.msra.mxu0 %v5081_v12  ;;  %4653 = vmatpush1.bf16.msra.mxu1 %v5743_v28  ;;  %v5027_v28 = vld [vmem:[%s5690_s26 + $0x238] ss:$28 sps:$4 sm:$0xff]  }
  0x81   : > { %2645 = vmatprep.subr.bf16.mxu0 %v5563_v1  ;;  %4638 = vmatprep.subr.bf16.mxu1 %v5563_v1  ;;  %v5102_v11 = vld [vmem:[%s5690_s26 + $0x4d4] ss:$28 sps:$4 sm:$0xff]   ;;  %v5104_v12 = vld [vmem:[%s5690_s26 + $0x4dc] ss:$28 sps:$4 sm:$0xff]  }
  0x84   : > { %2646 = vmatpush1.bf16.msra.mxu0 %v5088_v14  ;;  %4654 = vmatpush1.bf16.msra.mxu1 %v5754_v30  ;;  %v5031_v30 = vld [vmem:[%s5690_s26 + $0x274] ss:$28 sps:$4 sm:$0xff]  }
  0x85   : > { %2647 = vmatprep.subr.bf16.mxu0 %v5563_v1  ;;  %4639 = vmatprep.subr.bf16.mxu1 %v5563_v1  ;;  %v5107_v14 = vld [vmem:[%s5690_s26 + $0x4d8] ss:$28 sps:$4 sm:$0xff]  }
  0x86   : > { %2130 = vmatmul.mubr.bf16.gmra.mrb[28].mxu1 %v5006_v13  ;;  %2419 = vmatmul.mubr.bf16.gmra.mrb[28].mxu0 %v5007_v15  ;;  %v5106_v13 = vld [vmem:[%s5690_s26 + $0x4d0] ss:$28 sps:$4 sm:$0xff]  }
  0x87   : > { %2137 = vmatprep.mubr.bf16.mxu1 %v5009_v16  ;;  %2426 = vmatprep.mubr.bf16.mxu0 %v5011_v17  ;;  %v5109_v15 = vld [vmem:[%s5690_s26 + $0x50c] ss:$28 sps:$4 sm:$0xff]   ;;  %v5111_v16 = vld [vmem:[%s5690_s26 + $0x514] ss:$28 sps:$4 sm:$0xff]  }
  0x88   : > { %2648 = vmatpush1.bf16.msra.mxu0 %v5101_v18  ;;  %4655 = vmatpush1.bf16.msra.mxu1 %v5765_v32  ;;  %v5034_v32 = vld [vmem:[%s5690_s26 + $0x270] ss:$28 sps:$4 sm:$0xff]   ;;  %v5113_v17 = vld [vmem:[%s5690_s26 + $0x508] ss:$28 sps:$4 sm:$0xff]  }
  0x89   : > { %2649 = vmatprep.subr.bf16.mxu0 %v5563_v1  ;;  %4640 = vmatprep.subr.bf16.mxu1 %v5563_v1  ;;  %v5026_v1 = vld [vmem:[%s5690_s26 + $0x230] ss:$28 sps:$4 sm:$0xff]  }
  0x8a   : > { %v5114_v18 = vld [vmem:[%s5690_s26 + $0x510] ss:$28 sps:$4 sm:$0xff]  }
  0x8c   : > { %2650 = vmatpush1.bf16.msra.mxu0 %v5108_v20  ;;  %4656 = vmatpush1.bf16.msra.mxu1 %v5776_v34  ;;  %v5037_v34 = vld [vmem:[%s5690_s26 + $0x2ac] ss:$28 sps:$4 sm:$0xff]   ;;  %v5119_v20 = vld [vmem:[%s5690_s26 + $0x14] ss:$28 sps:$4 sm:$0xff]  }
  0x8d   : > { %4545 = vmatprep.subr.bf16.mxu1 %v5947_v55 }
  0x8e   : > { %2138 = vmatmul.mubr.bf16.gmra.mrb[32].mxu1 %v5013_v19  ;;  %2427 = vmatmul.mubr.bf16.gmra.mrb[32].mxu0 %v5014_v21  ;;  %v5115_v19 = vld [vmem:[%s5690_s26 + $0x544] ss:$28 sps:$4 sm:$0xff]  }
  0x8f   : > { %2145 = vmatprep.mubr.bf16.mxu1 %v5015_v22  ;;  %2434 = vmatprep.mubr.bf16.mxu0 %v5017_v23  ;;  %v5120_v21 = vld [vmem:[%s5690_s26 + $0x540] ss:$28 sps:$4 sm:$0xff]   ;;  %v5117_v22 = vld [vmem:[%s5690_s26 + $0x10] ss:$28 sps:$4 sm:$0xff]  }
  0x90   : > { %v5121_v23 = vld [vmem:[%s5690_s26 + $0x57c] ss:$28 sps:$4 sm:$0xff]  }
  0x96   : > { %2146 = vmatmul.mubr.bf16.gmra.mrb[36].mxu1 %v5019_v24  ;;  %2435 = vmatmul.mubr.bf16.gmra.mrb[36].mxu0 %v5020_v25  ;;  %v5123_v24 = vld [vmem:[%s5690_s26 + $0x4c] ss:$28 sps:$4 sm:$0xff]   ;;  %v5125_v25 = vld [vmem:[%s5690_s26 + $0x578] ss:$28 sps:$4 sm:$0xff]  }
  0x97   : > { %2153 = vmatprep.mubr.bf16.mxu1 %v5022_v26  ;;  %2442 = vmatprep.mubr.bf16.mxu0 %v5024_v27  ;;  %v5126_v26 = vld [vmem:[%s5690_s26 + $0x48] ss:$28 sps:$4 sm:$0xff]   ;;  %v5127_v27 = vld [vmem:[%s5690_s26 + $0x5b4] ss:$28 sps:$4 sm:$0xff]  }
  0x9e   : > { %2154 = vmatmul.mubr.bf16.gmra.mrb[40].mxu1 %v5026_v1  ;;  %2443 = vmatmul.mubr.bf16.gmra.mrb[40].mxu0 %v5027_v28  ;;  %v5129_v1 = vld [vmem:[%s5690_s26 + $0x84] ss:$28 sps:$4 sm:$0xff]   ;;  %v5131_v28 = vld [vmem:[%s5690_s26 + $0x5b0] ss:$28 sps:$4 sm:$0xff]  }
  0x9f   : > { %2161 = vmatprep.mubr.bf16.mxu1 %v5029_v29  ;;  %2450 = vmatprep.mubr.bf16.mxu0 %v5031_v30  ;;  %v5132_v29 = vld [vmem:[%s5690_s26 + $0x80] ss:$28 sps:$4 sm:$0xff]   ;;  %v5133_v30 = vld [vmem:[%s5690_s26 + $0x5ec] ss:$28 sps:$4 sm:$0xff]  }
  0xa6   : > { %2162 = vmatmul.mubr.bf16.gmra.mrb[44].mxu1 %v5033_v31  ;;  %2451 = vmatmul.mubr.bf16.gmra.mrb[44].mxu0 %v5034_v32  ;;  %v5135_v31 = vld [vmem:[%s5690_s26 + $0xbc] ss:$28 sps:$4 sm:$0xff]  }
  0xa7   : > { %2169 = vmatprep.mubr.bf16.mxu1 %v5035_v33  ;;  %2458 = vmatprep.mubr.bf16.mxu0 %v5037_v34  ;;  %v5137_v34 = vld [vmem:[%s5690_s26 + $0x5e8] ss:$28 sps:$4 sm:$0xff]  }
  0xae   : > { %2170 = vmatmul.mubr.bf16.gmra.mrb[48].mxu1 %v5039_v35  ;;  %2459 = vmatmul.mubr.bf16.gmra.mrb[48].mxu0 %v5040_v36  ;;  %v5138_v36 = vld [vmem:[%s5690_s26 + $0xb8] ss:$28 sps:$4 sm:$0xff]  }
  0xaf   : > { %2177 = vmatprep.mubr.bf16.mxu1 %v5042_v37  ;;  %2466 = vmatprep.mubr.bf16.mxu0 %v5044_v38  ;;  %v5139_v37 = vld [vmem:[%s5690_s26 + $0x624] ss:$28 sps:$4 sm:$0xff]  }
  0xb6   : > { %2178 = vmatmul.mubr.bf16.gmra.mrb[52].mxu1 %v5046_v39  ;;  %2467 = vmatmul.mubr.bf16.gmra.mrb[52].mxu0 %v5047_v40  ;;  %v5141_v39 = vld [vmem:[%s5690_s26 + $0xf4] ss:$28 sps:$4 sm:$0xff]  }
  0xb7   : > { %2185 = vmatprep.mubr.bf16.mxu1 %v5049_v41  ;;  %2474 = vmatprep.mubr.bf16.mxu0 %v5051_v42  ;;  %v5143_v42 = vld [vmem:[%s5690_s26 + $0x620] ss:$28 sps:$4 sm:$0xff]  }
  0xbe   : > { %2186 = vmatmul.mubr.bf16.gmra.mrb[56].mxu1 %v5053_v43  ;;  %2475 = vmatmul.mubr.bf16.gmra.mrb[56].mxu0 %v5054_v44  ;;  %v5144_v44 = vld [vmem:[%s5690_s26 + $0xf0] ss:$28 sps:$4 sm:$0xff]  }
  0xbf   : > { %2193 = vmatprep.mubr.bf16.mxu1 %v5055_v45  ;;  %2482 = vmatprep.mubr.bf16.mxu0 %v5057_v46  ;;  %v5145_v45 = vld [vmem:[%s5690_s26 + $0x65c] ss:$28 sps:$4 sm:$0xff]  }
  0xc6   : > { %2194 = vmatmul.mubr.bf16.gmra.mrb[60].mxu1 %v5059_v47  ;;  %2483 = vmatmul.mubr.bf16.gmra.mrb[60].mxu0 %v5060_v48  ;;  %v5147_v47 = vld [vmem:[%s5690_s26 + $0x12c] ss:$28 sps:$4 sm:$0xff]  }
  0xc7   : > { %2201 = vmatprep.mubr.bf16.mxu1 %v5062_v49  ;;  %2490 = vmatprep.mubr.bf16.mxu0 %v5064_v50  ;;  %v5149_v50 = vld [vmem:[%s5690_s26 + $0x658] ss:$28 sps:$4 sm:$0xff]  }
  0xce   : > { %2202 = vmatmul.mubr.bf16.gmra.mrb[64].mxu1 %v5066_v51  ;;  %2491 = vmatmul.mubr.bf16.gmra.mrb[64].mxu0 %v5067_v52  ;;  %v5150_v52 = vld [vmem:[%s5690_s26 + $0x128] ss:$28 sps:$4 sm:$0xff]  }
  0xcf   : > { %2209 = vmatprep.mubr.bf16.mxu1 %v5069_v53  ;;  %2498 = vmatprep.mubr.bf16.mxu0 %v5071_v54  ;;  %v5151_v53 = vld [vmem:[%s5690_s26 + $0x694] ss:$28 sps:$4 sm:$0xff]  }
  0xd6   : > { %2210 = vmatmul.mubr.bf16.gmra.mrb[68].mxu1 %v5073_v56  ;;  %2499 = vmatmul.mubr.bf16.gmra.mrb[68].mxu0 %v5074_v57  ;;  %v5153_v56 = vld [vmem:[%s5690_s26 + $0x164] ss:$28 sps:$4 sm:$0xff]  }
  0xd7   : > { %2217 = vmatprep.mubr.bf16.mxu1 %v5075_v58  ;;  %2506 = vmatprep.mubr.bf16.mxu0 %v5077_v59  ;;  %v5155_v59 = vld [vmem:[%s5690_s26 + $0x690] ss:$28 sps:$4 sm:$0xff]  }
  0xde   : > { %2218 = vmatmul.mubr.bf16.gmra.mrb[72].mxu1 %v5079_v60  ;;  %2507 = vmatmul.mubr.bf16.gmra.mrb[72].mxu0 %v5080_v61  ;;  %v5156_v61 = vld [vmem:[%s5690_s26 + $0x160] ss:$28 sps:$4 sm:$0xff]  }
  0xdf   : > { %2225 = vmatprep.mubr.bf16.mxu1 %v5082_v62  ;;  %2514 = vmatprep.mubr.bf16.mxu0 %v5084_v63  ;;  %v5157_v62 = vld [vmem:[%s5690_s26 + $0x6cc] ss:$28 sps:$4 sm:$0xff]  }
  0xe6   : > { %2226 = vmatmul.mubr.bf16.gmra.mrb[76].mxu1 %v5086_v0  ;;  %2515 = vmatmul.mubr.bf16.gmra.mrb[76].mxu0 %v5087_v2  ;;  %v5159_v0 = vld [vmem:[%s5690_s26 + $0x19c] ss:$28 sps:$4 sm:$0xff]  }
  0xe7   : > { %2233 = vmatprep.mubr.bf16.mxu1 %v5089_v3  ;;  %2522 = vmatprep.mubr.bf16.mxu0 %v5091_v4  ;;  %v5161_v4 = vld [vmem:[%s5690_s26 + $0x6c8] ss:$28 sps:$4 sm:$0xff]  }
  0xee   : > { %2234 = vmatmul.mubr.bf16.gmra.mrb[80].mxu1 %v5093_v5  ;;  %2523 = vmatmul.mubr.bf16.gmra.mrb[80].mxu0 %v5094_v6  ;;  %v5162_v6 = vld [vmem:[%s5690_s26 + $0x198] ss:$28 sps:$4 sm:$0xff]  }
  0xef   : > { %2241 = vmatprep.mubr.bf16.mxu1 %v5095_v7  ;;  %2530 = vmatprep.mubr.bf16.mxu0 %v5097_v8  ;;  %v5165_v7 = vld [vmem:[%s5690_s26 + $0x54c] ss:$28 sps:$4 sm:$0xff]  }
  0xf6   : > { %2242 = vmatmul.mubr.bf16.gmra.mrb[84].mxu1 %v5099_v9  ;;  %2531 = vmatmul.mubr.bf16.gmra.mrb[84].mxu0 %v5100_v10  ;;  %v5166_v9 = vld [vmem:[%s5690_s26 + $0x1d4] ss:$28 sps:$4 sm:$0xff]  }
  0xf7   : > { %2249 = vmatprep.mubr.bf16.mxu1 %v5102_v11  ;;  %2538 = vmatprep.mubr.bf16.mxu0 %v5104_v12  ;;  %v5163_v12 = vld [vmem:[%s5690_s26 + $0x548] ss:$28 sps:$4 sm:$0xff]  }
  0xfe   : > { %2250 = vmatmul.mubr.bf16.gmra.mrb[88].mxu1 %v5106_v13  ;;  %2539 = vmatmul.mubr.bf16.gmra.mrb[88].mxu0 %v5107_v14  ;;  %v5168_v14 = vld [vmem:[%s5690_s26 + $0x1d0] ss:$28 sps:$4 sm:$0xff]  }
  0xff   : > { %2257 = vmatprep.mubr.bf16.mxu1 %v5109_v15  ;;  %2546 = vmatprep.mubr.bf16.mxu0 %v5111_v16  ;;  %v5170_v16 = vld [vmem:[%s5690_s26 + $0x584] ss:$28 sps:$4 sm:$0xff]  }
 0x106   : > { %2258 = vmatmul.mubr.bf16.gmra.mrb[92].mxu1 %v5113_v17  ;;  %2547 = vmatmul.mubr.bf16.gmra.mrb[92].mxu0 %v5114_v18  ;;  %v5172_v17 = vld [vmem:[%s5690_s26 + $0x20c] ss:$28 sps:$4 sm:$0xff]  }
 0x107   : > { %2265 = vmatprep.mubr.bf16.mxu1 %v5115_v19  ;;  %2651 = vmatprep.mubr.bf16.mxu0 %v5119_v20  ;;  %v5176_v18 = vld [vmem:[%s7580_s1 + $0x188] sm:$0xff]   ;;  %v5183_v19 = vld [vmem:[%s7580_s1 + $0x190] sm:$0xff]  }
 0x10e   : > { %2266 = vmatmul.mubr.bf16.gmra.mrb[96].mxu1 %v5120_v21  ;;  %2652 = vmatmul.mubr.bf16.vlgmr.msra.gmra.mrb[0].mxu0 %v5117_v22  ;;  %v5174_v22 = vld [vmem:[%s5690_s26 + $0x580] ss:$28 sps:$4 sm:$0xff]  }
 0x10f   : > { %2273 = vmatprep.mubr.bf16.mxu1 %v5121_v23  ;;  %2659 = vmatprep.mubr.bf16.mxu0 %v5123_v24  ;;  %v5175_v24 = vld [vmem:[%s5690_s26 + $0x208] ss:$28 sps:$4 sm:$0xff]  }
 0x116   : > { %2274 = vmatmul.mubr.bf16.gmra.mrb[100].mxu1 %v5125_v25  ;;  %2660 = vmatmul.mubr.bf16.gmra.mrb[4].mxu0 %v5126_v26  ;;  %v5177_v25 = vld [vmem:[%s5690_s26 + $0x5bc] ss:$28 sps:$4 sm:$0xff]  }
 0x117   : > { %2281 = vmatprep.mubr.bf16.mxu1 %v5127_v27  ;;  %2667 = vmatprep.mubr.bf16.mxu0 %v5129_v1  ;;  %v5190_v27 = vld [vmem:[%s7580_s1 + $0x198] sm:$0xff]  }
 0x11e   : > { %2282 = vmatmul.mubr.bf16.gmra.mrb[104].mxu1 %v5131_v28  ;;  %2668 = vmatmul.mubr.bf16.gmra.mrb[8].mxu0 %v5132_v29  ;;  %v5197_v28 = vld [vmem:[%s7580_s1 + $0x1a0] sm:$0xff]  }
 0x11f   : > { %2289 = vmatprep.mubr.bf16.mxu1 %v5133_v30  ;;  %2675 = vmatprep.mubr.bf16.mxu0 %v5135_v31  ;;  %v5181_v30 = vld [vmem:[%s5690_s26 + $0x5b8] ss:$28 sps:$4 sm:$0xff]  }
 0x121   : > { %v5990_v32 = vpop.f32.mrb[0].mxu1 }
 0x122   : > { %v2077_v33 = vpop.f32.mrb[1].mxu1 }
 0x123   : > { %v5993_v35 = vpop.f32.mrb[2].mxu1  ;;  %v5182_v33 = vld [vmem:[%s5690_s26 + $0x240] ss:$28 sps:$4 sm:$0xff]  }
 0x124   : > { %v2080_v38 = vpop.f32.mrb[3].mxu1 }
 0x125   : > { %v5204_v38 = vld [vmem:[%s7580_s1 + $0x1a8] sm:$0xff]  }
 0x126   : > { %2290 = vmatmul.mubr.bf16.gmra.mrb[108].mxu1 %v5137_v34  ;;  %2676 = vmatmul.mubr.bf16.gmra.mrb[12].mxu0 %v5138_v36  ;;  %v5184_v34 = vld [vmem:[%s5690_s26 + $0x5f4] ss:$28 sps:$4 sm:$0xff]  }
 0x127   : > { %2297 = vmatprep.mubr.bf16.mxu1 %v5139_v37  ;;  %2683 = vmatprep.mubr.bf16.mxu0 %v5141_v39  ;;  %v5186_v37 = vld [vmem:[%s5690_s26 + $0x27c] ss:$28 sps:$4 sm:$0xff]  }
 0x129   : > { %v5998_v40 = vpop.f32.mrb[4].mxu1 }
 0x12a   : > { %v2085_v41 = vpop.f32.mrb[5].mxu1 }
 0x12b   : > { %v6001_v43 = vpop.f32.mrb[6].mxu1  ;;  %v5211_v41 = vld [vmem:[%s7580_s1 + $0x1b0] sm:$0xff]  }
 0x12c   : > { %v2088_v46 = vpop.f32.mrb[7].mxu1 }
 0x12d   : > { %v5189_v46 = vld [vmem:[%s5690_s26 + $0x278] ss:$28 sps:$4 sm:$0xff]  }
 0x12e   : > { %2298 = vmatmul.mubr.bf16.gmra.mrb[112].mxu1 %v5143_v42  ;;  %2684 = vmatmul.mubr.bf16.gmra.mrb[16].mxu0 %v5144_v44  ;;  %v5188_v44 = vld [vmem:[%s5690_s26 + $0x5f0] ss:$28 sps:$4 sm:$0xff]  }
 0x12f   : > { %2305 = vmatprep.mubr.bf16.mxu1 %v5145_v45  ;;  %2691 = vmatprep.mubr.bf16.mxu0 %v5147_v47  ;;  %v5191_v47 = vld [vmem:[%s5690_s26 + $0x62c] ss:$28 sps:$4 sm:$0xff]  }
 0x131   : > { %v6006_v48 = vpop.f32.mrb[8].mxu1 }
 0x132   : > { %v2093_v49 = vpop.f32.mrb[9].mxu1 }
 0x133   : > { %v6009_v51 = vpop.f32.mrb[10].mxu1 }
 0x134   : > { %v2096_v54 = vpop.f32.mrb[11].mxu1 }
 0x136   : > { %2306 = vmatmul.mubr.bf16.gmra.mrb[116].mxu1 %v5149_v50  ;;  %2692 = vmatmul.mubr.bf16.gmra.mrb[20].mxu0 %v5150_v52  ;;  %v5193_v50 = vld [vmem:[%s5690_s26 + $0x2b4] ss:$28 sps:$4 sm:$0xff]   ;;  %v5218_v52 = vld [vmem:[%s7580_s1 + $0x1b8] sm:$0xff]  }
 0x137   : > { %2313 = vmatprep.mubr.bf16.mxu1 %v5151_v53  ;;  %2699 = vmatprep.mubr.bf16.mxu0 %v5153_v56  ;;  %v5195_v56 = vld [vmem:[%s5690_s26 + $0x628] ss:$28 sps:$4 sm:$0xff]  }
 0x139   : > { %v6014_v57 = vpop.f32.mrb[12].mxu1 }
 0x13a   : > { %v2101_v58 = vpop.f32.mrb[13].mxu1 }
 0x13b   : > { %v6017_v60 = vpop.f32.mrb[14].mxu1 }
 0x13c   : > { %v2104_v63 = vpop.f32.mrb[15].mxu1 }
 0x13d   : > { %v5200_v63 = vld [vmem:[%s5690_s26 + $0x2ec] ss:$28 sps:$4 sm:$0xff]  }
 0x13e   : > { %2314 = vmatmul.mubr.bf16.gmra.mrb[120].mxu1 %v5155_v59  ;;  %2700 = vmatmul.mubr.bf16.gmra.mrb[24].mxu0 %v5156_v61  ;;  %v5196_v59 = vld [vmem:[%s5690_s26 + $0x2b0] ss:$28 sps:$4 sm:$0xff]   ;;  %v5198_v61 = vld [vmem:[%s5690_s26 + $0x664] ss:$28 sps:$4 sm:$0xff]  }
 0x13f   : > { %2321 = vmatprep.mubr.bf16.mxu1 %v5157_v62  ;;  %2707 = vmatprep.mubr.bf16.mxu0 %v5159_v0 }
 0x141   : > { %v6022_v2 = vpop.f32.mrb[16].mxu1 }
 0x142   : > { %v2109_v3 = vpop.f32.mrb[17].mxu1 }
 0x143   : > { %v6025_v5 = vpop.f32.mrb[18].mxu1 }
 0x144   : > { %v2112_v8 = vpop.f32.mrb[19].mxu1 }
 0x145   : > { %v5205_v8 = vld [vmem:[%s5690_s26 + $0x69c] ss:$28 sps:$4 sm:$0xff]  }
 0x146   : > { %2322 = vmatmul.mubr.bf16.gmra.mrb[124].mxu1 %v5161_v4  ;;  %2708 = vmatmul.mubr.bf16.gmra.mrb[28].mxu0 %v5162_v6  ;;  %v5202_v4 = vld [vmem:[%s5690_s26 + $0x660] ss:$28 sps:$4 sm:$0xff]  }
 0x147   : > { %2554 = vmatprep.mubr.bf16.mxu1 %v5165_v7  ;;  %2715 = vmatprep.mubr.bf16.mxu0 %v5166_v9  ;;  %v5203_v7 = vld [vmem:[%s5690_s26 + $0x2e8] ss:$28 sps:$4 sm:$0xff]  }
 0x149   : > { %v6030_v10 = vpop.f32.mrb[20].mxu1 }
 0x14a   : > { %v2117_v11 = vpop.f32.mrb[21].mxu1 }
 0x14b   : > { %v6033_v13 = vpop.f32.mrb[22].mxu1  ;;  %v5207_v11 = vld [vmem:[%s5690_s26 + $0x324] ss:$28 sps:$4 sm:$0xff]  }
 0x14c   : > { %v2120_v15 = vpop.f32.mrb[23].mxu1 }
 0x14d   : > { %v5209_v15 = vld [vmem:[%s5690_s26 + $0x698] ss:$28 sps:$4 sm:$0xff]  }
 0x14e   : > { %2555 = vmatmul.mubr.bf16.vlgmr.msra.gmra.mrb[96].mxu1 %v5163_v12  ;;  %2716 = vmatmul.mubr.bf16.gmra.mrb[32].mxu0 %v5168_v14 }
 0x14f   : > { %4546 = vmatpush3.bf16.msra.mxu1 %v5947_v55  ;;  %2562 = vmatprep.mubr.bf16.mxu1 %v5170_v16  ;;  %v5179_v55 = vld [vmem:[%s5690_s26 + $0x244] ss:$28 sps:$4 sm:$0xff]  }
 0x150   : > { %2723 = vmatprep.mubr.bf16.mxu0 %v5172_v17  ;;  %4547 = vmatprep.subr.bf16.mxu1 %v5176_v18  ;;  %v5210_v17 = vld [vmem:[%s5690_s26 + $0x320] ss:$28 sps:$4 sm:$0xff]  }
 0x151   : > { %v6045_v20 = vpop.f32.mrb[24].mxu1 }
 0x152   : > { %v2125_v21 = vpop.f32.mrb[25].mxu1 }
 0x153   : > { %v6048_v23 = vpop.f32.mrb[26].mxu1  ;;  %4548 = vmatpush3.bf16.msra.mxu1 %v5176_v18  ;;  %v5212_v18 = vld [vmem:[%s5690_s26 + $0x6d4] ss:$28 sps:$4 sm:$0xff]   ;;  %v5214_v21 = vld [vmem:[%s5690_s26 + $0x35c] ss:$28 sps:$4 sm:$0xff]  }
 0x154   : > { %v2128_v26 = vpop.f32.mrb[27].mxu1  ;;  %4549 = vmatprep.subr.bf16.mxu1 %v5183_v19 }
 0x156   : > { %2563 = vmatmul.mubr.bf16.gmra.mrb[100].mxu1 %v5174_v22  ;;  %2724 = vmatmul.mubr.bf16.gmra.mrb[36].mxu0 %v5175_v24 }
 0x157   : > { %2570 = vmatprep.mubr.bf16.mxu1 %v5177_v25  ;;  %2731 = vmatprep.mubr.bf16.mxu0 %v5179_v55  ;;  %v5216_v25 = vld [vmem:[%s5690_s26 + $0x6d0] ss:$28 sps:$4 sm:$0xff]   ;;  %v5217_v55 = vld [vmem:[%s5690_s26 + $0x358] ss:$28 sps:$4 sm:$0xff]  }
 0x158   : > { %4550 = vmatpush3.bf16.msra.mxu1 %v5183_v19 }
 0x159   : > { %v6056_v1 = vpop.f32.mrb[28].mxu1  ;;  %4551 = vmatprep.subr.bf16.mxu1 %v5190_v27 }
 0x15a   : > { %v2133_v29 = vpop.f32.mrb[29].mxu1 }
 0x15b   : > { %v6062_v31 = vpop.f32.mrb[30].mxu1  ;;  %v5219_v29 = vld [vmem:[%s5690_s26 + $0x394] ss:$28 sps:$4 sm:$0xff]  }
 0x15c   : > { %v2136_v36 = vpop.f32.mrb[31].mxu1  ;;  %4552 = vmatpush3.bf16.msra.mxu1 %v5190_v27  ;;  %v5221_v27 = vld [vmem:[%s5690_s26 + $0x18] ss:$28 sps:$4 sm:$0xff]  }
 0x15d   : > { %4553 = vmatprep.subr.bf16.mxu1 %v5197_v28 }
 0x15e   : > { %2571 = vmatmul.mubr.bf16.gmra.mrb[104].mxu1 %v5181_v30  ;;  %2732 = vmatmul.mubr.bf16.gmra.mrb[40].mxu0 %v5182_v33 }
 0x15f   : > { %2578 = vmatprep.mubr.bf16.mxu1 %v5184_v34  ;;  %2739 = vmatprep.mubr.bf16.mxu0 %v5186_v37  ;;  %v5223_v34 = vld [vmem:[%s5690_s26 + $0x50] ss:$28 sps:$4 sm:$0xff]  }
 0x160   : > { %4554 = vmatpush3.bf16.msra.mxu1 %v5197_v28  ;;  %v5222_v37 = vld [vmem:[%s5690_s26 + $0x390] ss:$28 sps:$4 sm:$0xff]  }
 0x161   : > { %v6070_v39 = vpop.f32.mrb[32].mxu1  ;;  %4555 = vmatprep.subr.bf16.mxu1 %v5204_v38 }
 0x162   : > { %v2141_v42 = vpop.f32.mrb[33].mxu1 }
 0x163   : > { %v6076_v45 = vpop.f32.mrb[34].mxu1  ;;  %v5224_v42 = vld [vmem:[%s5690_s26 + $0x3cc] ss:$28 sps:$4 sm:$0xff]  }
 0x164   : > { %v2144_v49 = vpop.f32.mrb[35].mxu1  ;;  %4556 = vmatpush3.bf16.msra.mxu1 %v5204_v38  ;;  %v5226_v38 = vld [vmem:[%s5690_s26 + $0x88] ss:$28 sps:$4 sm:$0xff]  }
 0x165   : > { %4557 = vmatprep.subr.bf16.mxu1 %v5211_v41 }
 0x166   : > { %2579 = vmatmul.mubr.bf16.gmra.mrb[108].mxu1 %v5188_v44  ;;  %2740 = vmatmul.mubr.bf16.gmra.mrb[44].mxu0 %v5189_v46 }
 0x167   : > { %2586 = vmatprep.mubr.bf16.mxu1 %v5191_v47  ;;  %2747 = vmatprep.mubr.bf16.mxu0 %v5193_v50  ;;  %v5228_v47 = vld [vmem:[%s5690_s26 + $0xc0] ss:$28 sps:$4 sm:$0xff]   ;;  %v5227_v50 = vld [vmem:[%s5690_s26 + $0x3c8] ss:$28 sps:$4 sm:$0xff]  }
 0x168   : > { %4558 = vmatpush3.bf16.msra.mxu1 %v5211_v41 }
 0x169   : > { %v6084_v53 = vpop.f32.mrb[36].mxu1  ;;  %4559 = vmatprep.subr.bf16.mxu1 %v5218_v52 }
 0x16a   : > { %v2149_v54 = vpop.f32.mrb[37].mxu1 }
 0x16b   : > { %v6087_v58 = vpop.f32.mrb[38].mxu1 }
 0x16c   : > { %v2152_v62 = vpop.f32.mrb[39].mxu1  ;;  %4560 = vmatpush3.bf16.msra.mxu1 %v5218_v52  ;;  %v5231_v52 = vld [vmem:[%s5690_s26 + $0xf8] ss:$28 sps:$4 sm:$0xff]  }
 0x16d   : > { %v5233_v62 = vld [vmem:[%s5690_s26 + $0x130] ss:$28 sps:$4 sm:$0xff]  }
 0x16e   : > { %2587 = vmatmul.mubr.bf16.gmra.mrb[112].mxu1 %v5195_v56  ;;  %2748 = vmatmul.mubr.bf16.gmra.mrb[48].mxu0 %v5196_v59  ;;  %v5229_v56 = vld [vmem:[%s5690_s26 + $0x404] ss:$28 sps:$4 sm:$0xff]  }
 0x16f   : > { %2594 = vmatprep.mubr.bf16.mxu1 %v5198_v61  ;;  %2755 = vmatprep.mubr.bf16.mxu0 %v5200_v63 }
 0x171   : > { %v6092_v0 = vpop.f32.mrb[40].mxu1 }
 0x172   : > { %v2157_v3 = vpop.f32.mrb[41].mxu1 }
 0x173   : > { %v6095_v6 = vpop.f32.mrb[42].mxu1  ;;  %v5232_v3 = vld [vmem:[%s5690_s26 + $0x400] ss:$28 sps:$4 sm:$0xff]  }
 0x174   : > { %v2160_v9 = vpop.f32.mrb[43].mxu1 }
 0x176   : > { %2595 = vmatmul.mubr.bf16.gmra.mrb[116].mxu1 %v5202_v4  ;;  %2756 = vmatmul.mubr.bf16.gmra.mrb[52].mxu0 %v5203_v7  ;;  %v5236_v4 = vld [vmem:[%s5690_s26 + $0x168] ss:$28 sps:$4 sm:$0xff]  }
 0x177   : > { %2602 = vmatprep.mubr.bf16.mxu1 %v5205_v8  ;;  %2763 = vmatprep.mubr.bf16.mxu0 %v5207_v11  ;;  %v5234_v8 = vld [vmem:[%s5690_s26 + $0x43c] ss:$28 sps:$4 sm:$0xff]  }
 0x179   : > { %v6100_v12 = vpop.f32.mrb[44].mxu1 }
 0x17a   : > { %v2165_v14 = vpop.f32.mrb[45].mxu1 }
 0x17b   : > { %v6103_v16 = vpop.f32.mrb[46].mxu1  ;;  %v5238_v14 = vld [vmem:[%s5690_s26 + $0x1a0] ss:$28 sps:$4 sm:$0xff]  }
 0x17c   : > { %v2168_v19 = vpop.f32.mrb[47].mxu1 }
 0x17e   : > { %2603 = vmatmul.mubr.bf16.gmra.mrb[120].mxu1 %v5209_v15  ;;  %2764 = vmatmul.mubr.bf16.gmra.mrb[56].mxu0 %v5210_v17  ;;  %v5237_v17 = vld [vmem:[%s5690_s26 + $0x438] ss:$28 sps:$4 sm:$0xff]  }
 0x17f   : > { %2610 = vmatprep.mubr.bf16.mxu1 %v5212_v18  ;;  %2771 = vmatprep.mubr.bf16.mxu0 %v5214_v21  ;;  %v5241_v18 = vld [vmem:[%s5690_s26 + $0x1d8] ss:$28 sps:$4 sm:$0xff]  }
 0x180   : > { %v5239_v21 = vld [vmem:[%s5690_s26 + $0x474] ss:$28 sps:$4 sm:$0xff]  }
 0x181   : > { %v6108_v22 = vpop.f32.mrb[48].mxu1 }
 0x182   : > { %v2173_v24 = vpop.f32.mrb[49].mxu1 }
 0x183   : > { %v6111_v26 = vpop.f32.mrb[50].mxu1 }
 0x184   : > { %v2176_v28 = vpop.f32.mrb[51].mxu1 }
 0x185   : > { %v5242_v28 = vld [vmem:[%s5690_s26 + $0x470] ss:$28 sps:$4 sm:$0xff]  }
 0x186   : > { %2611 = vmatmul.mubr.bf16.gmra.mrb[124].mxu1 %v5216_v25  ;;  %2772 = vmatmul.mubr.bf16.gmra.mrb[60].mxu0 %v5217_v55  ;;  %v5243_v55 = vld [vmem:[%s5690_s26 + $0x210] ss:$28 sps:$4 sm:$0xff]  }
 0x187   : > { %4561 = vmatprep.mubr.bf16.mxu1 %v5221_v27  ;;  %2779 = vmatprep.mubr.bf16.mxu0 %v5219_v29  ;;  %v5246_v29 = vld [vmem:[%s5690_s26 + $0x248] ss:$28 sps:$4 sm:$0xff]  }
 0x189   : > { %v6116_v30 = vpop.f32.mrb[52].mxu1 }
 0x18a   : > { %v2181_v33 = vpop.f32.mrb[53].mxu1 }
 0x18b   : > { %v6119_v36 = vpop.f32.mrb[54].mxu1 }
 0x18c   : > { %v2184_v41 = vpop.f32.mrb[55].mxu1 }
 0x18d   : > { %v5248_v41 = vld [vmem:[%s5690_s26 + $0x280] ss:$28 sps:$4 sm:$0xff]  }
 0x18e   : > { %4562 = vmatmul.mubr.bf16.vlgmr.msra.gmra.mrb[128].mxu1 %v5223_v34  ;;  %2780 = vmatmul.mubr.bf16.gmra.mrb[64].mxu0 %v5222_v37  ;;  %v5244_v34 = vld [vmem:[%s5690_s26 + $0x4ac] ss:$28 sps:$4 sm:$0xff]  }
 0x18f   : > { %4565 = vmatprep.mubr.bf16.mxu1 %v5226_v38  ;;  %2787 = vmatprep.mubr.bf16.mxu0 %v5224_v42 }
 0x191   : > { %v6124_v44 = vpop.f32.mrb[56].mxu1 }
 0x192   : > { %v2189_v46 = vpop.f32.mrb[57].mxu1 }
 0x193   : > { %v6127_v49 = vpop.f32.mrb[58].mxu1  ;;  %v5247_v46 = vld [vmem:[%s5690_s26 + $0x4a8] ss:$28 sps:$4 sm:$0xff]  }
 0x194   : > { %v2192_v54 = vpop.f32.mrb[59].mxu1 }
 0x196   : > { %4566 = vmatmul.mubr.bf16.gmra.mrb[132].mxu1 %v5228_v47  ;;  %2788 = vmatmul.mubr.bf16.gmra.mrb[68].mxu0 %v5227_v50  ;;  %v5251_v47 = vld [vmem:[%s5690_s26 + $0x2b8] ss:$28 sps:$4 sm:$0xff]  }
 0x197   : > { %4569 = vmatprep.mubr.bf16.mxu1 %v5231_v52  ;;  %2795 = vmatprep.mubr.bf16.mxu0 %v5229_v56  ;;  %v5249_v52 = vld [vmem:[%s5690_s26 + $0x4e4] ss:$28 sps:$4 sm:$0xff]  }
 0x199   : > { %v6132_v59 = vpop.f32.mrb[60].mxu1 }
 0x19a   : > { %v2197_v61 = vpop.f32.mrb[61].mxu1 }
 0x19b   : > { %v6135_v63 = vpop.f32.mrb[62].mxu1  ;;  %v5253_v61 = vld [vmem:[%s5690_s26 + $0x2f0] ss:$28 sps:$4 sm:$0xff]  }
 0x19c   : > { %v2200_v7 = vpop.f32.mrb[63].mxu1 }
 0x19e   : > { %4570 = vmatmul.mubr.bf16.gmra.mrb[136].mxu1 %v5233_v62  ;;  %2796 = vmatmul.mubr.bf16.gmra.mrb[72].mxu0 %v5232_v3  ;;  %v5252_v3 = vld [vmem:[%s5690_s26 + $0x4e0] ss:$28 sps:$4 sm:$0xff]  }
 0x19f   : > { %4573 = vmatprep.mubr.bf16.mxu1 %v5236_v4  ;;  %2803 = vmatprep.mubr.bf16.mxu0 %v5234_v8  ;;  %v5256_v4 = vld [vmem:[%s5690_s26 + $0x328] ss:$28 sps:$4 sm:$0xff]   ;;  %v5254_v8 = vld [vmem:[%s5690_s26 + $0x51c] ss:$28 sps:$4 sm:$0xff]  }
 0x1a1   : > { %v6140_v9 = vpop.f32.mrb[64].mxu1 }
 0x1a2   : > { %v2205_v11 = vpop.f32.mrb[65].mxu1 }
 0x1a3   : > { %v6143_v15 = vpop.f32.mrb[66].mxu1 }
 0x1a4   : > { %v2208_v19 = vpop.f32.mrb[67].mxu1 }
 0x1a5   : > { %v5257_v19 = vld [vmem:[%s5690_s26 + $0x518] ss:$28 sps:$4 sm:$0xff]  }
 0x1a6   : > { %4574 = vmatmul.mubr.bf16.gmra.mrb[140].mxu1 %v5238_v14  ;;  %2804 = vmatmul.mubr.bf16.gmra.mrb[76].mxu0 %v5237_v17  ;;  %v5258_v17 = vld [vmem:[%s5690_s26 + $0x360] ss:$28 sps:$4 sm:$0xff]  }
 0x1a7   : > { %4577 = vmatprep.mubr.bf16.mxu1 %v5241_v18  ;;  %2811 = vmatprep.mubr.bf16.mxu0 %v5239_v21  ;;  %v5261_v21 = vld [vmem:[%s5690_s26 + $0x398] ss:$28 sps:$4 sm:$0xff]  }
 0x1a9   : > { %v6148_v24 = vpop.f32.mrb[68].mxu1 }
 0x1aa   : > { %v2213_v25 = vpop.f32.mrb[69].mxu1 }
 0x1ab   : > { %v6151_v27 = vpop.f32.mrb[70].mxu1 }
 0x1ac   : > { %v2216_v33 = vpop.f32.mrb[71].mxu1 }
 0x1ad   : > { %v5263_v33 = vld [vmem:[%s5690_s26 + $0x3d0] ss:$28 sps:$4 sm:$0xff]  }
 0x1ae   : > { %4578 = vmatmul.mubr.bf16.gmra.mrb[144].mxu1 %v5243_v55  ;;  %2812 = vmatmul.mubr.bf16.gmra.mrb[80].mxu0 %v5242_v28  ;;  %v5259_v55 = vld [vmem:[%s5690_s26 + $0x554] ss:$28 sps:$4 sm:$0xff]  }
 0x1af   : > { %4581 = vmatprep.mubr.bf16.mxu1 %v5246_v29  ;;  %2819 = vmatprep.mubr.bf16.mxu0 %v5244_v34 }
 0x1b1   : > { %v6156_v37 = vpop.f32.mrb[72].mxu1 }
 0x1b2   : > { %v2221_v38 = vpop.f32.mrb[73].mxu1 }
 0x1b3   : > { %v6159_v42 = vpop.f32.mrb[74].mxu1  ;;  %v5262_v38 = vld [vmem:[%s5690_s26 + $0x550] ss:$28 sps:$4 sm:$0xff]  }
 0x1b4   : > { %v2224_v50 = vpop.f32.mrb[75].mxu1 }
 0x1b6   : > { %4582 = vmatmul.mubr.bf16.gmra.mrb[148].mxu1 %v5248_v41  ;;  %2820 = vmatmul.mubr.bf16.gmra.mrb[84].mxu0 %v5247_v46  ;;  %v5266_v41 = vld [vmem:[%s5690_s26 + $0x408] ss:$28 sps:$4 sm:$0xff]  }
 0x1b7   : > { %4585 = vmatprep.mubr.bf16.mxu1 %v5251_v47  ;;  %2827 = vmatprep.mubr.bf16.mxu0 %v5249_v52  ;;  %v5264_v47 = vld [vmem:[%s5690_s26 + $0x58c] ss:$28 sps:$4 sm:$0xff]  }
 0x1b9   : > { %v6164_v54 = vpop.f32.mrb[76].mxu1 }
 0x1ba   : > { %v2229_v56 = vpop.f32.mrb[77].mxu1 }
 0x1bb   : > { %v6167_v62 = vpop.f32.mrb[78].mxu1  ;;  %v5268_v56 = vld [vmem:[%s5690_s26 + $0x440] ss:$28 sps:$4 sm:$0xff]  }
 0x1bc   : > { %v2232_v7 = vpop.f32.mrb[79].mxu1 }
 0x1be   : > { %4586 = vmatmul.mubr.bf16.gmra.mrb[152].mxu1 %v5253_v61  ;;  %2828 = vmatmul.mubr.bf16.gmra.mrb[88].mxu0 %v5252_v3  ;;  %v5267_v3 = vld [vmem:[%s5690_s26 + $0x588] ss:$28 sps:$4 sm:$0xff]  }
 0x1bf   : > { %4589 = vmatprep.mubr.bf16.mxu1 %v5256_v4  ;;  %2835 = vmatprep.mubr.bf16.mxu0 %v5254_v8  ;;  %v5271_v4 = vld [vmem:[%s5690_s26 + $0x478] ss:$28 sps:$4 sm:$0xff]   ;;  %v5269_v8 = vld [vmem:[%s5690_s26 + $0x5c4] ss:$28 sps:$4 sm:$0xff]  }
 0x1c1   : > { %v6172_v11 = vpop.f32.mrb[80].mxu1 }
 0x1c2   : > { %v2237_v14 = vpop.f32.mrb[81].mxu1 }
 0x1c3   : > { %v6175_v18 = vpop.f32.mrb[82].mxu1 }
 0x1c4   : > { %v2240_v25 = vpop.f32.mrb[83].mxu1 }
 0x1c5   : > { %v5272_v25 = vld [vmem:[%s5690_s26 + $0x5c0] ss:$28 sps:$4 sm:$0xff]  }
 0x1c6   : > { %4590 = vmatmul.mubr.bf16.gmra.mrb[156].mxu1 %v5258_v17  ;;  %2836 = vmatmul.mubr.bf16.gmra.mrb[92].mxu0 %v5257_v19  ;;  %v5273_v19 = vld [vmem:[%s5690_s26 + $0x4b0] ss:$28 sps:$4 sm:$0xff]  }
 0x1c7   : > { %4593 = vmatprep.mubr.bf16.mxu1 %v5261_v21  ;;  %2843 = vmatprep.mubr.bf16.mxu0 %v5259_v55  ;;  %v5276_v55 = vld [vmem:[%s5690_s26 + $0x4e8] ss:$28 sps:$4 sm:$0xff]  }
 0x1c9   : > { %v6180_v28 = vpop.f32.mrb[84].mxu1 }
 0x1ca   : > { %v2245_v29 = vpop.f32.mrb[85].mxu1 }
 0x1cb   : > { %v6183_v34 = vpop.f32.mrb[86].mxu1 }
 0x1cc   : > { %v2248_v46 = vpop.f32.mrb[87].mxu1 }
 0x1ce   : > { %4594 = vmatmul.mubr.bf16.gmra.mrb[160].mxu1 %v5263_v33  ;;  %2844 = vmatmul.mubr.bf16.gmra.mrb[96].mxu0 %v5262_v38  ;;  %v5274_v33 = vld [vmem:[%s5690_s26 + $0x5fc] ss:$28 sps:$4 sm:$0xff]   ;;  %v6207_v38 = vld [vmem:[%s7581_s2] ss:$0 sm:$0xff] }
 0x1cf   : > { %4597 = vmatprep.mubr.bf16.mxu1 %v5266_v41  ;;  %2851 = vmatprep.mubr.bf16.mxu0 %v5264_v47  ;;  %v2076_v41 = vadd.f32 %v6207_v38, %v5990_v32  ;;  %v5278_v47 = vld [vmem:[%s5690_s26 + $0x520] ss:$28 sps:$4 sm:$0xff]   ;;  %v2084_v32 = vadd.f32 %v6207_v38, %v5998_v40  ;;  %v2092_v40 = vadd.f32 %v6207_v38, %v6006_v48 }
 0x1d0   : > { %v2100_v48 = vadd.f32 %v6207_v38, %v6014_v57  ;;  %v2108_v57 = vadd.f32 %v6207_v38, %v6022_v2  ;;  %v2119_v2 = vadd.f32 %v6207_v38, %v6033_v13 }
 0x1d1   : > { %v6188_v50 = vpop.f32.mrb[88].mxu1 }
 0x1d2   : > { %v2253_v52 = vpop.f32.mrb[89].mxu1 }
 0x1d3   : > { %v6191_v61 = vpop.f32.mrb[90].mxu1  ;;  %v2079_v52 = vadd.f32 %v6207_v38, %v5993_v35 }
 0x1d4   : > { %v2256_v7 = vpop.f32.mrb[91].mxu1 }
 0x1d5   : > { %v5281_v7 = vld [vmem:[%s5690_s26 + $0x558] ss:$28 sps:$4 sm:$0xff]  }
 0x1d6   : > { %4598 = vmatmul.mubr.bf16.gmra.mrb[164].mxu1 %v5268_v56  ;;  %2852 = vmatmul.mubr.bf16.gmra.mrb[100].mxu0 %v5267_v3 }
 0x1d7   : > { %4601 = vmatprep.mubr.bf16.mxu1 %v5271_v4  ;;  %2859 = vmatprep.mubr.bf16.mxu0 %v5269_v8  ;;  %v5277_v4 = vld [vmem:[%s5690_s26 + $0x5f8] ss:$28 sps:$4 sm:$0xff]  }
 0x1d9   : > { %v6196_v14 = vpop.f32.mrb[92].mxu1 }
 0x1da   : > { %v2261_v17 = vpop.f32.mrb[93].mxu1 }
 0x1db   : > { %v6199_v21 = vpop.f32.mrb[94].mxu1  ;;  %v5279_v17 = vld [vmem:[%s5690_s26 + $0x634] ss:$28 sps:$4 sm:$0xff]  }
 0x1dc   : > { %v2264_v29 = vpop.f32.mrb[95].mxu1 }
 0x1dd   : > { %v2087_v29 = vadd.f32 %v6207_v38, %v6001_v43 }
 0x1de   : > { %4602 = vmatmul.mubr.bf16.gmra.mrb[168].mxu1 %v5273_v19  ;;  %2860 = vmatmul.mubr.bf16.gmra.mrb[104].mxu0 %v5272_v25 }
 0x1df   : > { %4605 = vmatprep.mubr.bf16.mxu1 %v5276_v55  ;;  %2867 = vmatprep.mubr.bf16.mxu0 %v5274_v33  ;;  %v5283_v55 = vld [vmem:[%s5690_s26 + $0x590] ss:$28 sps:$4 sm:$0xff]  }
 0x1e1   : > { %v2653_v46 = vpop.f32.mrb[0].mxu0 }
 0x1e2   : > { %v6214_v56 = vadd.f32 %v2653_v46, %v2076_v41  ;;  %v2655_v3 = vpop.f32.mrb[1].mxu0  ;;  %v5282_v46 = vld [vmem:[%s5690_s26 + $0x630] ss:$28 sps:$4 sm:$0xff]  }
 0x1e3   : > { %v2656_v8 = vpop.f32.mrb[2].mxu0  ;;  %v5284_v3 = vld [vmem:[%s5690_s26 + $0x66c] ss:$28 sps:$4 sm:$0xff]  }
 0x1e4   : > { %v6219_v19 = vadd.f32 %v2656_v8, %v2079_v52  ;;  %v2658_v25 = vpop.f32.mrb[3].mxu0  ;;  %v5286_v52 = vld [vmem:[%s5690_s26 + $0x5c8] ss:$28 sps:$4 sm:$0xff]   ;;  %v5288_v8 = vld [vmem:[%s5690_s26 + $0x600] ss:$28 sps:$4 sm:$0xff]  }
 0x1e6   : > { %4606 = vmatmul.mubr.bf16.gmra.mrb[172].mxu1 %v5278_v47  ;;  %2868 = vmatmul.mubr.bf16.gmra.mrb[108].mxu0 %v5277_v4 }
 0x1e7   : > { %4609 = vmatprep.mubr.bf16.mxu1 %v5281_v7  ;;  %2875 = vmatprep.mubr.bf16.mxu0 %v5279_v17  ;;  %v2095_v17 = vadd.f32 %v6207_v38, %v6009_v51 }
 0x1e9   : > { %v2661_v35 = vpop.f32.mrb[4].mxu0 }
 0x1ea   : > { %v6226_v33 = vadd.f32 %v2661_v35, %v2084_v32  ;;  %v2663_v41 = vpop.f32.mrb[5].mxu0  ;;  %v5287_v35 = vld [vmem:[%s5690_s26 + $0x668] ss:$28 sps:$4 sm:$0xff]  }
 0x1eb   : > { %v2664_v47 = vpop.f32.mrb[6].mxu0  ;;  %v5289_v41 = vld [vmem:[%s5690_s26 + $0x6a4] ss:$28 sps:$4 sm:$0xff]  }
 0x1ec   : > { %v6231_v4 = vadd.f32 %v2664_v47, %v2087_v29  ;;  %v2666_v7 = vpop.f32.mrb[7].mxu0  ;;  %v5291_v29 = vld [vmem:[%s5690_s26 + $0x638] ss:$28 sps:$4 sm:$0xff]   ;;  %v5293_v47 = vld [vmem:[%s5690_s26 + $0x670] ss:$28 sps:$4 sm:$0xff]  }
 0x1ee   : > { %4610 = vmatmul.mubr.bf16.gmra.mrb[176].mxu1 %v5283_v55  ;;  %2876 = vmatmul.mubr.bf16.gmra.mrb[112].mxu0 %v5282_v46 }
 0x1ef   : > { %4613 = vmatprep.mubr.bf16.mxu1 %v5286_v52  ;;  %2883 = vmatprep.mubr.bf16.mxu0 %v5284_v3  ;;  %v2103_v3 = vadd.f32 %v6207_v38, %v6017_v60  ;;  %v5298_v60 = vld [vmem:[%s5690_s26 + $0x6e0] ss:$28 sps:$4 sm:$0xff]  }
 0x1f1   : > { %v2669_v43 = vpop.f32.mrb[8].mxu0 }
 0x1f2   : > { %v6238_v25 = vadd.f32 %v2669_v43, %v2092_v40  ;;  %v2671_v32 = vpop.f32.mrb[9].mxu0  ;;  %v5292_v43 = vld [vmem:[%s5690_s26 + $0x6a0] ss:$28 sps:$4 sm:$0xff]  }
 0x1f3   : > { %v2672_v55 = vpop.f32.mrb[10].mxu0 }
 0x1f4   : > { %v6243_v46 = vadd.f32 %v2672_v55, %v2095_v17  ;;  %v2674_v52 = vpop.f32.mrb[11].mxu0  ;;  %v5296_v17 = vld [vmem:[%s5690_s26 + $0x6a8] ss:$28 sps:$4 sm:$0xff]  }
 0x1f6   : > { %4614 = vmatmul.mubr.bf16.gmra.mrb[180].mxu1 %v5288_v8  ;;  %2884 = vmatmul.mubr.bf16.gmra.mrb[116].mxu0 %v5287_v35  ;;  %v5294_v8 = vld [vmem:[%s5690_s26 + $0x6dc] ss:$28 sps:$4 sm:$0xff]  }
 0x1f7   : > { %4617 = vmatprep.mubr.bf16.mxu1 %v5291_v29  ;;  %2891 = vmatprep.mubr.bf16.mxu0 %v5289_v41  ;;  %v2111_v41 = vadd.f32 %v6207_v38, %v6025_v5 }
 0x1f9   : > { %v2677_v51 = vpop.f32.mrb[12].mxu0 }
 0x1fa   : > { %v6250_v7 = vadd.f32 %v2677_v51, %v2100_v48  ;;  %v2679_v40 = vpop.f32.mrb[13].mxu0  ;;  %v5297_v51 = vld [vmem:[%s5690_s26 + $0x6d8] ss:$28 sps:$4 sm:$0xff]   ;;  %s4221_s26 = sshll.u32 %s7724_s7, 3 }
 0x1fb   : > { %v2680_v32 = vpop.f32.mrb[14].mxu0  ;;  %s6628_s10 = scalar_lea.vmem %s7582_s3, %s4221_s26 }
 0x1fc   : > { %v6255_v35 = vadd.f32 %v2680_v32, %v2103_v3  ;;  %v2682_v29 = vpop.f32.mrb[15].mxu0 }
 0x1fe   : > { %4618 = vmatmul.mubr.bf16.gmra.mrb[184].mxu1 %v5293_v47  ;;  %2892 = vmatmul.mubr.bf16.gmra.mrb[120].mxu0 %v5292_v43  ;;  %v2116_v47 = vadd.f32 %v6207_v38, %v6030_v10 }
 0x1ff   : > { %4621 = vmatprep.mubr.bf16.mxu1 %v5296_v17  ;;  %2899 = vmatprep.mubr.bf16.mxu0 %v5294_v8 }
 0x201   : > { %v2685_v55 = vpop.f32.mrb[16].mxu0 }
 0x202   : > { %v6262_v52 = vadd.f32 %v2685_v55, %v2108_v57  ;;  %v2687_v48 = vpop.f32.mrb[17].mxu0  ;;  %v2124_v55 = vadd.f32 %v6207_v38, %v6045_v20 }
 0x203   : > { %v2688_v40 = vpop.f32.mrb[18].mxu0 }
 0x204   : > { %v6265_v3 = vadd.f32 %v2688_v40, %v2111_v41  ;;  %v2690_v32 = vpop.f32.mrb[19].mxu0 }
 0x205   : > { %v2132_v32 = vadd.f32 %v6207_v38, %v6056_v1  ;;  %v2143_v1 = vadd.f32 %v6207_v38, %v6076_v45  ;;  %v2151_v45 = vadd.f32 %v6207_v38, %v6087_v58  ;;  %v2159_v58 = vadd.f32 %v6207_v38, %v6095_v6 }
 0x206   : > { %4622 = vmatmul.mubr.bf16.gmra.mrb[188].mxu1 %v5298_v60  ;;  %2900 = vmatmul.mubr.bf16.gmra.mrb[124].mxu0 %v5297_v51  ;;  %v2127_v60 = vadd.f32 %v6207_v38, %v6048_v23  ;;  %v2167_v6 = vadd.f32 %v6207_v38, %v6103_v16  ;;  %v2175_v16 = vadd.f32 %v6207_v38, %v6111_v26 }
 0x207   : > { %v2183_v26 = vadd.f32 %v6207_v38, %v6119_v36  ;;  %v2191_v36 = vadd.f32 %v6207_v38, %v6127_v49  ;;  %v2199_v49 = vadd.f32 %v6207_v38, %v6135_v63  ;;  %v6393_v63 = vadd.f32 %v6207_v38, %v6151_v27 }
 0x208   : > { %v6417_v27 = vadd.f32 %v6207_v38, %v6175_v18 }
 0x209   : > { %v2693_v43 = vpop.f32.mrb[20].mxu0 }
 0x20a   : > { %v6271_v17 = vadd.f32 %v2693_v43, %v2116_v47  ;;  %v2695_v5 = vpop.f32.mrb[21].mxu0  ;;  %v2135_v43 = vadd.f32 %v6207_v38, %v6062_v31 }
 0x20b   : > { %v2696_v8 = vpop.f32.mrb[22].mxu0 }
 0x20c   : > { %v6273_v29 = vadd.f32 %v2696_v8, %v2119_v2  ;;  %v2698_v57 = vpop.f32.mrb[23].mxu0 }
 0x20d   : > { %v2140_v57 = vadd.f32 %v6207_v38, %v6070_v39  ;;  %v2148_v39 = vadd.f32 %v6207_v38, %v6084_v53  ;;  %v2156_v53 = vadd.f32 %v6207_v38, %v6092_v0  ;;  %v2164_v0 = vadd.f32 %v6207_v38, %v6100_v12 }
 0x20e   : > { %v2172_v12 = vadd.f32 %v6207_v38, %v6108_v22  ;;  %v2180_v22 = vadd.f32 %v6207_v38, %v6116_v30  ;;  %v2188_v30 = vadd.f32 %v6207_v38, %v6124_v44  ;;  %v2196_v44 = vadd.f32 %v6207_v38, %v6132_v59 }
 0x20f   : > { %v2207_v59 = vadd.f32 %v6207_v38, %v6143_v15  ;;  %v6409_v15 = vadd.f32 %v6207_v38, %v6167_v62  ;;  %v6433_v62 = vadd.f32 %v6207_v38, %v6191_v61 }
 0x211   : > { %v2701_v41 = vpop.f32.mrb[24].mxu0 }
 0x212   : > { %v6279_v48 = vadd.f32 %v2701_v41, %v2124_v55  ;;  %v2703_v10 = vpop.f32.mrb[25].mxu0 }
 0x213   : > { %v2704_v51 = vpop.f32.mrb[26].mxu0 }
 0x214   : > { %v6281_v40 = vadd.f32 %v2704_v51, %v2127_v60  ;;  %v2706_v13 = vpop.f32.mrb[27].mxu0 }
 0x219   : > { %v2709_v47 = vpop.f32.mrb[28].mxu0 }
 0x21a   : > { %v6287_v2 = vadd.f32 %v2709_v47, %v2132_v32  ;;  %v2711_v20 = vpop.f32.mrb[29].mxu0 }
 0x21b   : > { %v2712_v5 = vpop.f32.mrb[30].mxu0 }
 0x21c   : > { %v6289_v8 = vadd.f32 %v2712_v5, %v2135_v43  ;;  %v2714_v23 = vpop.f32.mrb[31].mxu0 }
 0x221   : > { %v6293_v55 = vpop.f32.mrb[96].mxu1  ;;  %v2717_v41 = vpop.f32.mrb[32].mxu0 }
 0x222   : > { %v2558_v60 = vpop.f32.mrb[97].mxu1  ;;  %v6297_v10 = vadd.f32 %v2717_v41, %v2140_v57  ;;  %v2719_v31 = vpop.f32.mrb[33].mxu0 }
 0x223   : > { %v6299_v51 = vpop.f32.mrb[98].mxu1  ;;  %v2720_v13 = vpop.f32.mrb[34].mxu0 }
 0x224   : > { %7583 = vst [vmem:[#allocation2_spill] sm:$0xff] %v6297_v10  ;;  %v2561_v32 = vpop.f32.mrb[99].mxu1  ;;  %v6301_v47 = vadd.f32 %v2720_v13, %v2143_v1  ;;  %v2722_v43 = vpop.f32.mrb[35].mxu0 }
 0x226   : > { %7584 = vst [vmem:[#allocation3_spill] sm:$0xff] %v6301_v47 }
 0x229   : > { %v6305_v20 = vpop.f32.mrb[100].mxu1  ;;  %v2725_v5 = vpop.f32.mrb[36].mxu0 }
 0x22a   : > { %v2566_v23 = vpop.f32.mrb[101].mxu1  ;;  %v6309_v57 = vadd.f32 %v2725_v5, %v2148_v39  ;;  %v2727_v41 = vpop.f32.mrb[37].mxu0 }
 0x22b   : > { %v6311_v60 = vpop.f32.mrb[102].mxu1  ;;  %v2728_v31 = vpop.f32.mrb[38].mxu0 }
 0x22c   : > { %7585 = vst [vmem:[#allocation4_spill] sm:$0xff] %v6309_v57  ;;  %v2569_v32 = vpop.f32.mrb[103].mxu1  ;;  %v6313_v1 = vadd.f32 %v2728_v31, %v2151_v45  ;;  %v2730_v13 = vpop.f32.mrb[39].mxu0 }
 0x22e   : > { %7586 = vst [vmem:[#allocation5_spill] sm:$0xff] %v6313_v1 }
 0x231   : > { %v6317_v43 = vpop.f32.mrb[104].mxu1  ;;  %v2733_v47 = vpop.f32.mrb[40].mxu0 }
 0x232   : > { %v2574_v23 = vpop.f32.mrb[105].mxu1  ;;  %v6321_v39 = vadd.f32 %v2733_v47, %v2156_v53  ;;  %v2735_v5 = vpop.f32.mrb[41].mxu0 }
 0x233   : > { %v6323_v41 = vpop.f32.mrb[106].mxu1  ;;  %v2736_v10 = vpop.f32.mrb[42].mxu0 }
 0x234   : > { %7587 = vst [vmem:[#allocation6_spill] sm:$0xff] %v6321_v39  ;;  %v2577_v32 = vpop.f32.mrb[107].mxu1  ;;  %v6325_v45 = vadd.f32 %v2736_v10, %v2159_v58  ;;  %v2738_v31 = vpop.f32.mrb[43].mxu0 }
 0x236   : > { %7588 = vst [vmem:[#allocation7_spill] sm:$0xff] %v6325_v45 }
 0x239   : > { %v6329_v13 = vpop.f32.mrb[108].mxu1  ;;  %v2741_v1 = vpop.f32.mrb[44].mxu0 }
 0x23a   : > { %v2582_v23 = vpop.f32.mrb[109].mxu1  ;;  %v6333_v47 = vadd.f32 %v2741_v1, %v2164_v0  ;;  %v2743_v53 = vpop.f32.mrb[45].mxu0 }
 0x23b   : > { %v6335_v5 = vpop.f32.mrb[110].mxu1  ;;  %v2744_v39 = vpop.f32.mrb[46].mxu0 }
 0x23c   : > { %7589 = vst [vmem:[#allocation8_spill] sm:$0xff] %v6333_v47  ;;  %v2585_v32 = vpop.f32.mrb[111].mxu1  ;;  %v6337_v10 = vadd.f32 %v2744_v39, %v2167_v6  ;;  %v2746_v58 = vpop.f32.mrb[47].mxu0 }
 0x23e   : > { %7590 = vst [vmem:[#allocation9_spill] sm:$0xff] %v6337_v10 }
 0x241   : > { %v6341_v31 = vpop.f32.mrb[112].mxu1  ;;  %v2749_v45 = vpop.f32.mrb[48].mxu0 }
 0x242   : > { %v2590_v23 = vpop.f32.mrb[113].mxu1  ;;  %v6345_v1 = vadd.f32 %v2749_v45, %v2172_v12  ;;  %v2751_v0 = vpop.f32.mrb[49].mxu0 }
 0x243   : > { %v6347_v53 = vpop.f32.mrb[114].mxu1  ;;  %v2752_v47 = vpop.f32.mrb[50].mxu0 }
 0x244   : > { %7591 = vst [vmem:[#allocation10_spill] sm:$0xff] %v6345_v1  ;;  %v2593_v32 = vpop.f32.mrb[115].mxu1  ;;  %v6349_v39 = vadd.f32 %v2752_v47, %v2175_v16  ;;  %v2754_v6 = vpop.f32.mrb[51].mxu0 }
 0x246   : > { %7592 = vst [vmem:[#allocation11_spill] sm:$0xff] %v6349_v39 }
 0x249   : > { %v6353_v58 = vpop.f32.mrb[116].mxu1  ;;  %v2757_v10 = vpop.f32.mrb[52].mxu0 }
 0x24a   : > { %v2598_v23 = vpop.f32.mrb[117].mxu1  ;;  %v6357_v45 = vadd.f32 %v2757_v10, %v2180_v22  ;;  %v2759_v12 = vpop.f32.mrb[53].mxu0 }
 0x24b   : > { %v6359_v0 = vpop.f32.mrb[118].mxu1  ;;  %v2760_v1 = vpop.f32.mrb[54].mxu0 }
 0x24c   : > { %7593 = vst [vmem:[#allocation12_spill] sm:$0xff] %v6357_v45  ;;  %v2601_v32 = vpop.f32.mrb[119].mxu1  ;;  %v6361_v47 = vadd.f32 %v2760_v1, %v2183_v26  ;;  %v2762_v16 = vpop.f32.mrb[55].mxu0 }
 0x24e   : > { %7594 = vst [vmem:[#allocation13_spill] sm:$0xff] %v6361_v47 }
 0x251   : > { %v6365_v6 = vpop.f32.mrb[120].mxu1  ;;  %v2765_v39 = vpop.f32.mrb[56].mxu0 }
 0x252   : > { %v2606_v23 = vpop.f32.mrb[121].mxu1  ;;  %v6369_v10 = vadd.f32 %v2765_v39, %v2188_v30  ;;  %v2767_v22 = vpop.f32.mrb[57].mxu0 }
 0x253   : > { %v6371_v12 = vpop.f32.mrb[122].mxu1  ;;  %v2768_v45 = vpop.f32.mrb[58].mxu0 }
 0x254   : > { %7595 = vst [vmem:[#allocation14_spill] sm:$0xff] %v6369_v10  ;;  %v2609_v32 = vpop.f32.mrb[123].mxu1  ;;  %v6373_v1 = vadd.f32 %v2768_v45, %v2191_v36  ;;  %v2770_v26 = vpop.f32.mrb[59].mxu0  ;;  %v2204_v36 = vadd.f32 %v6207_v38, %v6140_v9  ;;  %v6405_v9 = vadd.f32 %v6207_v38, %v6164_v54  ;;  %v6429_v54 = vadd.f32 %v6207_v38, %v6188_v50 }
 0x255   : > { %v2212_v26 = vadd.f32 %v6207_v38, %v6148_v24  ;;  %v6413_v24 = vadd.f32 %v6207_v38, %v6172_v11  ;;  %v6437_v11 = vadd.f32 %v6207_v38, %v6196_v14  ;;  %v6449_v50 = vadd.f32 %v6207_v38, %v6299_v51 }
 0x256   : > { %7596 = vst [vmem:[#allocation15_spill] sm:$0xff] %v6373_v1  ;;  %v6456_v14 = vadd.f32 %v6207_v38, %v6305_v20 }
 0x257   : > { %7599 = vst [vmem:[#allocation18_spill] sm:$0xff] %v6437_v11  ;;  %7602 = vst [vmem:[#allocation21_spill] sm:$0xff] %v6449_v50 }
 0x258   : > { %7603 = vst [vmem:[#allocation22_spill] sm:$0xff] %v6456_v14 }
 0x259   : > { %v6377_v16 = vpop.f32.mrb[124].mxu1  ;;  %v2773_v47 = vpop.f32.mrb[60].mxu0 }
 0x25a   : > { %v2614_v23 = vpop.f32.mrb[125].mxu1  ;;  %v6381_v39 = vadd.f32 %v2773_v47, %v2196_v44  ;;  %v2775_v30 = vpop.f32.mrb[61].mxu0  ;;  %v6397_v47 = vadd.f32 %v6207_v38, %v6156_v37  ;;  %v6421_v37 = vadd.f32 %v6207_v38, %v6180_v28  ;;  %v6441_v28 = vadd.f32 %v6207_v38, %v6199_v21 }
 0x25b   : > { %v2615_v22 = vpop.f32.mrb[126].mxu1  ;;  %v2776_v10 = vpop.f32.mrb[62].mxu0  ;;  %v6460_v21 = vadd.f32 %v6207_v38, %v6311_v60  ;;  %v6473_v30 = vadd.f32 %v6207_v38, %v6323_v41 }
 0x25c   : > { %7597 = vst [vmem:[#allocation16_spill] sm:$0xff] %v6381_v39  ;;  %v2617_v57 = vpop.f32.mrb[127].mxu1  ;;  %v6383_v32 = vadd.f32 %v2776_v10, %v2199_v49  ;;  %v2778_v45 = vpop.f32.mrb[63].mxu0  ;;  %7600 = vst [vmem:[#allocation19_spill] sm:$0xff] %v6441_v28 }
 0x25d   : > { %v6401_v57 = vadd.f32 %v6207_v38, %v6159_v42  ;;  %v6425_v42 = vadd.f32 %v6207_v38, %v6183_v34  ;;  %v6445_v34 = vadd.f32 %v6207_v38, %v6293_v55  ;;  %7604 = vst [vmem:[#allocation23_spill] sm:$0xff] %v6460_v21  ;;  %7607 = vst [vmem:[#allocation26_spill] sm:$0xff] %v6473_v30 }
 0x25e   : > { %7598 = vst [vmem:[#allocation17_spill] sm:$0xff] %v6383_v32 }
 0x25f   : > { %7601 = vst [vmem:[#allocation20_spill] sm:$0xff] %v6445_v34 }
 0x261   : > { %v4563_v18 = vpop.f32.mrb[128].mxu1  ;;  %v2781_v10 = vpop.f32.mrb[64].mxu0 }
 0x262   : > { %v6452_v61 = vadd.f32 %v6226_v33, %v4563_v18  ;;  %v2942_v44 = vpop.f32.mrb[129].mxu1  ;;  %v6462_v23 = vadd.f32 %v2781_v10, %v2204_v36  ;;  %v2783_v55 = vpop.f32.mrb[65].mxu0  ;;  %v6469_v33 = vadd.f32 %v6207_v38, %v6317_v43 }
 0x263   : > { %v6465_v49 = vadd.f32 %v6214_v56, %v2942_v44  ;;  %v4564_v51 = vpop.f32.mrb[130].mxu1  ;;  %v2784_v60 = vpop.f32.mrb[66].mxu0  ;;  %v6482_v56 = vadd.f32 %v6207_v38, %v6329_v13  ;;  %v6493_v44 = vadd.f32 %v6207_v38, %v6335_v5 }
 0x264   : > { %7605 = vst [vmem:[#allocation24_spill] sm:$0xff] %v6462_v23  ;;  %7606 = vst [vmem:[#allocation25_spill] sm:$0xff] %v6469_v33  ;;  %v3199_v20 = vmul.f32 %v6452_v61, %v6452_v61  ;;  %v6478_v45 = vadd.f32 %v6231_v4, %v4564_v51  ;;  %v2945_v36 = vpop.f32.mrb[131].mxu1  ;;  %v6486_v18 = vadd.f32 %v2784_v60, %v2207_v59  ;;  %v2786_v10 = vpop.f32.mrb[67].mxu0 }
 0x265   : > { %7608 = vst [vmem:[#allocation27_spill] sm:$0xff] %v6482_v56  ;;  %v3197_v43 = vmul.f32 %v6465_v49, %v6465_v49  ;;  %v6489_v41 = vadd.f32 %v6219_v19, %v2945_v36  ;;  %7610 = vst [vmem:[#allocation29_spill] sm:$0xff] %v6493_v44  ;;  %v6497_v4 = vadd.f32 %v6207_v38, %v6341_v31 }
 0x266   : > { %7609 = vst [vmem:[#allocation28_spill] sm:$0xff] %v6486_v18  ;;  %v3273_v55 = vrot.slane %v3199_v20, 4  ;;  %v3200_v13 = vmul.f32 %v6478_v45, %v6478_v45  ;;  %v6503_v59 = vadd.f32 %v6207_v38, %v6347_v53  ;;  %v6507_v19 = vadd.f32 %v6207_v38, %v6353_v58 }
 0x267   : > { %7611 = vst [vmem:[#allocation30_spill] sm:$0xff] %v6497_v4  ;;  %v3261_v51 = vrot.slane %v3197_v43, 4  ;;  %v3198_v5 = vmul.f32 %v6489_v41, %v6489_v41  ;;  %v6513_v31 = vadd.f32 %v6207_v38, %v6359_v0  ;;  %v6517_v60 = vadd.f32 %v6207_v38, %v6365_v6 }
 0x268   : > { %7612 = vst [vmem:[#allocation31_spill] sm:$0xff] %v6503_v59  ;;  %7613 = vst [vmem:[#allocation32_spill] sm:$0xff] %v6507_v19  ;;  %v3274_v36 = vadd.f32 %v3273_v55, %v3199_v20  ;;  %v3279_v10 = vrot.slane %v3200_v13, 4  ;;  %v6521_v53 = vadd.f32 %v6207_v38, %v6371_v12  ;;  %v6525_v58 = vadd.f32 %v6207_v38, %v6377_v16 }
 0x269   : > { %7614 = vst [vmem:[#allocation33_spill] sm:$0xff] %v6513_v31  ;;  %7615 = vst [vmem:[#allocation34_spill] sm:$0xff] %v6517_v60  ;;  %v3262_v19 = vadd.f32 %v3261_v51, %v3197_v43  ;;  %v3267_v59 = vrot.slane %v3198_v5, 4  ;;  %v4567_v4 = vpop.f32.mrb[132].mxu1  ;;  %v6528_v0 = vadd.f32 %v6207_v38, %v2615_v22  ;;  %v2789_v6 = vpop.f32.mrb[68].mxu0 }
 0x26a   : > { %7616 = vst [vmem:[#allocation35_spill] sm:$0xff] %v6521_v53  ;;  %7617 = vst [vmem:[#allocation36_spill] sm:$0xff] %v6525_v58  ;;  %v3275_v31 = vrot.slane %v3274_v36, 2  ;;  %v3280_v44 = vadd.f32 %v3279_v10, %v3200_v13  ;;  %v6531_v20 = vadd.f32 %v6250_v7, %v4567_v4  ;;  %v2958_v55 = vpop.f32.mrb[133].mxu1  ;;  %v6533_v53 = vadd.f32 %v2789_v6, %v2212_v26  ;;  %v2791_v56 = vpop.f32.mrb[69].mxu0 }
 0x26b   : > { %7618 = vst [vmem:[#allocation37_spill] sm:$0xff] %v6528_v0  ;;  %v3263_v60 = vrot.slane %v3262_v19, 2  ;;  %v3268_v12 = vadd.f32 %v3267_v59, %v3198_v5  ;;  %v6536_v16 = vadd.f32 %v6238_v25, %v2958_v55  ;;  %v4568_v43 = vpop.f32.mrb[134].mxu1  ;;  %v2792_v22 = vpop.f32.mrb[70].mxu0 }
 0x26c   : > { %7619 = vst [vmem:[#allocation38_spill] sm:$0xff] %v6533_v53  ;;  %v3276_v51 = vadd.f32 %v3275_v31, %v3274_v36  ;;  %v3281_v58 = vrot.slane %v3280_v44, 2  ;;  %v3203_v38 = vmul.f32 %v6531_v20, %v6531_v20  ;;  %v6541_v13 = vadd.f32 %v6255_v35, %v4568_v43  ;;  %v2961_v7 = vpop.f32.mrb[135].mxu1  ;;  %v2794_v25 = vpop.f32.mrb[71].mxu0 }
 0x26d   : > { %v3264_v4 = vadd.f32 %v3263_v60, %v3262_v19  ;;  %v3269_v10 = vrot.slane %v3268_v12, 2  ;;  %v3201_v26 = vmul.f32 %v6536_v16, %v6536_v16  ;;  %v6546_v56 = vadd.f32 %v2792_v22, %v6393_v63 }
 0x26e   : > { %v3277_v59 = vrot.slane %v3276_v51, 1  ;;  %v3282_v5 = vadd.f32 %v3281_v58, %v3280_v44  ;;  %v3297_v31 = vrot.slane %v3203_v38, 4  ;;  %v3204_v36 = vmul.f32 %v6541_v13, %v6541_v13 }
 0x26f   : > { %7620 = vst [vmem:[#allocation39_spill] sm:$0xff] %v6546_v56  ;;  %v3265_v6 = vrot.slane %v3264_v4, 1  ;;  %v3270_v55 = vadd.f32 %v3269_v10, %v3268_v12  ;;  %v3285_v35 = vrot.slane %v3201_v26, 4  ;;  %v6551_v43 = vadd.f32 %v6243_v46, %v2961_v7 }
 0x270   : > { %v6553_v19 = vadd.f32 %v3277_v59, %v3276_v51  ;;  %v3283_v60 = vrot.slane %v3282_v5, 1  ;;  %v3298_v0 = vadd.f32 %v3297_v31, %v3203_v38  ;;  %v3303_v30 = vrot.slane %v3204_v36, 4 }
 0x271   : > { %v6555_v63 = vadd.f32 %v3265_v6, %v3264_v4  ;;  %v3271_v22 = vrot.slane %v3270_v55, 1  ;;  %v3286_v25 = vadd.f32 %v3285_v35, %v3201_v26  ;;  %v3202_v44 = vmul.f32 %v6551_v43, %v6551_v43  ;;  %v4571_v58 = vpop.f32.mrb[136].mxu1  ;;  %v2797_v51 = vpop.f32.mrb[72].mxu0 }
 0x272   : > { %v3647_v33 = vadd.f32 1.0, %v6553_v19  ;;  %v3839_v12 = vadd.f32 1e-16, %v6553_v19  ;;  %v6561_v10 = vadd.f32 %v3283_v60, %v3282_v5  ;;  %v3299_v46 = vrot.slane %v3298_v0, 2  ;;  %v2974_v7 = vpop.f32.mrb[137].mxu1  ;;  %v2799_v31 = vpop.f32.mrb[73].mxu0 }
 0x273   : > { %v3645_v38 = vadd.f32 1.0, %v6555_v63  ;;  %v3837_v4 = vadd.f32 1e-16, %v6555_v63  ;;  %v6565_v59 = vadd.f32 %v3271_v22, %v3270_v55  ;;  %v3287_v26 = vrot.slane %v3286_v25, 2  ;;  %v4572_v6 = vpop.f32.mrb[138].mxu1  ;;  %v2800_v5 = vpop.f32.mrb[74].mxu0 }
 0x274   : > { %5299 = vrcp.f32 %v3647_v33  ;;  %v3648_v35 = vadd.f32 1.0, %v6561_v10  ;;  %v3840_v21 = vadd.f32 1e-16, %v6561_v10  ;;  %v3300_v14 = vadd.f32 %v3299_v46, %v3298_v0  ;;  %v6569_v60 = vpop.f32.mrb[139].mxu1  ;;  %v2802_v55 = vpop.f32.mrb[75].mxu0 }
 0x275   : > { %5301 = vrsqrt.f32 %v3839_v12  ;;  %v3646_v18 = vadd.f32 1.0, %v6565_v59  ;;  %v3838_v56 = vadd.f32 1e-16, %v6565_v59  ;;  %v3288_v50 = vadd.f32 %v3287_v26, %v3286_v25 }
 0x276   : > { %5303 = vrcp.f32 %v3645_v38  ;;  %v3301_v22 = vrot.slane %v3300_v14, 1  ;;  %v3304_v31 = vadd.f32 %v3303_v30, %v3204_v36  ;;  %v3291_v23 = vrot.slane %v3202_v44, 4 }
 0x277   : > { %5305 = vrsqrt.f32 %v3837_v4  ;;  %v3289_v33 = vrot.slane %v3288_v50, 1  ;;  %v6574_v53 = vadd.f32 %v2797_v51, %v6397_v47  ;;  %v6577_v0 = vadd.f32 %v6271_v17, %v4571_v58 }
 0x278   : > { %5307 = vrcp.f32 %v3648_v35  ;;  %v6579_v12 = vadd.f32 %v3301_v22, %v3300_v14  ;;  %v3305_v46 = vrot.slane %v3304_v31, 2  ;;  %v3292_v34 = vadd.f32 %v3291_v23, %v3202_v44 }
 0x279   : > { %7621 = vst [vmem:[#allocation40_spill] sm:$0xff] %v6574_v53  ;;  %5309 = vrsqrt.f32 %v3840_v21  ;;  %v6581_v25 = vadd.f32 %v3289_v33, %v3288_v50  ;;  %v3207_v30 = vmul.f32 %v6577_v0, %v6577_v0  ;;  %v6586_v36 = vadd.f32 %v6262_v52, %v2974_v7  ;;  %v6588_v38 = vpop.f32.mrb[140].mxu1  ;;  %v6592_v58 = vpop.f32.mrb[76].mxu0 }
 0x27a   : > { %5311 = vrcp.f32 %v3646_v18  ;;  %v3651_v17 = vadd.f32 1.0, %v6579_v12  ;;  %v3843_v47 = vadd.f32 1e-16, %v6579_v12  ;;  %v3306_v14 = vadd.f32 %v3305_v46, %v3304_v31  ;;  %v6594_v23 = vpop.f32.mrb[141].mxu1  ;;  %v2807_v52 = vpop.f32.mrb[77].mxu0 }
 0x27b   : > { %5313 = vrsqrt.f32 %v3838_v56  ;;  %v3649_v50 = vadd.f32 1.0, %v6581_v25  ;;  %v3841_v21 = vadd.f32 1e-16, %v6581_v25  ;;  %v3293_v44 = vrot.slane %v3292_v34, 2  ;;  %v6598_v51 = vpop.f32.mrb[142].mxu1  ;;  %v6602_v26 = vpop.f32.mrb[78].mxu0 }
 0x27c   : > { %5315 = vrcp.f32 %v3651_v17  ;;  %v3307_v18 = vrot.slane %v3306_v14, 1  ;;  %v3321_v7 = vrot.slane %v3207_v30, 4  ;;  %v3205_v4 = vmul.f32 %v6586_v36, %v6586_v36  ;;  %v6604_v35 = vpop.f32.mrb[143].mxu1  ;;  %v2810_v31 = vpop.f32.mrb[79].mxu0 }
 0x27d   : > { %5317 = vrsqrt.f32 %v3843_v47  ;;  %v3294_v56 = vadd.f32 %v3293_v44, %v3292_v34  ;;  %v6607_v55 = vadd.f32 %v2800_v5, %v6401_v57  ;;  %v6610_v22 = vadd.f32 %v6273_v29, %v4572_v6 }
 0x27e   : > { %v5300_v33 = vpop.eup %5299  ;;  %5319 = vrcp.f32 %v3649_v50  ;;  %v6612_v46 = vadd.f32 %v3307_v18, %v3306_v14  ;;  %v3322_v17 = vadd.f32 %v3321_v7, %v3207_v30  ;;  %v3309_v52 = vrot.slane %v3205_v4, 4 }
 0x27f   : > { %7622 = vst [vmem:[#allocation41_spill] sm:$0xff] %v6607_v55  ;;  %v5302_v53 = vpop.eup %5301  ;;  %v3775_v1 = vmul.f32 %v5300_v33, %v6553_v19  ;;  %5321 = vrsqrt.f32 %v3841_v21  ;;  %v3295_v47 = vrot.slane %v3294_v56, 1  ;;  %v3208_v57 = vmul.f32 %v6610_v22, %v6610_v22 }
 0x280   : > { %v5304_v34 = vpop.eup %5303  ;;  %v3652_v29 = vadd.f32 1.0, %v6612_v46  ;;  %v3844_v6 = vadd.f32 1e-16, %v6612_v46  ;;  %v3323_v5 = vrot.slane %v3322_v17, 2  ;;  %v3310_v50 = vadd.f32 %v3309_v52, %v3205_v4 }
 0x281   : > { %v5306_v14 = vpop.eup %5305  ;;  %v3967_v44 = vmul.f32 %v5302_v53, %v3775_v1  ;;  %v3773_v30 = vmul.f32 %v5304_v34, %v6555_v63  ;;  %v6621_v18 = vadd.f32 %v3295_v47, %v3294_v56  ;;  %v3327_v7 = vrot.slane %v3208_v57, 4  ;;  %v6623_v19 = vpop.f32.mrb[144].mxu1 }
 0x282   : > { %v5308_v21 = vpop.eup %5307  ;;  %5323 = vrcp.f32 %v3652_v29  ;;  %v3324_v31 = vadd.f32 %v3323_v5, %v3322_v17  ;;  %v3311_v33 = vrot.slane %v3310_v50, 2  ;;  %v6632_v4 = vadd.f32 %v6265_v3, %v6569_v60  ;;  %v6634_v1 = vpop.f32.mrb[80].mxu0 }
 0x283   : > { %v6636_v53 = vpop.f32.mrb[145].mxu1  ;;  %v5310_v63 = vpop.eup %5309  ;;  %v4031_v56 = vmul.f32 %v3967_v44, %v6452_v61  ;;  %v3965_v52 = vmul.f32 %v5306_v14, %v3773_v30  ;;  %v3776_v47 = vmul.f32 %v5308_v21, %v6561_v10  ;;  %5325 = vrsqrt.f32 %v3844_v6 }
 0x284   : > { %v2815_v34 = vpop.f32.mrb[81].mxu0  ;;  %v6640_v29 = vpop.f32.mrb[146].mxu1  ;;  %v3650_v5 = vadd.f32 1.0, %v6621_v18  ;;  %v3842_v3 = vadd.f32 1e-16, %v6621_v18  ;;  %v3325_v60 = vrot.slane %v3324_v31, 1  ;;  %v3312_v55 = vadd.f32 %v3311_v33, %v3310_v50 }
 0x285   : > { %v5312_v17 = vpop.eup %5311  ;;  %v6644_v32 = vpop.f32.mrb[82].mxu0  ;;  %4095 = vst [vmem:[%s6628_s10 + $0x10] sm:$0xff] %v4031_v56  ;;  %v4029_v10 = vmul.f32 %v3965_v52, %v6465_v49  ;;  %v3968_v6 = vmul.f32 %v5310_v63, %v3776_v47  ;;  %v3328_v44 = vadd.f32 %v3327_v7, %v3208_v57  ;;  %v3206_v33 = vmul.f32 %v6632_v4, %v6632_v4 }
 0x286   : > { %v6646_v28 = vpop.f32.mrb[147].mxu1  ;;  %v5314_v61 = vpop.eup %5313  ;;  %v3774_v14 = vmul.f32 %v5312_v17, %v6565_v59  ;;  %5327 = vrcp.f32 %v3650_v5  ;;  %v6651_v34 = vadd.f32 %v3325_v60, %v3324_v31  ;;  %v3313_v50 = vrot.slane %v3312_v55, 1 }
 0x287   : > { %v2818_v30 = vpop.f32.mrb[83].mxu0  ;;  %v5316_v21 = vpop.eup %5315  ;;  %4093 = vst [vmem:[%s6628_s10] sm:$0xff] %v4029_v10  ;;  %v4032_v56 = vmul.f32 %v3968_v6, %v6478_v45  ;;  %5329 = vrsqrt.f32 %v3842_v3  ;;  %v3329_v63 = vrot.slane %v3328_v44, 2  ;;  %v3315_v5 = vrot.slane %v3206_v33, 4 }
 0x288   : > { %v5318_v39 = vpop.eup %5317  ;;  %v3966_v11 = vmul.f32 %v5314_v61, %v3774_v14  ;;  %v3779_v49 = vmul.f32 %v5316_v21, %v6579_v12  ;;  %v3655_v57 = vadd.f32 1.0, %v6651_v34  ;;  %v3847_v7 = vadd.f32 1e-16, %v6651_v34 }
 0x289   : > { %v5320_v59 = vpop.eup %5319  ;;  %v6660_v31 = vadd.f32 %v3313_v50, %v3312_v55  ;;  %4096 = vst [vmem:[%s6628_s10 + $0x18] sm:$0xff] %v4032_v56  ;;  %v6665_v60 = vpop.f32.mrb[148].mxu1  ;;  %v3330_v61 = vadd.f32 %v3329_v63, %v3328_v44  ;;  %v6679_v44 = vadd.f32 %v6592_v58, %v6405_v9  ;;  %v6683_v21 = vadd.f32 %v6287_v2, %v6588_v38 }
 0x28a   : > { %v5322_v52 = vpop.eup %5321  ;;  %v4030_v47 = vmul.f32 %v3966_v11, %v6489_v41  ;;  %v3971_v17 = vmul.f32 %v5318_v39, %v3779_v49  ;;  %v3777_v45 = vmul.f32 %v5320_v59, %v6581_v25  ;;  %5331 = vrcp.f32 %v3655_v57  ;;  %v6669_v10 = vpop.f32.mrb[84].mxu0 }
 0x28b   : > { %v3653_v12 = vadd.f32 1.0, %v6660_v31  ;;  %v3845_v3 = vadd.f32 1e-16, %v6660_v31  ;;  %v6671_v55 = vpop.f32.mrb[149].mxu1  ;;  %5333 = vrsqrt.f32 %v3847_v7  ;;  %v3316_v41 = vadd.f32 %v3315_v5, %v3206_v33  ;;  %v2823_v25 = vpop.f32.mrb[85].mxu0  ;;  %7623 = vst [vmem:[#allocation42_spill] sm:$0xff] %v6679_v44 }
 0x28c   : > { %4094 = vst [vmem:[%s6628_s10 + $0x8] sm:$0xff] %v4030_v47  ;;  %v4035_v11 = vmul.f32 %v3971_v17, %v6531_v20  ;;  %v3969_v39 = vmul.f32 %v5322_v52, %v3777_v45  ;;  %v6675_v6 = vpop.f32.mrb[150].mxu1  ;;  %v5324_v14 = vpop.eup %5323  ;;  %v3331_v30 = vrot.slane %v3330_v61, 1  ;;  %v3211_v9 = vmul.f32 %v6683_v21, %v6683_v21 }
 0x28d   : > { %5335 = vrcp.f32 %v3653_v12  ;;  %v6685_v50 = vpop.f32.mrb[86].mxu0  ;;  %v6687_v20 = vpop.f32.mrb[151].mxu1  ;;  %v3780_v49 = vmul.f32 %v5324_v14, %v6612_v46  ;;  %v3317_v59 = vrot.slane %v3316_v41, 2  ;;  %v6698_v2 = vadd.f32 %v6279_v48, %v6594_v23 }
 0x28e   : > { %v5326_v33 = vpop.eup %5325  ;;  %4099 = vst [vmem:[%s6628_s10 + $0x30] sm:$0xff] %v4035_v11  ;;  %v4033_v56 = vmul.f32 %v3969_v39, %v6536_v16  ;;  %5337 = vrsqrt.f32 %v3845_v3  ;;  %v2826_v57 = vpop.f32.mrb[87].mxu0  ;;  %v6692_v7 = vadd.f32 %v3331_v30, %v3330_v61  ;;  %v6702_v38 = vadd.f32 %v6602_v26, %v6409_v15 }
 0x28f   : > { %v3972_v16 = vmul.f32 %v5326_v33, %v3780_v49  ;;  %v3318_v58 = vadd.f32 %v3317_v59, %v3316_v41  ;;  %v6707_v46 = vadd.f32 %v6289_v8, %v6598_v51  ;;  %v6711_v63 = vadd.f32 %v6281_v40, %v6604_v35 }
 0x290   : > { %7624 = vst [vmem:[#allocation43_spill] sm:$0xff] %v6702_v38  ;;  %4097 = vst [vmem:[%s6628_s10 + $0x20] sm:$0xff] %v4033_v56  ;;  %v5328_v52 = vpop.eup %5327  ;;  %v3656_v47 = vadd.f32 1.0, %v6692_v7  ;;  %v3848_v48 = vadd.f32 1e-16, %v6692_v7  ;;  %v3345_v23 = vrot.slane %v3211_v9, 4  ;;  %v3209_v15 = vmul.f32 %v6698_v2, %v6698_v2 }
 0x291   : > { %v5330_v26 = vpop.eup %5329  ;;  %v4036_v17 = vmul.f32 %v3972_v16, %v6541_v13  ;;  %v3778_v8 = vmul.f32 %v5328_v52, %v6621_v18  ;;  %v3319_v51 = vrot.slane %v3318_v58, 1  ;;  %v3212_v40 = vmul.f32 %v6707_v46, %v6707_v46  ;;  %v6721_v35 = vpop.f32.mrb[152].mxu1 }
 0x292   : > { %5339 = vrcp.f32 %v3656_v47  ;;  %v3346_v45 = vadd.f32 %v3345_v23, %v3211_v9  ;;  %v3333_v5 = vrot.slane %v3209_v15, 4  ;;  %v3210_v12 = vmul.f32 %v6711_v63, %v6711_v63  ;;  %v6725_v3 = vpop.f32.mrb[88].mxu0  ;;  %v6727_v61 = vpop.f32.mrb[153].mxu1 }
 0x293   : > { %4100 = vst [vmem:[%s6628_s10 + $0x38] sm:$0xff] %v4036_v17  ;;  %v3970_v13 = vmul.f32 %v5330_v26, %v3778_v8  ;;  %5341 = vrsqrt.f32 %v3848_v48  ;;  %v6730_v18 = vadd.f32 %v3319_v51, %v3318_v58  ;;  %v3351_v11 = vrot.slane %v3212_v40, 4  ;;  %v2831_v39 = vpop.f32.mrb[89].mxu0  ;;  %v6732_v41 = vpop.f32.mrb[154].mxu1 }
 0x294   : > { %v5332_v25 = vpop.eup %5331  ;;  %v3347_v14 = vrot.slane %v3346_v45, 2  ;;  %v3334_v30 = vadd.f32 %v3333_v5, %v3209_v15  ;;  %v3339_v33 = vrot.slane %v3210_v12, 4  ;;  %v6736_v56 = vadd.f32 %v6634_v1, %v6413_v24  ;;  %v6738_v49 = vpop.f32.mrb[90].mxu0 }
 0x295   : > { %v6740_v59 = vpop.f32.mrb[155].mxu1  ;;  %v5334_v57 = vpop.eup %5333  ;;  %v4034_v9 = vmul.f32 %v3970_v13, %v6551_v43  ;;  %v3783_v16 = vmul.f32 %v5332_v25, %v6651_v34  ;;  %v3654_v58 = vadd.f32 1.0, %v6730_v18  ;;  %v3846_v52 = vadd.f32 1e-16, %v6730_v18  ;;  %v7626_v43 = vld [vmem:[#allocation4_spill] sm:$0xff] }
 0x296   : > { %7625 = vst [vmem:[#allocation44_spill] sm:$0xff] %v6736_v56  ;;  %v2834_v47 = vpop.f32.mrb[91].mxu0  ;;  %v3348_v23 = vadd.f32 %v3347_v14, %v3346_v45  ;;  %v3335_v15 = vrot.slane %v3334_v30, 2  ;;  %v3352_v26 = vadd.f32 %v3351_v11, %v3212_v40  ;;  %v3340_v24 = vadd.f32 %v3339_v33, %v3210_v12 }
 0x297   : > { %v5336_v48 = vpop.eup %5335  ;;  %4098 = vst [vmem:[%s6628_s10 + $0x28] sm:$0xff] %v4034_v9  ;;  %v3975_v17 = vmul.f32 %v5334_v57, %v3783_v16  ;;  %5343 = vrcp.f32 %v3654_v58  ;;  %v6750_v51 = vadd.f32 %v7626_v43, %v6623_v19  ;;  %v7627_v19 = vld [vmem:[#allocation2_spill] sm:$0xff]  ;;  %v6771_v58 = vadd.f32 %v6644_v32, %v6417_v27 }
 0x298   : > { %v5338_v1 = vpop.eup %5337  ;;  %v3781_v8 = vmul.f32 %v5336_v48, %v6660_v31  ;;  %5345 = vrsqrt.f32 %v3846_v52  ;;  %v3349_v34 = vrot.slane %v3348_v23, 1  ;;  %v3336_v5 = vadd.f32 %v3335_v15, %v3334_v30 }
 0x299   : > { %v3353_v13 = vrot.slane %v3352_v26, 2  ;;  %v4039_v45 = vmul.f32 %v3975_v17, %v6577_v0  ;;  %v3341_v40 = vrot.slane %v3340_v24, 2  ;;  %v3215_v12 = vmul.f32 %v6750_v51, %v6750_v51  ;;  %v6755_v11 = vpop.f32.mrb[156].mxu1  ;;  %v6763_v57 = vpop.f32.mrb[92].mxu0  ;;  %7628 = vst [vmem:[#allocation4_spill] sm:$0xff] %v6771_v58 }
 0x29a   : > { %v3973_v39 = vmul.f32 %v5338_v1, %v3781_v8  ;;  %v6757_v31 = vadd.f32 %v3349_v34, %v3348_v23  ;;  %v3337_v25 = vrot.slane %v3336_v5, 1  ;;  %v6761_v33 = vadd.f32 %v7627_v19, %v6636_v53  ;;  %v6765_v30 = vpop.f32.mrb[157].mxu1  ;;  %v2839_v52 = vpop.f32.mrb[93].mxu0 }
 0x29b   : > { %v3354_v14 = vadd.f32 %v3353_v13, %v3352_v26  ;;  %4103 = vst [vmem:[%s6628_s10 + $0x50] sm:$0xff] %v4039_v45  ;;  %v3342_v9 = vadd.f32 %v3341_v40, %v3340_v24  ;;  %v3369_v16 = vrot.slane %v3215_v12, 4  ;;  %v6773_v47 = vpop.f32.mrb[158].mxu1  ;;  %v6779_v1 = vpop.f32.mrb[94].mxu0 }
 0x29c   : > { %v4037_v0 = vmul.f32 %v3973_v39, %v6586_v36  ;;  %v5340_v48 = vpop.eup %5339  ;;  %v3659_v53 = vadd.f32 1.0, %v6757_v31  ;;  %v3851_v23 = vadd.f32 1e-16, %v6757_v31  ;;  %v6777_v15 = vadd.f32 %v3337_v25, %v3336_v5  ;;  %v6781_v36 = vpop.f32.mrb[159].mxu1 }
 0x29d   : > { %v3355_v26 = vrot.slane %v3354_v14, 1  ;;  %v5342_v24 = vpop.eup %5341  ;;  %v3784_v32 = vmul.f32 %v5340_v48, %v6692_v7  ;;  %v3343_v27 = vrot.slane %v3342_v9, 1  ;;  %v3370_v17 = vadd.f32 %v3369_v16, %v3215_v12  ;;  %v2842_v43 = vpop.f32.mrb[95].mxu0 }
 0x29e   : > { %4101 = vst [vmem:[%s6628_s10 + $0x40] sm:$0xff] %v4037_v0  ;;  %v3213_v8 = vmul.f32 %v6761_v33, %v6761_v33  ;;  %5347 = vrcp.f32 %v3659_v53  ;;  %v3657_v34 = vadd.f32 1.0, %v6777_v15  ;;  %v3849_v5 = vadd.f32 1e-16, %v6777_v15 }
 0x29f   : > { %v6789_v13 = vadd.f32 %v3355_v26, %v3354_v14  ;;  %v3976_v45 = vmul.f32 %v5342_v24, %v3784_v32  ;;  %5349 = vrsqrt.f32 %v3851_v23  ;;  %v6791_v39 = vadd.f32 %v3343_v27, %v3342_v9  ;;  %v7630_v27 = vld [vmem:[#allocation3_spill] sm:$0xff] }
 0x2a0   : > { %v3371_v40 = vrot.slane %v3370_v17, 2  ;;  %5351 = vrcp.f32 %v3657_v34  ;;  %v3357_v25 = vrot.slane %v3213_v8, 4  ;;  %v6812_v43 = vadd.f32 %v7630_v27, %v6646_v28 }
 0x2a1   : > { %v3660_v7 = vadd.f32 1.0, %v6789_v13  ;;  %v3852_v12 = vadd.f32 1e-16, %v6789_v13  ;;  %v5344_v19 = vpop.eup %5343  ;;  %v4040_v0 = vmul.f32 %v3976_v45, %v6610_v22  ;;  %5353 = vrsqrt.f32 %v3849_v5  ;;  %v6798_v52 = vpop.f32.mrb[160].mxu1  ;;  %v7629_v22 = vld [vmem:[#allocation5_spill] sm:$0xff] }
 0x2a2   : > { %v3658_v16 = vadd.f32 1.0, %v6791_v39  ;;  %v3850_v14 = vadd.f32 1e-16, %v6791_v39  ;;  %v5346_v9 = vpop.eup %5345  ;;  %v3782_v48 = vmul.f32 %v5344_v19, %v6730_v18  ;;  %v3372_v53 = vadd.f32 %v3371_v40, %v3370_v17  ;;  %v6801_v26 = vpop.f32.mrb[96].mxu0 }
 0x2a3   : > { %5355 = vrcp.f32 %v3660_v7  ;;  %v3358_v23 = vadd.f32 %v3357_v25, %v3213_v8  ;;  %v6803_v24 = vpop.f32.mrb[161].mxu1  ;;  %4104 = vst [vmem:[%s6628_s10 + $0x58] sm:$0xff] %v4040_v0  ;;  %v6808_v32 = vadd.f32 %v7629_v22, %v6640_v29  ;;  %v6816_v18 = vadd.f32 %v6669_v10, %v6421_v37  ;;  %v2847_v17 = vpop.f32.mrb[97].mxu0  ;;  %v7632_v10 = vld [vmem:[#allocation8_spill] sm:$0xff] }
 0x2a4   : > { %5357 = vrsqrt.f32 %v3852_v12  ;;  %v6818_v8 = vpop.f32.mrb[162].mxu1  ;;  %v3974_v34 = vmul.f32 %v5346_v9, %v3782_v48  ;;  %v3373_v5 = vrot.slane %v3372_v53, 1  ;;  %v6820_v40 = vpop.f32.mrb[98].mxu0  ;;  %v3214_v37 = vmul.f32 %v6812_v43, %v6812_v43 }
 0x2a5   : > { %7631 = vst [vmem:[#allocation2_spill] sm:$0xff] %v6816_v18  ;;  %5359 = vrcp.f32 %v3658_v16  ;;  %v3359_v45 = vrot.slane %v3358_v23, 2  ;;  %v6822_v29 = vpop.f32.mrb[163].mxu1  ;;  %v3216_v28 = vmul.f32 %v6808_v32, %v6808_v32  ;;  %v6830_v7 = vadd.f32 %v7632_v10, %v6665_v60  ;;  %v2850_v12 = vpop.f32.mrb[99].mxu0  ;;  %v7633_v16 = vld [vmem:[#allocation6_spill] sm:$0xff] }
 0x2a6   : > { %5361 = vrsqrt.f32 %v3850_v14  ;;  %v4038_v25 = vmul.f32 %v3974_v34, %v6632_v4  ;;  %v6833_v19 = vadd.f32 %v3373_v5, %v3372_v53  ;;  %v6837_v9 = vadd.f32 %v7633_v16, %v6671_v55  ;;  %v7636_v16 = vld [vmem:[#allocation9_spill] sm:$0xff] }
 0x2a7   : > { %v3360_v0 = vadd.f32 %v3359_v45, %v3358_v23  ;;  %v3375_v14 = vrot.slane %v3216_v28, 4  ;;  %v3363_v48 = vrot.slane %v3214_v37, 4  ;;  %v3219_v22 = vmul.f32 %v6830_v7, %v6830_v7 }
 0x2a8   : > { %v6843_v27 = vadd.f32 %v6685_v50, %v6425_v42  ;;  %v5348_v60 = vpop.eup %5347  ;;  %4102 = vst [vmem:[%s6628_s10 + $0x48] sm:$0xff] %v4038_v25  ;;  %v3663_v4 = vadd.f32 1.0, %v6833_v19  ;;  %v3855_v53 = vadd.f32 1e-16, %v6833_v19  ;;  %v3217_v55 = vmul.f32 %v6837_v9, %v6837_v9 }
 0x2a9   : > { %v3361_v23 = vrot.slane %v3360_v0, 1  ;;  %v5350_v17 = vpop.eup %5349  ;;  %v3787_v34 = vmul.f32 %v5348_v60, %v6757_v31  ;;  %v3376_v5 = vadd.f32 %v3375_v14, %v3216_v28  ;;  %v3364_v45 = vadd.f32 %v3363_v48, %v3214_v37  ;;  %v6851_v12 = vpop.f32.mrb[164].mxu1 }
 0x2aa   : > { %7634 = vst [vmem:[#allocation5_spill] sm:$0xff] %v6843_v27  ;;  %v3393_v10 = vrot.slane %v3219_v22, 4  ;;  %7635 = vst [vmem:[#allocation3_spill] sm:$0xff] %v6851_v12  ;;  %v5352_v42 = vpop.eup %5351  ;;  %5363 = vrcp.f32 %v3663_v4  ;;  %v3381_v25 = vrot.slane %v3217_v55, 4  ;;  %v6857_v58 = vadd.f32 %v7636_v16, %v6675_v6  ;;  %v6859_v27 = vpop.f32.mrb[100].mxu0 }
 0x2ab   : > { %v6853_v50 = vadd.f32 %v3361_v23, %v3360_v0  ;;  %7637 = vst [vmem:[#allocation8_spill] sm:$0xff] %v6859_v27  ;;  %v6861_v56 = vpop.f32.mrb[165].mxu1  ;;  %v5354_v18 = vpop.eup %5353  ;;  %v3979_v31 = vmul.f32 %v5350_v17, %v3787_v34  ;;  %v3785_v28 = vmul.f32 %v5352_v42, %v6777_v15  ;;  %5365 = vrsqrt.f32 %v3855_v53 }
 0x2ac   : > { %7638 = vst [vmem:[#allocation6_spill] sm:$0xff] %v6861_v56  ;;  %v3377_v37 = vrot.slane %v3376_v5, 2  ;;  %v2855_v14 = vpop.f32.mrb[101].mxu0  ;;  %v6864_v48 = vpop.f32.mrb[166].mxu1  ;;  %v3365_v6 = vrot.slane %v3364_v45, 2  ;;  %v3394_v23 = vadd.f32 %v3393_v10, %v3219_v22  ;;  %v3382_v12 = vadd.f32 %v3381_v25, %v3217_v55 }
 0x2ad   : > { %7639 = vst [vmem:[#allocation9_spill] sm:$0xff] %v6864_v48  ;;  %v5356_v0 = vpop.eup %5355  ;;  %v3661_v60 = vadd.f32 1.0, %v6853_v50  ;;  %v3853_v4 = vadd.f32 1e-16, %v6853_v50  ;;  %v6868_v16 = vpop.f32.mrb[102].mxu0  ;;  %v4043_v15 = vmul.f32 %v3979_v31, %v6683_v21  ;;  %v3977_v53 = vmul.f32 %v5354_v18, %v3785_v28 }
 0x2ae   : > { %v6870_v38 = vpop.f32.mrb[167].mxu1  ;;  %v5358_v17 = vpop.eup %5357  ;;  %v3788_v34 = vmul.f32 %v5356_v0, %v6789_v13  ;;  %v3378_v42 = vadd.f32 %v3377_v37, %v3376_v5  ;;  %v3366_v56 = vadd.f32 %v3365_v6, %v3364_v45  ;;  %v3395_v44 = vrot.slane %v3394_v23, 2  ;;  %v7641_v45 = vld [vmem:[#allocation7_spill] sm:$0xff] }
 0x2af   : > { %7640 = vst [vmem:[#allocation45_spill] sm:$0xff] %v6870_v38  ;;  %v2858_v14 = vpop.f32.mrb[103].mxu0  ;;  %v5360_v48 = vpop.eup %5359  ;;  %5367 = vrcp.f32 %v3661_v60  ;;  %4107 = vst [vmem:[%s6628_s10 + $0x70] sm:$0xff] %v4043_v15  ;;  %v4041_v22 = vmul.f32 %v3977_v53, %v6698_v2  ;;  %v3383_v5 = vrot.slane %v3382_v12, 2  ;;  %v3220_v55 = vmul.f32 %v6857_v58, %v6857_v58 }
 0x2b0   : > { %v5362_v27 = vpop.eup %5361  ;;  %v3980_v10 = vmul.f32 %v5358_v17, %v3788_v34  ;;  %v3786_v38 = vmul.f32 %v5360_v48, %v6791_v39  ;;  %5369 = vrsqrt.f32 %v3853_v4  ;;  %v3379_v21 = vrot.slane %v3378_v42, 1 }
 0x2b1   : > { %v3367_v18 = vrot.slane %v3366_v56, 1  ;;  %v3396_v13 = vadd.f32 %v3395_v44, %v3394_v23  ;;  %4105 = vst [vmem:[%s6628_s10 + $0x60] sm:$0xff] %v4041_v22  ;;  %v6883_v25 = vadd.f32 %v7641_v45, %v6687_v20  ;;  %v6885_v2 = vpop.f32.mrb[168].mxu1  ;;  %v3384_v44 = vadd.f32 %v3383_v5, %v3382_v12  ;;  %v6891_v0 = vpop.f32.mrb[104].mxu0 }
 0x2b2   : > { %v4044_v31 = vmul.f32 %v3980_v10, %v6707_v46  ;;  %v3978_v28 = vmul.f32 %v5362_v27, %v3786_v38  ;;  %v6887_v39 = vadd.f32 %v3379_v21, %v3378_v42  ;;  %v6893_v46 = vpop.f32.mrb[169].mxu1  ;;  %v3399_v27 = vrot.slane %v3220_v55, 4  ;;  %v7642_v10 = vld [vmem:[#allocation12_spill] sm:$0xff] }
 0x2b3   : > { %v6889_v37 = vadd.f32 %v3367_v18, %v3366_v56  ;;  %v3397_v48 = vrot.slane %v3396_v13, 1  ;;  %v3218_v20 = vmul.f32 %v6883_v25, %v6883_v25  ;;  %v6901_v60 = vadd.f32 %v6725_v3, %v6429_v54  ;;  %v2863_v56 = vpop.f32.mrb[105].mxu0  ;;  %v6903_v4 = vpop.f32.mrb[170].mxu1  ;;  %v7643_v18 = vld [vmem:[#allocation10_spill] sm:$0xff] }
 0x2b4   : > { %4108 = vst [vmem:[%s6628_s10 + $0x78] sm:$0xff] %v4044_v31  ;;  %v4042_v38 = vmul.f32 %v3978_v28, %v6711_v63  ;;  %v5364_v12 = vpop.eup %5363  ;;  %v3664_v6 = vadd.f32 1.0, %v6887_v39  ;;  %v3856_v23 = vadd.f32 1e-16, %v6887_v39  ;;  %v3385_v54 = vrot.slane %v3384_v44, 1  ;;  %v6913_v42 = vpop.f32.mrb[106].mxu0 }
 0x2b5   : > { %v3662_v17 = vadd.f32 1.0, %v6889_v37  ;;  %v3854_v63 = vadd.f32 1e-16, %v6889_v37  ;;  %v5366_v15 = vpop.eup %5365  ;;  %v3791_v53 = vmul.f32 %v5364_v12, %v6833_v19  ;;  %v6911_v34 = vadd.f32 %v3397_v48, %v3396_v13  ;;  %v6915_v14 = vpop.f32.mrb[171].mxu1 }
 0x2b6   : > { %4106 = vst [vmem:[%s6628_s10 + $0x68] sm:$0xff] %v4042_v38  ;;  %v3400_v3 = vadd.f32 %v3399_v27, %v3220_v55  ;;  %5371 = vrcp.f32 %v3664_v6  ;;  %v3387_v22 = vrot.slane %v3218_v20, 4  ;;  %v6919_v21 = vadd.f32 %v7642_v10, %v6721_v35  ;;  %v2866_v31 = vpop.f32.mrb[107].mxu0 }
 0x2b7   : > { %v6923_v5 = vadd.f32 %v7643_v18, %v6727_v61  ;;  %v3983_v19 = vmul.f32 %v5366_v15, %v3791_v53  ;;  %5373 = vrsqrt.f32 %v3856_v23  ;;  %v3667_v13 = vadd.f32 1.0, %v6911_v34 }
 0x2b8   : > { %v3859_v28 = vadd.f32 1e-16, %v6911_v34  ;;  %5375 = vrcp.f32 %v3662_v17  ;;  %v6927_v45 = vadd.f32 %v3385_v54, %v3384_v44  ;;  %v3401_v48 = vrot.slane %v3400_v3, 2 }
 0x2b9   : > { %v5368_v55 = vpop.eup %5367  ;;  %v3388_v38 = vadd.f32 %v3387_v22, %v3218_v20  ;;  %v4047_v27 = vmul.f32 %v3983_v19, %v6750_v51  ;;  %5377 = vrsqrt.f32 %v3854_v63  ;;  %v3223_v56 = vmul.f32 %v6919_v21, %v6919_v21  ;;  %v6933_v12 = vpop.f32.mrb[172].mxu1 }
 0x2ba   : > { %v5370_v35 = vpop.eup %5369  ;;  %v3789_v61 = vmul.f32 %v5368_v55, %v6853_v50  ;;  %5379 = vrcp.f32 %v3667_v13  ;;  %v3665_v6 = vadd.f32 1.0, %v6927_v45  ;;  %v3857_v23 = vadd.f32 1e-16, %v6927_v45  ;;  %v6937_v17 = vpop.f32.mrb[108].mxu0 }
 0x2bb   : > { %v3402_v44 = vadd.f32 %v3401_v48, %v3400_v3  ;;  %v6939_v20 = vpop.f32.mrb[173].mxu1  ;;  %4111 = vst [vmem:[%s6628_s10 + $0x90] sm:$0xff] %v4047_v27  ;;  %5381 = vrsqrt.f32 %v3859_v28  ;;  %v3389_v50 = vrot.slane %v3388_v38, 2  ;;  %v3417_v63 = vrot.slane %v3223_v56, 4  ;;  %v2871_v15 = vpop.f32.mrb[109].mxu0 }
 0x2bc   : > { %v3981_v51 = vmul.f32 %v5370_v35, %v3789_v61  ;;  %v6942_v53 = vpop.f32.mrb[174].mxu1  ;;  %5383 = vrcp.f32 %v3665_v6  ;;  %v3221_v22 = vmul.f32 %v6923_v5, %v6923_v5  ;;  %v6948_v3 = vadd.f32 %v6738_v49, %v6433_v62  ;;  %v6950_v10 = vpop.f32.mrb[110].mxu0  ;;  %v7646_v35 = vld [vmem:[#allocation13_spill] sm:$0xff]  ;;  %v7647_v62 = vld [vmem:[#allocation11_spill] sm:$0xff]  ;;  %v7648_v15 = vld [vmem:[#allocation18_spill] sm:$0xff] }
 0x2bd   : > { %v3403_v54 = vrot.slane %v3402_v44, 1  ;;  %v6952_v18 = vpop.f32.mrb[175].mxu1  ;;  %5385 = vrsqrt.f32 %v3857_v23  ;;  %v3390_v19 = vadd.f32 %v3389_v50, %v3388_v38  ;;  %v3418_v13 = vadd.f32 %v3417_v63, %v3223_v56  ;;  %v2874_v28 = vpop.f32.mrb[111].mxu0  ;;  %v7649_v38 = vld [vmem:[#allocation16_spill] sm:$0xff] }
 0x2be   : > { %7644 = vst [vmem:[#allocation7_spill] sm:$0xff] %v6948_v3  ;;  %7645 = vst [vmem:[#allocation12_spill] sm:$0xff] %v6952_v18  ;;  %v4045_v31 = vmul.f32 %v3981_v51, %v6761_v33  ;;  %v3405_v48 = vrot.slane %v3221_v22, 4  ;;  %v6959_v27 = vadd.f32 %v7646_v35, %v6732_v41  ;;  %v6963_v49 = vadd.f32 %v7647_v62, %v6740_v59 }
 0x2bf   : > { %v6955_v55 = vadd.f32 %v3403_v54, %v3402_v44  ;;  %v3391_v61 = vrot.slane %v3390_v19, 1  ;;  %v3419_v6 = vrot.slane %v3418_v13, 2  ;;  %v6968_v33 = vadd.f32 %v6763_v57, %v7648_v15 }
 0x2c0   : > { %4109 = vst [vmem:[%s6628_s10 + $0x80] sm:$0xff] %v4045_v31  ;;  %v6972_v56 = vadd.f32 %v7649_v38, %v6755_v11  ;;  %v5372_v23 = vpop.eup %5371  ;;  %v3406_v51 = vadd.f32 %v3405_v48, %v3221_v22  ;;  %v3224_v59 = vmul.f32 %v6959_v27, %v6959_v27  ;;  %v3222_v31 = vmul.f32 %v6963_v49, %v6963_v49 }
 0x2c1   : > { %v3668_v44 = vadd.f32 1.0, %v6955_v55  ;;  %v3860_v41 = vadd.f32 1e-16, %v6955_v55  ;;  %v5374_v50 = vpop.eup %5373  ;;  %v3792_v63 = vmul.f32 %v5372_v23, %v6887_v39  ;;  %v6979_v54 = vadd.f32 %v3391_v61, %v3390_v19  ;;  %v6983_v11 = vpop.f32.mrb[176].mxu1 }
 0x2c2   : > { %v3420_v57 = vadd.f32 %v3419_v6, %v3418_v13  ;;  %7650 = vst [vmem:[#allocation10_spill] sm:$0xff] %v6983_v11  ;;  %v5376_v28 = vpop.eup %5375  ;;  %v3407_v35 = vrot.slane %v3406_v51, 2  ;;  %v3423_v62 = vrot.slane %v3224_v59, 4  ;;  %v3227_v22 = vmul.f32 %v6972_v56, %v6972_v56  ;;  %v6987_v48 = vpop.f32.mrb[112].mxu0 }
 0x2c3   : > { %5387 = vrcp.f32 %v3668_v44  ;;  %7651 = vst [vmem:[#allocation13_spill] sm:$0xff] %v6987_v48  ;;  %v6989_v15 = vpop.f32.mrb[177].mxu1  ;;  %v5378_v39 = vpop.eup %5377  ;;  %v3984_v19 = vmul.f32 %v5374_v50, %v3792_v63  ;;  %v3790_v13 = vmul.f32 %v5376_v28, %v6889_v37  ;;  %v3666_v61 = vadd.f32 1.0, %v6979_v54 }
 0x2c4   : > { %7652 = vst [vmem:[#allocation11_spill] sm:$0xff] %v6989_v15  ;;  %5389 = vrsqrt.f32 %v3860_v41  ;;  %v2879_v6 = vpop.f32.mrb[113].mxu0  ;;  %v6993_v38 = vpop.f32.mrb[178].mxu1  ;;  %v3858_v44 = vadd.f32 1e-16, %v6979_v54  ;;  %v3421_v11 = vrot.slane %v3420_v57, 1  ;;  %v3408_v3 = vadd.f32 %v3407_v35, %v3406_v51 }
 0x2c5   : > { %7653 = vst [vmem:[#allocation18_spill] sm:$0xff] %v6993_v38  ;;  %v5380_v23 = vpop.eup %5379  ;;  %v3424_v18 = vadd.f32 %v3423_v62, %v3224_v59  ;;  %v6996_v48 = vpop.f32.mrb[114].mxu0  ;;  %v4048_v37 = vmul.f32 %v3984_v19, %v6808_v32  ;;  %v3982_v41 = vmul.f32 %v5378_v39, %v3790_v13  ;;  %5391 = vrcp.f32 %v3666_v61 }
 0x2c6   : > { %7654 = vst [vmem:[#allocation16_spill] sm:$0xff] %v6996_v48  ;;  %v6998_v15 = vpop.f32.mrb[179].mxu1  ;;  %v5382_v50 = vpop.eup %5381  ;;  %v3795_v63 = vmul.f32 %v5380_v23, %v6911_v34  ;;  %5393 = vrsqrt.f32 %v3858_v44  ;;  %v7002_v38 = vadd.f32 %v3421_v11, %v3420_v57  ;;  %v3409_v51 = vrot.slane %v3408_v3, 1 }
 0x2c7   : > { %7655 = vst [vmem:[#allocation46_spill] sm:$0xff] %v6998_v15  ;;  %v2882_v28 = vpop.f32.mrb[115].mxu0  ;;  %v5384_v6 = vpop.eup %5383  ;;  %v3425_v35 = vrot.slane %v3424_v18, 2  ;;  %4112 = vst [vmem:[%s6628_s10 + $0x98] sm:$0xff] %v4048_v37  ;;  %v4046_v62 = vmul.f32 %v3982_v41, %v6812_v43  ;;  %v3411_v32 = vrot.slane %v3222_v31, 4  ;;  %v3441_v23 = vrot.slane %v3227_v22, 4 }
 0x2c8   : > { %v5386_v59 = vpop.eup %5385  ;;  %v3987_v15 = vmul.f32 %v5382_v50, %v3795_v63  ;;  %v3793_v48 = vmul.f32 %v5384_v6, %v6927_v45  ;;  %v3671_v39 = vadd.f32 1.0, %v7002_v38  ;;  %v3863_v34 = vadd.f32 1e-16, %v7002_v38  ;;  %v7656_v28 = vld [vmem:[#allocation14_spill] sm:$0xff] }
 0x2c9   : > { %v7009_v19 = vadd.f32 %v3409_v51, %v3408_v3  ;;  %v3426_v13 = vadd.f32 %v3425_v35, %v3424_v18  ;;  %4110 = vst [vmem:[%s6628_s10 + $0x88] sm:$0xff] %v4046_v62  ;;  %v3412_v61 = vadd.f32 %v3411_v32, %v3222_v31  ;;  %v7013_v44 = vpop.f32.mrb[180].mxu1  ;;  %v7017_v37 = vpop.f32.mrb[116].mxu0  ;;  %v3442_v18 = vadd.f32 %v3441_v23, %v3227_v22  ;;  %v7657_v51 = vld [vmem:[#allocation19_spill] sm:$0xff] }
 0x2ca   : > { %v4051_v57 = vmul.f32 %v3987_v15, %v6830_v7  ;;  %v3985_v11 = vmul.f32 %v5386_v59, %v3793_v48  ;;  %5395 = vrcp.f32 %v3671_v39  ;;  %v7019_v41 = vpop.f32.mrb[181].mxu1  ;;  %v2887_v31 = vpop.f32.mrb[117].mxu0  ;;  %v7029_v6 = vadd.f32 %v7656_v28, %v6765_v30 }
 0x2cb   : > { %v3669_v43 = vadd.f32 1.0, %v7009_v19  ;;  %v3861_v45 = vadd.f32 1e-16, %v7009_v19  ;;  %v3427_v50 = vrot.slane %v3426_v13, 1  ;;  %5397 = vrsqrt.f32 %v3863_v34  ;;  %v7023_v48 = vpop.f32.mrb[182].mxu1  ;;  %v7035_v59 = vpop.f32.mrb[118].mxu0 }
 0x2cc   : > { %4115 = vst [vmem:[%s6628_s10 + $0xb0] sm:$0xff] %v4051_v57  ;;  %v4049_v3 = vmul.f32 %v3985_v11, %v6837_v9  ;;  %v3413_v7 = vrot.slane %v3412_v61, 2  ;;  %v7033_v35 = vadd.f32 %v6779_v1, %v7657_v51  ;;  %v7037_v9 = vpop.f32.mrb[183].mxu1  ;;  %v3443_v39 = vrot.slane %v3442_v18, 2  ;;  %v2890_v34 = vpop.f32.mrb[119].mxu0  ;;  %v7658_v57 = vld [vmem:[#allocation17_spill] sm:$0xff] }
 0x2cd   : > { %v5388_v15 = vpop.eup %5387  ;;  %5399 = vrcp.f32 %v3669_v43  ;;  %v7025_v63 = vadd.f32 %v3427_v50, %v3426_v13  ;;  %v3225_v1 = vmul.f32 %v7029_v6, %v7029_v6  ;;  %v7047_v11 = vadd.f32 %v7658_v57, %v6773_v47 }
 0x2ce   : > { %v5390_v22 = vpop.eup %5389  ;;  %4113 = vst [vmem:[%s6628_s10 + $0xa0] sm:$0xff] %v4049_v3  ;;  %v3796_v62 = vmul.f32 %v5388_v15, %v6955_v55  ;;  %5401 = vrsqrt.f32 %v3861_v45  ;;  %v3414_v32 = vadd.f32 %v3413_v7, %v3412_v61  ;;  %v3444_v3 = vadd.f32 %v3443_v39, %v3442_v18  ;;  %v7659_v55 = vld [vmem:[#allocation15_spill] sm:$0xff] }
 0x2cf   : > { %v3672_v13 = vadd.f32 1.0, %v7025_v63  ;;  %v3864_v30 = vadd.f32 1e-16, %v7025_v63  ;;  %v5392_v23 = vpop.eup %5391  ;;  %v7051_v61 = vadd.f32 %v7659_v55, %v6781_v36  ;;  %v3429_v31 = vrot.slane %v3225_v1, 4 }
 0x2d0   : > { %v3988_v43 = vmul.f32 %v5390_v22, %v3796_v62  ;;  %v3415_v50 = vrot.slane %v3414_v32, 1  ;;  %v5394_v45 = vpop.eup %5393  ;;  %v3794_v7 = vmul.f32 %v5392_v23, %v6979_v54  ;;  %v3228_v15 = vmul.f32 %v7047_v11, %v7047_v11 }
 0x2d1   : > { %5403 = vrcp.f32 %v3672_v13  ;;  %v3445_v51 = vrot.slane %v3444_v3, 1  ;;  %v7059_v18 = vpop.f32.mrb[184].mxu1  ;;  %v3430_v36 = vadd.f32 %v3429_v31, %v3225_v1  ;;  %v3226_v39 = vmul.f32 %v7051_v61, %v7051_v61  ;;  %v7063_v54 = vpop.f32.mrb[120].mxu0 }
 0x2d2   : > { %v4052_v47 = vmul.f32 %v3988_v43, %v6857_v58  ;;  %5405 = vrsqrt.f32 %v3864_v30  ;;  %v7057_v28 = vadd.f32 %v3415_v50, %v3414_v32  ;;  %7660 = vst [vmem:[#allocation14_spill] sm:$0xff] %v7059_v18  ;;  %v3986_v22 = vmul.f32 %v5394_v45, %v3794_v7  ;;  %v7065_v34 = vpop.f32.mrb[185].mxu1  ;;  %v7662_v30 = vld [vmem:[#allocation20_spill] sm:$0xff]  ;;  %v2895_v1 = vpop.f32.mrb[121].mxu0 }
 0x2d3   : > { %v3447_v62 = vrot.slane %v3228_v15, 4  ;;  %7661 = vst [vmem:[#allocation19_spill] sm:$0xff] %v7065_v34  ;;  %v7070_v32 = vadd.f32 %v3445_v51, %v3444_v3  ;;  %v7074_v57 = vadd.f32 %v7662_v30, %v6801_v26  ;;  %v7076_v23 = vpop.f32.mrb[186].mxu1  ;;  %v3431_v55 = vrot.slane %v3430_v36, 2  ;;  %v7079_v31 = vpop.f32.mrb[122].mxu0 }
 0x2d4   : > { %4116 = vst [vmem:[%s6628_s10 + $0xb8] sm:$0xff] %v4052_v47  ;;  %v3670_v13 = vadd.f32 1.0, %v7057_v28  ;;  %v3862_v58 = vadd.f32 1e-16, %v7057_v28  ;;  %7663 = vst [vmem:[#allocation17_spill] sm:$0xff] %v7076_v23  ;;  %v5396_v43 = vpop.eup %5395  ;;  %v4050_v50 = vmul.f32 %v3986_v22, %v6883_v25  ;;  %v3435_v7 = vrot.slane %v3226_v39, 4 }
 0x2d5   : > { %v3448_v45 = vadd.f32 %v3447_v62, %v3228_v15  ;;  %7664 = vst [vmem:[#allocation15_spill] sm:$0xff] %v7079_v31  ;;  %v7081_v47 = vpop.f32.mrb[187].mxu1  ;;  %v5398_v3 = vpop.eup %5397  ;;  %v3799_v51 = vmul.f32 %v5396_v43, %v7002_v38  ;;  %v3675_v26 = vadd.f32 1.0, %v7070_v32  ;;  %v3867_v30 = vadd.f32 1e-16, %v7070_v32 }
 0x2d6   : > { %7665 = vst [vmem:[#allocation20_spill] sm:$0xff] %v7081_v47  ;;  %5407 = vrcp.f32 %v3670_v13  ;;  %v2898_v1 = vpop.f32.mrb[123].mxu0  ;;  %4114 = vst [vmem:[%s6628_s10 + $0xa8] sm:$0xff] %v4050_v50  ;;  %v3432_v25 = vadd.f32 %v3431_v55, %v3430_v36  ;;  %v3436_v15 = vadd.f32 %v3435_v7, %v3226_v39  ;;  %v7666_v47 = vld [vmem:[#allocation38_spill] sm:$0xff]  ;;  %v7667_v39 = vld [vmem:[#allocation24_spill] sm:$0xff] }
 0x2d7   : > { %v5400_v23 = vpop.eup %5399  ;;  %5409 = vrsqrt.f32 %v3862_v58  ;;  %v3449_v22 = vrot.slane %v3448_v45, 2  ;;  %v3991_v34 = vmul.f32 %v5398_v3, %v3799_v51  ;;  %v7090_v38 = vadd.f32 %v7666_v47, %v6798_v52 }
 0x2d8   : > { %v5402_v62 = vpop.eup %5401  ;;  %v3797_v31 = vmul.f32 %v5400_v23, %v7009_v19  ;;  %5411 = vrcp.f32 %v3675_v26  ;;  %v3433_v13 = vrot.slane %v3432_v25, 1  ;;  %v3437_v1 = vrot.slane %v3436_v15, 2 }
 0x2d9   : > { %5413 = vrsqrt.f32 %v3867_v30  ;;  %v3450_v43 = vadd.f32 %v3449_v22, %v3448_v45  ;;  %v4055_v50 = vmul.f32 %v3991_v34, %v6919_v21  ;;  %v3231_v36 = vmul.f32 %v7090_v38, %v7090_v38  ;;  %v7099_v19 = vpop.f32.mrb[188].mxu1  ;;  %v7669_v45 = vld [vmem:[#allocation21_spill] sm:$0xff]  ;;  %v7107_v21 = vpop.f32.mrb[124].mxu0 }
 0x2da   : > { %v3989_v58 = vmul.f32 %v5402_v62, %v3797_v31  ;;  %v7097_v55 = vadd.f32 %v7667_v39, %v6803_v24  ;;  %7668 = vst [vmem:[#allocation38_spill] sm:$0xff] %v7099_v19  ;;  %v7101_v52 = vadd.f32 %v3433_v13, %v3432_v25  ;;  %v3438_v47 = vadd.f32 %v3437_v1, %v3436_v15  ;;  %v7109_v34 = vpop.f32.mrb[189].mxu1  ;;  %v2903_v25 = vpop.f32.mrb[125].mxu0  ;;  %v7675_v39 = vld [vmem:[#allocation39_spill] sm:$0xff] }
 0x2db   : > { %v5404_v23 = vpop.eup %5403  ;;  %v3451_v7 = vrot.slane %v3450_v43, 1  ;;  %v7105_v3 = vadd.f32 %v7669_v45, %v6820_v40  ;;  %7670 = vst [vmem:[#allocation24_spill] sm:$0xff] %v7107_v21  ;;  %7671 = vst [vmem:[#allocation21_spill] sm:$0xff] %v7109_v34  ;;  %v3465_v26 = vrot.slane %v3231_v36, 4  ;;  %v7116_v22 = vpop.f32.mrb[190].mxu1 }
 0x2dc   : > { %v5406_v31 = vpop.eup %5405  ;;  %4119 = vst [vmem:[%s6628_s10 + $0xd0] sm:$0xff] %v4055_v50  ;;  %v4053_v24 = vmul.f32 %v3989_v58, %v6923_v5  ;;  %v3800_v51 = vmul.f32 %v5404_v23, %v7025_v63  ;;  %v3229_v30 = vmul.f32 %v7097_v55, %v7097_v55  ;;  %7672 = vst [vmem:[#allocation47_spill] sm:$0xff] %v7116_v22  ;;  %v3673_v40 = vadd.f32 1.0, %v7101_v52  ;;  %v7122_v1 = vpop.f32.mrb[126].mxu0 }
 0x2dd   : > { %v3865_v15 = vadd.f32 1e-16, %v7101_v52  ;;  %v7120_v62 = vadd.f32 %v3451_v7, %v3450_v43  ;;  %v3439_v13 = vrot.slane %v3438_v47, 1  ;;  %7673 = vst [vmem:[#allocation48_spill] sm:$0xff] %v7122_v1  ;;  %v7124_v50 = vpop.f32.mrb[191].mxu1  ;;  %v3466_v63 = vadd.f32 %v3465_v26, %v3231_v36  ;;  %v2906_v45 = vpop.f32.mrb[127].mxu0 }
 0x2de   : > { %7674 = vst [vmem:[#allocation49_spill] sm:$0xff] %v7124_v50  ;;  %4117 = vst [vmem:[%s6628_s10 + $0xc0] sm:$0xff] %v4053_v24  ;;  %v3992_v5 = vmul.f32 %v5406_v31, %v3800_v51  ;;  %v3453_v58 = vrot.slane %v3229_v30, 4  ;;  %v7129_v23 = vadd.f32 %v7675_v39, %v6818_v8  ;;  %5415 = vrcp.f32 %v3673_v40 }
 0x2df   : > { %v3676_v25 = vadd.f32 1.0, %v7120_v62  ;;  %v3868_v43 = vadd.f32 1e-16, %v7120_v62  ;;  %v7133_v7 = vadd.f32 %v3439_v13, %v3438_v47  ;;  %5417 = vrsqrt.f32 %v3865_v15 }
 0x2e0   : > { %v5408_v22 = vpop.eup %5407  ;;  %v4056_v50 = vmul.f32 %v3992_v5, %v6959_v27  ;;  %v3467_v31 = vrot.slane %v3466_v63, 2  ;;  %v3454_v36 = vadd.f32 %v3453_v58, %v3229_v30  ;;  %v3232_v13 = vmul.f32 %v7129_v23, %v7129_v23 }
 0x2e1   : > { %v5410_v24 = vpop.eup %5409  ;;  %v3798_v51 = vmul.f32 %v5408_v22, %v7057_v28  ;;  %5419 = vrcp.f32 %v3676_v25  ;;  %v3674_v8 = vadd.f32 1.0, %v7133_v7  ;;  %v3866_v26 = vadd.f32 1e-16, %v7133_v7  ;;  %v7676_v28 = vld [vmem:[#allocation28_spill] sm:$0xff] }
 0x2e2   : > { %v5412_v40 = vpop.eup %5411  ;;  %4120 = vst [vmem:[%s6628_s10 + $0xd8] sm:$0xff] %v4056_v50  ;;  %5421 = vrsqrt.f32 %v3868_v43  ;;  %v3468_v39 = vadd.f32 %v3467_v31, %v3466_v63  ;;  %v3455_v47 = vrot.slane %v3454_v36, 2  ;;  %v7145_v22 = vadd.f32 %v7676_v28, %v6822_v29  ;;  %v7677_v43 = vld [vmem:[#allocation8_spill] sm:$0xff]  ;;  %v7678_v31 = vld [vmem:[#allocation22_spill] sm:$0xff] }
 0x2e3   : > { %v5414_v27 = vpop.eup %5413  ;;  %v3990_v15 = vmul.f32 %v5410_v24, %v3798_v51  ;;  %v3803_v30 = vmul.f32 %v5412_v40, %v7070_v32  ;;  %5423 = vrcp.f32 %v3674_v8  ;;  %v3471_v50 = vrot.slane %v3232_v13, 4  ;;  %v7679_v8 = vld [vmem:[#allocation3_spill] sm:$0xff] }
 0x2e4   : > { %5425 = vrsqrt.f32 %v3866_v26  ;;  %v3469_v5 = vrot.slane %v3468_v39, 1  ;;  %v3456_v58 = vadd.f32 %v3455_v47, %v3454_v36  ;;  %v3230_v25 = vmul.f32 %v7145_v22, %v7145_v22  ;;  %v7680_v26 = vld [vmem:[#allocation42_spill] sm:$0xff] }
 0x2e5   : > { %v4054_v63 = vmul.f32 %v3990_v15, %v6963_v49  ;;  %v3995_v45 = vmul.f32 %v5414_v27, %v3803_v30  ;;  %v7152_v24 = vadd.f32 %v7678_v31, %v7677_v43  ;;  %v3472_v29 = vadd.f32 %v3471_v50, %v3232_v13  ;;  %v7681_v47 = vld [vmem:[#allocation6_spill] sm:$0xff]  ;;  %v7682_v27 = vld [vmem:[#allocation40_spill] sm:$0xff]  ;;  %v7683_v30 = vld [vmem:[#allocation23_spill] sm:$0xff] }
 0x2e6   : > { %v7154_v32 = vadd.f32 %v3469_v5, %v3468_v39  ;;  %v3457_v51 = vrot.slane %v3456_v58, 1  ;;  %v7158_v40 = vadd.f32 %v7680_v26, %v7679_v8  ;;  %v3459_v36 = vrot.slane %v3230_v25, 4  ;;  %v7684_v31 = vld [vmem:[#allocation9_spill] sm:$0xff]  ;;  %v7685_v8 = vld [vmem:[#allocation43_spill] sm:$0xff] }
 0x2e7   : > { %4118 = vst [vmem:[%s6628_s10 + $0xc8] sm:$0xff] %v4054_v63  ;;  %v4059_v49 = vmul.f32 %v3995_v45, %v6972_v56  ;;  %v7164_v15 = vadd.f32 %v7682_v27, %v7681_v47  ;;  %v7168_v28 = vadd.f32 %v7683_v30, %v6868_v16  ;;  %v3473_v50 = vrot.slane %v3472_v29, 2 }
 0x2e8   : > { %v3679_v39 = vadd.f32 1.0, %v7154_v32  ;;  %v3871_v13 = vadd.f32 1e-16, %v7154_v32  ;;  %v7172_v5 = vadd.f32 %v3457_v51, %v3456_v58  ;;  %v5416_v43 = vpop.eup %5415  ;;  %v3460_v63 = vadd.f32 %v3459_v36, %v3230_v25 }
 0x2e9   : > { %4123 = vst [vmem:[%s6628_s10 + $0xf0] sm:$0xff] %v4059_v49  ;;  %v3235_v56 = vmul.f32 %v7158_v40, %v7158_v40  ;;  %v3233_v45 = vmul.f32 %v7164_v15, %v7164_v15  ;;  %v7181_v16 = vadd.f32 %v7685_v8, %v7684_v31  ;;  %v5418_v26 = vpop.eup %5417  ;;  %v3801_v47 = vmul.f32 %v5416_v43, %v7101_v52 }
 0x2ea   : > { %5427 = vrcp.f32 %v3679_v39  ;;  %v3677_v58 = vadd.f32 1.0, %v7172_v5  ;;  %v3869_v51 = vadd.f32 1e-16, %v7172_v5  ;;  %v3474_v25 = vadd.f32 %v3473_v50, %v3472_v29 }
 0x2eb   : > { %v5420_v49 = vpop.eup %5419  ;;  %5429 = vrsqrt.f32 %v3871_v13  ;;  %v3461_v36 = vrot.slane %v3460_v63, 2  ;;  %v3489_v27 = vrot.slane %v3235_v56, 4  ;;  %v3993_v1 = vmul.f32 %v5418_v26, %v3801_v47 }
 0x2ec   : > { %v5422_v30 = vpop.eup %5421  ;;  %v3804_v34 = vmul.f32 %v5420_v49, %v7120_v62  ;;  %5431 = vrcp.f32 %v3677_v58  ;;  %v3477_v31 = vrot.slane %v3233_v45, 4  ;;  %v3475_v52 = vrot.slane %v3474_v25, 1  ;;  %v7687_v49 = vld [vmem:[#allocation41_spill] sm:$0xff] }
 0x2ed   : > { %v5424_v8 = vpop.eup %5423  ;;  %5433 = vrsqrt.f32 %v3869_v51  ;;  %v3462_v39 = vadd.f32 %v3461_v36, %v3460_v63  ;;  %v3490_v43 = vadd.f32 %v3489_v27, %v3235_v56  ;;  %v4057_v21 = vmul.f32 %v3993_v1, %v7029_v6  ;;  %v7686_v51 = vld [vmem:[#allocation45_spill] sm:$0xff] }
 0x2ee   : > { %v5426_v19 = vpop.eup %5425  ;;  %v3996_v18 = vmul.f32 %v5422_v30, %v3804_v34  ;;  %v3802_v29 = vmul.f32 %v5424_v8, %v7133_v7  ;;  %v3478_v13 = vadd.f32 %v3477_v31, %v3233_v45  ;;  %v7189_v50 = vadd.f32 %v3475_v52, %v3474_v25 }
 0x2ef   : > { %v3463_v26 = vrot.slane %v3462_v39, 1  ;;  %v3491_v62 = vrot.slane %v3490_v43, 2  ;;  %v3236_v47 = vmul.f32 %v7181_v16, %v7181_v16  ;;  %4121 = vst [vmem:[%s6628_s10 + $0xe0] sm:$0xff] %v4057_v21  ;;  %v7197_v6 = vadd.f32 %v7687_v49, %v7686_v51 }
 0x2f0   : > { %v4060_v58 = vmul.f32 %v3996_v18, %v7047_v11  ;;  %v3994_v63 = vmul.f32 %v5426_v19, %v3802_v29  ;;  %v3479_v56 = vrot.slane %v3478_v13, 2  ;;  %v3680_v34 = vadd.f32 1.0, %v7189_v50  ;;  %v7688_v29 = vld [vmem:[#allocation25_spill] sm:$0xff] }
 0x2f1   : > { %v3872_v1 = vadd.f32 1e-16, %v7189_v50  ;;  %v7201_v7 = vadd.f32 %v3463_v26, %v3462_v39  ;;  %v3492_v45 = vadd.f32 %v3491_v62, %v3490_v43  ;;  %v3495_v36 = vrot.slane %v3236_v47, 4 }
 0x2f2   : > { %4124 = vst [vmem:[%s6628_s10 + $0xf8] sm:$0xff] %v4060_v58  ;;  %v4058_v25 = vmul.f32 %v3994_v63, %v7051_v61  ;;  %v3480_v21 = vadd.f32 %v3479_v56, %v3478_v13  ;;  %v3234_v11 = vmul.f32 %v7197_v6, %v7197_v6  ;;  %5435 = vrcp.f32 %v3680_v34 }
 0x2f3   : > { %v3678_v18 = vadd.f32 1.0, %v7201_v7  ;;  %v3870_v19 = vadd.f32 1e-16, %v7201_v7  ;;  %v3493_v27 = vrot.slane %v3492_v45, 1  ;;  %5437 = vrsqrt.f32 %v3872_v1 }
 0x2f4   : > { %v5428_v30 = vpop.eup %5427  ;;  %4122 = vst [vmem:[%s6628_s10 + $0xe8] sm:$0xff] %v4058_v25  ;;  %v3481_v31 = vrot.slane %v3480_v21, 1  ;;  %v3496_v8 = vadd.f32 %v3495_v36, %v3236_v47  ;;  %v3483_v52 = vrot.slane %v3234_v11, 4  ;;  %v7215_v13 = vadd.f32 %v7688_v29, %v6891_v0  ;;  %v7689_v36 = vld [vmem:[#allocation2_spill] sm:$0xff] }
 0x2f5   : > { %v5430_v39 = vpop.eup %5429  ;;  %v3807_v61 = vmul.f32 %v5428_v30, %v7154_v32  ;;  %5439 = vrcp.f32 %v3678_v18  ;;  %v7211_v43 = vadd.f32 %v3493_v27, %v3492_v45 }
 0x2f6   : > { %v5432_v26 = vpop.eup %5431  ;;  %5441 = vrsqrt.f32 %v3870_v19  ;;  %v7217_v62 = vadd.f32 %v3481_v31, %v3480_v21  ;;  %v3497_v58 = vrot.slane %v3496_v8, 2  ;;  %v3484_v63 = vadd.f32 %v3483_v52, %v3234_v11  ;;  %v7690_v19 = vld [vmem:[#allocation44_spill] sm:$0xff]  ;;  %v7691_v31 = vld [vmem:[#allocation26_spill] sm:$0xff] }
 0x2f7   : > { %v5434_v56 = vpop.eup %5433  ;;  %v3999_v51 = vmul.f32 %v5430_v39, %v3807_v61  ;;  %v3805_v47 = vmul.f32 %v5432_v26, %v7172_v5  ;;  %v3683_v32 = vadd.f32 1.0, %v7211_v43  ;;  %v3875_v49 = vadd.f32 1e-16, %v7211_v43  ;;  %v7693_v26 = vld [vmem:[#allocation4_spill] sm:$0xff] }
 0x2f8   : > { %v3681_v34 = vadd.f32 1.0, %v7217_v62  ;;  %v3873_v0 = vadd.f32 1e-16, %v7217_v62  ;;  %v3498_v1 = vadd.f32 %v3497_v58, %v3496_v8  ;;  %v3485_v45 = vrot.slane %v3484_v63, 2 }
 0x2f9   : > { %v4063_v25 = vmul.f32 %v3999_v51, %v7090_v38  ;;  %v3997_v21 = vmul.f32 %v5434_v56, %v3805_v47  ;;  %5443 = vrcp.f32 %v3683_v32  ;;  %v7227_v11 = vadd.f32 %v7689_v36, %v6885_v2 }
 0x2fa   : > { %5445 = vrsqrt.f32 %v3875_v49  ;;  %v3499_v5 = vrot.slane %v3498_v1, 1  ;;  %v3486_v18 = vadd.f32 %v3485_v45, %v3484_v63  ;;  %v7231_v27 = vadd.f32 %v7690_v19, %v6893_v46 }
 0x2fb   : > { %4127 = vst [vmem:[%s6628_s10 + $0x110] sm:$0xff] %v4063_v25  ;;  %v4061_v30 = vmul.f32 %v3997_v21, %v7097_v55  ;;  %5447 = vrcp.f32 %v3681_v34  ;;  %v3239_v38 = vmul.f32 %v7227_v11, %v7227_v11  ;;  %v7239_v8 = vadd.f32 %v7691_v31, %v6913_v42  ;;  %v7692_v55 = vld [vmem:[#allocation5_spill] sm:$0xff]  ;;  %v7694_v42 = vld [vmem:[#allocation27_spill] sm:$0xff] }
 0x2fc   : > { %5449 = vrsqrt.f32 %v3873_v0  ;;  %v7241_v2 = vadd.f32 %v3499_v5, %v3498_v1  ;;  %v3487_v52 = vrot.slane %v3486_v18, 1  ;;  %v3237_v39 = vmul.f32 %v7231_v27, %v7231_v27  ;;  %v5436_v46 = vpop.eup %5435 }
 0x2fd   : > { %4125 = vst [vmem:[%s6628_s10 + $0x100] sm:$0xff] %v4061_v30  ;;  %v3513_v61 = vrot.slane %v3239_v38, 4  ;;  %v7248_v29 = vadd.f32 %v7692_v55, %v6903_v4  ;;  %v7252_v58 = vadd.f32 %v7693_v26, %v6915_v14  ;;  %v7256_v63 = vadd.f32 %v7694_v42, %v6937_v17  ;;  %v5438_v56 = vpop.eup %5437 }
 0x2fe   : > { %v3808_v51 = vmul.f32 %v5436_v46, %v7189_v50  ;;  %v3684_v47 = vadd.f32 1.0, %v7241_v2  ;;  %v3876_v32 = vadd.f32 1e-16, %v7241_v2  ;;  %v7261_v49 = vadd.f32 %v3487_v52, %v3486_v18 }
 0x2ff   : > { %v5440_v34 = vpop.eup %5439  ;;  %v3514_v4 = vadd.f32 %v3513_v61, %v3239_v38  ;;  %v3501_v0 = vrot.slane %v3237_v39, 4  ;;  %v3240_v14 = vmul.f32 %v7248_v29, %v7248_v29  ;;  %v3238_v1 = vmul.f32 %v7252_v58, %v7252_v58 }
 0x300   : > { %v5442_v17 = vpop.eup %5441  ;;  %v4000_v45 = vmul.f32 %v5438_v56, %v3808_v51  ;;  %v3806_v25 = vmul.f32 %v5440_v34, %v7201_v7  ;;  %5451 = vrcp.f32 %v3684_v47  ;;  %v3682_v50 = vadd.f32 1.0, %v7261_v49 }
 0x301   : > { %5453 = vrsqrt.f32 %v3876_v32  ;;  %v3874_v21 = vadd.f32 1e-16, %v7261_v49  ;;  %v3515_v36 = vrot.slane %v3514_v4, 2  ;;  %v3502_v5 = vadd.f32 %v3501_v0, %v3237_v39 }
 0x302   : > { %v4064_v18 = vmul.f32 %v4000_v45, %v7129_v23  ;;  %v3998_v19 = vmul.f32 %v5442_v17, %v3806_v25  ;;  %5455 = vrcp.f32 %v3682_v50  ;;  %v3519_v30 = vrot.slane %v3240_v14, 4 }
 0x303   : > { %v5444_v38 = vpop.eup %5443  ;;  %5457 = vrsqrt.f32 %v3874_v21  ;;  %v3516_v31 = vadd.f32 %v3515_v36, %v3514_v4  ;;  %v3503_v52 = vrot.slane %v3502_v5, 2  ;;  %v3507_v7 = vrot.slane %v3238_v1, 4 }
 0x304   : > { %v5446_v46 = vpop.eup %5445  ;;  %4128 = vst [vmem:[%s6628_s10 + $0x118] sm:$0xff] %v4064_v18  ;;  %v4062_v61 = vmul.f32 %v3998_v19, %v7145_v22  ;;  %v3811_v55 = vmul.f32 %v5444_v38, %v7211_v43  ;;  %v3520_v26 = vadd.f32 %v3519_v30, %v3240_v14  ;;  %v7276_v39 = vadd.f32 %v6968_v33, %v6933_v12 }
 0x305   : > { %v5448_v23 = vpop.eup %5447  ;;  %v3517_v42 = vrot.slane %v3516_v31, 1  ;;  %v3504_v56 = vadd.f32 %v3503_v52, %v3502_v5  ;;  %v3508_v51 = vadd.f32 %v3507_v7, %v3238_v1  ;;  %v7280_v47 = vadd.f32 %v6901_v60, %v6939_v20 }
 0x306   : > { %v5450_v32 = vpop.eup %5449  ;;  %4126 = vst [vmem:[%s6628_s10 + $0x108] sm:$0xff] %v4062_v61  ;;  %v4003_v34 = vmul.f32 %v5446_v46, %v3811_v55  ;;  %v3809_v22 = vmul.f32 %v5448_v23, %v7217_v62  ;;  %v3521_v43 = vrot.slane %v3520_v26, 2  ;;  %v3243_v4 = vmul.f32 %v7276_v39, %v7276_v39 }
 0x307   : > { %v7286_v12 = vadd.f32 %v3517_v42, %v3516_v31  ;;  %v3505_v33 = vrot.slane %v3504_v56, 1  ;;  %v3509_v0 = vrot.slane %v3508_v51, 2  ;;  %v3241_v14 = vmul.f32 %v7280_v47, %v7280_v47 }
 0x308   : > { %v4067_v60 = vmul.f32 %v4003_v34, %v7158_v40  ;;  %v4001_v20 = vmul.f32 %v5450_v32, %v3809_v22  ;;  %v3522_v1 = vadd.f32 %v3521_v43, %v3520_v26  ;;  %v3537_v17 = vrot.slane %v3243_v4, 4 }
 0x309   : > { %v3687_v45 = vadd.f32 1.0, %v7286_v12  ;;  %v3879_v62 = vadd.f32 1e-16, %v7286_v12  ;;  %v7293_v25 = vadd.f32 %v3505_v33, %v3504_v56  ;;  %v3510_v50 = vadd.f32 %v3509_v0, %v3508_v51 }
 0x30a   : > { %v5452_v21 = vpop.eup %5451  ;;  %4131 = vst [vmem:[%s6628_s10 + $0x130] sm:$0xff] %v4067_v60  ;;  %v4065_v36 = vmul.f32 %v4001_v20, %v7164_v15  ;;  %v3523_v5 = vrot.slane %v3522_v1, 1  ;;  %v3538_v18 = vadd.f32 %v3537_v17, %v3243_v4  ;;  %v3525_v19 = vrot.slane %v3241_v14, 4  ;;  %v7695_v4 = vld [vmem:[#allocation29_spill] sm:$0xff]  ;;  %v7696_v20 = vld [vmem:[#allocation12_spill] sm:$0xff] }
 0x30b   : > { %v5454_v30 = vpop.eup %5453  ;;  %v3812_v40 = vmul.f32 %v5452_v21, %v7241_v2  ;;  %5459 = vrcp.f32 %v3687_v45  ;;  %v3685_v38 = vadd.f32 1.0, %v7293_v25  ;;  %v3877_v31 = vadd.f32 1e-16, %v7293_v25  ;;  %v7698_v45 = vld [vmem:[#allocation13_spill] sm:$0xff]  ;;  %v7700_v21 = vld [vmem:[#allocation10_spill] sm:$0xff] }
 0x30c   : > { %v5456_v52 = vpop.eup %5455  ;;  %4129 = vst [vmem:[%s6628_s10 + $0x120] sm:$0xff] %v4065_v36  ;;  %5461 = vrsqrt.f32 %v3879_v62  ;;  %v7301_v7 = vadd.f32 %v3523_v5, %v3522_v1  ;;  %v3511_v46 = vrot.slane %v3510_v50, 1  ;;  %v3539_v61 = vrot.slane %v3538_v18, 2  ;;  %v7697_v1 = vld [vmem:[#allocation7_spill] sm:$0xff]  ;;  %v7699_v62 = vld [vmem:[#allocation30_spill] sm:$0xff] }
 0x30d   : > { %v5458_v55 = vpop.eup %5457  ;;  %v4004_v15 = vmul.f32 %v5454_v30, %v3812_v40  ;;  %v3810_v26 = vmul.f32 %v5456_v52, %v7261_v49  ;;  %5463 = vrcp.f32 %v3685_v38  ;;  %v3526_v23 = vadd.f32 %v3525_v19, %v3241_v14  ;;  %v7701_v5 = vld [vmem:[#allocation11_spill] sm:$0xff]  ;;  %v7702_v19 = vld [vmem:[#allocation16_spill] sm:$0xff] }
 0x30e   : > { %5465 = vrsqrt.f32 %v3877_v31  ;;  %v3688_v2 = vadd.f32 1.0, %v7301_v7  ;;  %v3880_v42 = vadd.f32 1e-16, %v7301_v7  ;;  %v7306_v56 = vadd.f32 %v3511_v46, %v3510_v50  ;;  %v7703_v30 = vld [vmem:[#allocation31_spill] sm:$0xff] }
 0x30f   : > { %v4068_v51 = vmul.f32 %v4004_v15, %v7181_v16  ;;  %v4002_v32 = vmul.f32 %v5458_v55, %v3810_v26  ;;  %v3540_v34 = vadd.f32 %v3539_v61, %v3538_v18  ;;  %v3527_v22 = vrot.slane %v3526_v23, 2 }
 0x310   : > { %5467 = vrcp.f32 %v3688_v2  ;;  %v3686_v43 = vadd.f32 1.0, %v7306_v56  ;;  %v3878_v49 = vadd.f32 1e-16, %v7306_v56  ;;  %v7313_v33 = vadd.f32 %v7695_v4, %v6950_v10 }
 0x311   : > { %4132 = vst [vmem:[%s6628_s10 + $0x138] sm:$0xff] %v4068_v51  ;;  %v4066_v0 = vmul.f32 %v4002_v32, %v7197_v6  ;;  %5469 = vrsqrt.f32 %v3880_v42  ;;  %v3541_v14 = vrot.slane %v3540_v34, 1  ;;  %v3528_v60 = vadd.f32 %v3527_v22, %v3526_v23 }
 0x312   : > { %5471 = vrcp.f32 %v3686_v43  ;;  %v7319_v16 = vadd.f32 %v7033_v35, %v6942_v53  ;;  %v7323_v17 = vadd.f32 %v7697_v1, %v7696_v20  ;;  %v7327_v50 = vadd.f32 %v7699_v62, %v7698_v45 }
 0x313   : > { %4130 = vst [vmem:[%s6628_s10 + $0x128] sm:$0xff] %v4066_v0  ;;  %5473 = vrsqrt.f32 %v3878_v49  ;;  %v7330_v10 = vadd.f32 %v3541_v14, %v3540_v34  ;;  %v3529_v6 = vrot.slane %v3528_v60, 1  ;;  %v7334_v36 = vadd.f32 %v7152_v24, %v7700_v21 }
 0x314   : > { %v3244_v53 = vmul.f32 %v7319_v16, %v7319_v16  ;;  %v3242_v35 = vmul.f32 %v7323_v17, %v7323_v17  ;;  %v7342_v18 = vadd.f32 %v7074_v57, %v7701_v5  ;;  %v7346_v40 = vadd.f32 %v7703_v30, %v7702_v19  ;;  %v7704_v5 = vld [vmem:[#allocation18_spill] sm:$0xff] }
 0x315   : > { %v5460_v38 = vpop.eup %5459  ;;  %v3691_v31 = vadd.f32 1.0, %v7330_v10  ;;  %v3883_v24 = vadd.f32 1e-16, %v7330_v10  ;;  %v7350_v52 = vadd.f32 %v3529_v6, %v3528_v60  ;;  %v3247_v46 = vmul.f32 %v7334_v36, %v7334_v36 }
 0x316   : > { %v5462_v61 = vpop.eup %5461  ;;  %v3815_v55 = vmul.f32 %v5460_v38, %v7286_v12  ;;  %v3543_v15 = vrot.slane %v3244_v53, 4  ;;  %v3531_v57 = vrot.slane %v3242_v35, 4  ;;  %v3245_v26 = vmul.f32 %v7342_v18, %v7342_v18 }
 0x317   : > { %v5464_v23 = vpop.eup %5463  ;;  %5475 = vrcp.f32 %v3691_v31  ;;  %v3689_v2 = vadd.f32 1.0, %v7350_v52  ;;  %v3881_v42 = vadd.f32 1e-16, %v7350_v52  ;;  %v3561_v51 = vrot.slane %v3247_v46, 4 }
 0x318   : > { %v5466_v32 = vpop.eup %5465  ;;  %v4007_v34 = vmul.f32 %v5462_v61, %v3815_v55  ;;  %v3813_v22 = vmul.f32 %v5464_v23, %v7293_v25  ;;  %5477 = vrsqrt.f32 %v3883_v24  ;;  %v3544_v43 = vadd.f32 %v3543_v15, %v3244_v53 }
 0x319   : > { %5479 = vrcp.f32 %v3689_v2  ;;  %v3532_v12 = vadd.f32 %v3531_v57, %v3242_v35  ;;  %v3562_v49 = vadd.f32 %v3561_v51, %v3247_v46  ;;  %v3549_v4 = vrot.slane %v3245_v26, 4 }
 0x31a   : > { %v5468_v0 = vpop.eup %5467  ;;  %v4071_v14 = vmul.f32 %v4007_v34, %v7227_v11  ;;  %v4005_v60 = vmul.f32 %v5466_v32, %v3813_v22  ;;  %5481 = vrsqrt.f32 %v3881_v42  ;;  %v3545_v20 = vrot.slane %v3544_v43, 2  ;;  %v7705_v11 = vld [vmem:[#allocation46_spill] sm:$0xff] }
 0x31b   : > { %v5470_v1 = vpop.eup %5469  ;;  %v3816_v45 = vmul.f32 %v5468_v0, %v7301_v7  ;;  %v3533_v62 = vrot.slane %v3532_v12, 2  ;;  %v3563_v6 = vrot.slane %v3562_v49, 2  ;;  %v3550_v25 = vadd.f32 %v3549_v4, %v3245_v26 }
 0x31c   : > { %v5472_v21 = vpop.eup %5471  ;;  %4135 = vst [vmem:[%s6628_s10 + $0x150] sm:$0xff] %v4071_v14  ;;  %v4069_v53 = vmul.f32 %v4005_v60, %v7231_v27  ;;  %v3546_v35 = vadd.f32 %v3545_v20, %v3544_v43  ;;  %v7366_v19 = vadd.f32 %v7168_v28, %v7704_v5  ;;  %v7370_v30 = vadd.f32 %v7105_v3, %v7705_v11  ;;  %v7706_v43 = vld [vmem:[#allocation32_spill] sm:$0xff] }
 0x31d   : > { %v5474_v38 = vpop.eup %5473  ;;  %v4008_v31 = vmul.f32 %v5470_v1, %v3816_v45  ;;  %v3814_v7 = vmul.f32 %v5472_v21, %v7306_v56  ;;  %v3534_v24 = vadd.f32 %v3533_v62, %v3532_v12  ;;  %v3564_v46 = vadd.f32 %v3563_v6, %v3562_v49 }
 0x31e   : > { %4133 = vst [vmem:[%s6628_s10 + $0x140] sm:$0xff] %v4069_v53  ;;  %v3547_v61 = vrot.slane %v3546_v35, 1  ;;  %v3551_v55 = vrot.slane %v3550_v25, 2  ;;  %v3248_v27 = vmul.f32 %v7366_v19, %v7366_v19  ;;  %v3246_v28 = vmul.f32 %v7370_v30, %v7370_v30 }
 0x31f   : > { %v4072_v15 = vmul.f32 %v4008_v31, %v7248_v29  ;;  %v4006_v3 = vmul.f32 %v5474_v38, %v3814_v7  ;;  %v3535_v57 = vrot.slane %v3534_v24, 1  ;;  %v3565_v26 = vrot.slane %v3564_v46, 1 }
 0x320   : > { %v7379_v23 = vadd.f32 %v3547_v61, %v3546_v35  ;;  %v3552_v56 = vadd.f32 %v3551_v55, %v3550_v25  ;;  %v3567_v2 = vrot.slane %v3248_v27, 4  ;;  %v3555_v42 = vrot.slane %v3246_v28, 4 }
 0x321   : > { %v5476_v51 = vpop.eup %5475  ;;  %4136 = vst [vmem:[%s6628_s10 + $0x158] sm:$0xff] %v4072_v15  ;;  %v4070_v32 = vmul.f32 %v4006_v3, %v7252_v58  ;;  %v7383_v34 = vadd.f32 %v3535_v57, %v3534_v24  ;;  %v7385_v22 = vadd.f32 %v3565_v26, %v3564_v46  ;;  %v4774_v29 = vadd.f32 %v7706_v43, %v7017_v37  ;;  %v7707_v46 = vld [vmem:[#allocation33_spill] sm:$0xff]  ;;  %v7708_v57 = vld [vmem:[#allocation34_spill] sm:$0xff]  ;;  %v7710_v43 = vld [vmem:[#allocation19_spill] sm:$0xff] }
 0x322   : > { %v5478_v12 = vpop.eup %5477  ;;  %v3819_v49 = vmul.f32 %v5476_v51, %v7330_v10  ;;  %v3692_v4 = vadd.f32 1.0, %v7379_v23  ;;  %v3884_v0 = vadd.f32 1e-16, %v7379_v23  ;;  %v3553_v14 = vrot.slane %v3552_v56, 1 }
 0x323   : > { %v5480_v60 = vpop.eup %5479  ;;  %4134 = vst [vmem:[%s6628_s10 + $0x148] sm:$0xff] %v4070_v32  ;;  %v3690_v20 = vadd.f32 1.0, %v7383_v34  ;;  %v3882_v58 = vadd.f32 1e-16, %v7383_v34  ;;  %v3695_v1 = vadd.f32 1.0, %v7385_v22  ;;  %v3568_v25 = vadd.f32 %v3567_v2, %v3248_v27  ;;  %v7709_v2 = vld [vmem:[#allocation14_spill] sm:$0xff] }
 0x324   : > { %v3887_v45 = vadd.f32 1e-16, %v7385_v22  ;;  %v5482_v62 = vpop.eup %5481  ;;  %v4011_v37 = vmul.f32 %v5478_v12, %v3819_v49  ;;  %v3817_v10 = vmul.f32 %v5480_v60, %v7350_v52  ;;  %5483 = vrcp.f32 %v3692_v4 }
 0x325   : > { %v7398_v6 = vadd.f32 %v3553_v14, %v3552_v56  ;;  %5485 = vrsqrt.f32 %v3884_v0  ;;  %v3556_v21 = vadd.f32 %v3555_v42, %v3246_v28  ;;  %v7402_v53 = vadd.f32 %v7256_v63, %v7013_v44 }
 0x326   : > { %v4075_v35 = vmul.f32 %v4011_v37, %v7276_v39  ;;  %v4009_v5 = vmul.f32 %v5482_v62, %v3817_v10  ;;  %5487 = vrcp.f32 %v3690_v20  ;;  %v3569_v38 = vrot.slane %v3568_v25, 2 }
 0x327   : > { %v3693_v11 = vadd.f32 1.0, %v7398_v6  ;;  %5489 = vrsqrt.f32 %v3882_v58  ;;  %v3885_v52 = vadd.f32 1e-16, %v7398_v6  ;;  %v3557_v31 = vrot.slane %v3556_v21, 2 }
 0x328   : > { %4139 = vst [vmem:[%s6628_s10 + $0x170] sm:$0xff] %v4075_v35  ;;  %v4073_v7 = vmul.f32 %v4009_v5, %v7280_v47  ;;  %5491 = vrcp.f32 %v3695_v1  ;;  %v3251_v44 = vmul.f32 %v7402_v53, %v7402_v53  ;;  %v7413_v63 = vadd.f32 %v7215_v13, %v7019_v41 }
 0x329   : > { %5493 = vrsqrt.f32 %v3887_v45  ;;  %v3570_v39 = vadd.f32 %v3569_v38, %v3568_v25  ;;  %v3558_v24 = vadd.f32 %v3557_v31, %v3556_v21  ;;  %v7417_v61 = vadd.f32 %v7707_v46, %v7035_v59 }
 0x32a   : > { %4137 = vst [vmem:[%s6628_s10 + $0x160] sm:$0xff] %v4073_v7  ;;  %5495 = vrcp.f32 %v3693_v11  ;;  %v3585_v55 = vrot.slane %v3251_v44, 4  ;;  %v3249_v47 = vmul.f32 %v7413_v63, %v7413_v63  ;;  %v7424_v27 = vadd.f32 %v7313_v33, %v7023_v48 }
 0x32b   : > { %5497 = vrsqrt.f32 %v3885_v52  ;;  %v3571_v41 = vrot.slane %v3570_v39, 1  ;;  %v3559_v13 = vrot.slane %v3558_v24, 1  ;;  %v7428_v28 = vadd.f32 %v7239_v8, %v7037_v9 }
 0x32c   : > { %v3586_v15 = vadd.f32 %v3585_v55, %v3251_v44  ;;  %v3573_v59 = vrot.slane %v3249_v47, 4  ;;  %v3252_v3 = vmul.f32 %v7424_v27, %v7424_v27  ;;  %v7434_v26 = vadd.f32 %v7708_v57, %v7063_v54 }
 0x32d   : > { %v7436_v56 = vadd.f32 %v3571_v41, %v3570_v39  ;;  %v7438_v48 = vadd.f32 %v3559_v13, %v3558_v24  ;;  %v3250_v33 = vmul.f32 %v7428_v28, %v7428_v28  ;;  %v7443_v42 = vadd.f32 %v4774_v29, %v7709_v2 }
 0x32e   : > { %v5484_v9 = vpop.eup %5483  ;;  %v3587_v8 = vrot.slane %v3586_v15, 2  ;;  %v3574_v51 = vadd.f32 %v3573_v59, %v3249_v47  ;;  %v3591_v32 = vrot.slane %v3252_v3, 4  ;;  %v7447_v12 = vadd.f32 %v7327_v50, %v7710_v43 }
 0x32f   : > { %v5486_v54 = vpop.eup %5485  ;;  %v3820_v49 = vmul.f32 %v5484_v9, %v7379_v23  ;;  %v3696_v4 = vadd.f32 1.0, %v7436_v56  ;;  %v3888_v0 = vadd.f32 1e-16, %v7436_v56  ;;  %v3694_v14 = vadd.f32 1.0, %v7438_v48 }
 0x330   : > { %v5488_v60 = vpop.eup %5487  ;;  %v3886_v29 = vadd.f32 1e-16, %v7438_v48  ;;  %v3588_v20 = vadd.f32 %v3587_v8, %v3586_v15  ;;  %v3575_v58 = vrot.slane %v3574_v51, 2  ;;  %v3592_v1 = vadd.f32 %v3591_v32, %v3252_v3 }
 0x331   : > { %v5490_v45 = vpop.eup %5489  ;;  %v4012_v62 = vmul.f32 %v5486_v54, %v3820_v49  ;;  %v3818_v50 = vmul.f32 %v5488_v60, %v7383_v34  ;;  %5499 = vrcp.f32 %v3696_v4  ;;  %v3579_v37 = vrot.slane %v3250_v33, 4  ;;  %v7711_v49 = vld [vmem:[#allocation15_spill] sm:$0xff] }
 0x332   : > { %v5492_v10 = vpop.eup %5491  ;;  %5501 = vrsqrt.f32 %v3888_v0  ;;  %v3589_v23 = vrot.slane %v3588_v20, 1  ;;  %v3576_v25 = vadd.f32 %v3575_v58, %v3574_v51  ;;  %v3593_v21 = vrot.slane %v3592_v1, 2  ;;  %v7712_v4 = vld [vmem:[#allocation35_spill] sm:$0xff] }
 0x333   : > { %v5494_v35 = vpop.eup %5493  ;;  %v4076_v5 = vmul.f32 %v4012_v62, %v7319_v16  ;;  %v4010_v11 = vmul.f32 %v5490_v45, %v3818_v50  ;;  %v3823_v52 = vmul.f32 %v5492_v10, %v7385_v22  ;;  %5503 = vrcp.f32 %v3694_v14  ;;  %v7714_v62 = vld [vmem:[#allocation20_spill] sm:$0xff] }
 0x334   : > { %v5496_v38 = vpop.eup %5495  ;;  %5505 = vrsqrt.f32 %v3886_v29  ;;  %v7457_v31 = vadd.f32 %v3589_v23, %v3588_v20  ;;  %v3577_v34 = vrot.slane %v3576_v25, 1  ;;  %v3594_v7 = vadd.f32 %v3593_v21, %v3592_v1  ;;  %v7713_v29 = vld [vmem:[#allocation17_spill] sm:$0xff] }
 0x335   : > { %v5498_v44 = vpop.eup %5497  ;;  %4140 = vst [vmem:[%s6628_s10 + $0x178] sm:$0xff] %v4076_v5  ;;  %v4074_v39 = vmul.f32 %v4010_v11, %v7323_v17  ;;  %v4015_v24 = vmul.f32 %v5494_v35, %v3823_v52  ;;  %v3821_v46 = vmul.f32 %v5496_v38, %v7398_v6  ;;  %v3580_v16 = vadd.f32 %v3579_v37, %v3250_v33 }
 0x336   : > { %v3699_v55 = vadd.f32 1.0, %v7457_v31  ;;  %v3891_v22 = vadd.f32 1e-16, %v7457_v31  ;;  %v7464_v47 = vadd.f32 %v3577_v34, %v3576_v25  ;;  %v3595_v41 = vrot.slane %v3594_v7, 1 }
 0x337   : > { %4138 = vst [vmem:[%s6628_s10 + $0x168] sm:$0xff] %v4074_v39  ;;  %v4079_v13 = vmul.f32 %v4015_v24, %v7334_v36  ;;  %v4013_v15 = vmul.f32 %v5498_v44, %v3821_v46  ;;  %v3581_v59 = vrot.slane %v3580_v16, 2  ;;  %v3255_v17 = vmul.f32 %v7443_v42, %v7443_v42  ;;  %v7716_v44 = vld [vmem:[#allocation36_spill] sm:$0xff] }
 0x338   : > { %5507 = vrcp.f32 %v3699_v55  ;;  %v3697_v6 = vadd.f32 1.0, %v7464_v47  ;;  %v3889_v3 = vadd.f32 1e-16, %v7464_v47  ;;  %v7472_v57 = vadd.f32 %v3595_v41, %v3594_v7  ;;  %v7715_v7 = vld [vmem:[#allocation24_spill] sm:$0xff] }
 0x339   : > { %4143 = vst [vmem:[%s6628_s10 + $0x190] sm:$0xff] %v4079_v13  ;;  %v4077_v33 = vmul.f32 %v4013_v15, %v7342_v18  ;;  %5509 = vrsqrt.f32 %v3891_v22  ;;  %v3582_v2 = vadd.f32 %v3581_v59, %v3580_v16  ;;  %v3609_v9 = vrot.slane %v3255_v17, 4  ;;  %v7717_v15 = vld [vmem:[#allocation38_spill] sm:$0xff] }
 0x33a   : > { %5511 = vrcp.f32 %v3697_v6  ;;  %v3700_v36 = vadd.f32 1.0, %v7472_v57  ;;  %v3892_v8 = vadd.f32 1e-16, %v7472_v57  ;;  %v3253_v51 = vmul.f32 %v7447_v12, %v7447_v12 }
 0x33b   : > { %v5500_v32 = vpop.eup %5499  ;;  %4141 = vst [vmem:[%s6628_s10 + $0x180] sm:$0xff] %v4077_v33  ;;  %5513 = vrsqrt.f32 %v3889_v3  ;;  %v3583_v43 = vrot.slane %v3582_v2, 1  ;;  %v3610_v54 = vadd.f32 %v3609_v9, %v3255_v17  ;;  %v7483_v0 = vadd.f32 %v7712_v4, %v7711_v49  ;;  %v7718_v33 = vld [vmem:[#allocation21_spill] sm:$0xff] }
 0x33c   : > { %v5502_v18 = vpop.eup %5501  ;;  %v3824_v14 = vmul.f32 %v5500_v32, %v7436_v56  ;;  %5515 = vrcp.f32 %v3700_v36  ;;  %v3597_v60 = vrot.slane %v3253_v51, 4  ;;  %v7488_v20 = vadd.f32 %v7417_v61, %v7713_v29  ;;  %v7720_v9 = vld [vmem:[#allocation37_spill] sm:$0xff] }
 0x33d   : > { %v5504_v58 = vpop.eup %5503  ;;  %5517 = vrsqrt.f32 %v3892_v8  ;;  %v7490_v1 = vadd.f32 %v3583_v43, %v3582_v2  ;;  %v3611_v45 = vrot.slane %v3610_v54, 2  ;;  %v7494_v50 = vadd.f32 %v7346_v40, %v7714_v62 }
 0x33e   : > { %v5506_v37 = vpop.eup %5505  ;;  %v4016_v10 = vmul.f32 %v5502_v18, %v3824_v14  ;;  %v3822_v23 = vmul.f32 %v5504_v58, %v7438_v48  ;;  %v3598_v56 = vadd.f32 %v3597_v60, %v3253_v51  ;;  %v3256_v25 = vmul.f32 %v7488_v20, %v7488_v20 }
 0x33f   : > { %v3698_v61 = vadd.f32 1.0, %v7490_v1  ;;  %v3890_v21 = vadd.f32 1e-16, %v7490_v1  ;;  %v3612_v35 = vadd.f32 %v3611_v45, %v3610_v54  ;;  %v3254_v5 = vmul.f32 %v7494_v50, %v7494_v50 }
 0x340   : > { %v4080_v40 = vmul.f32 %v4016_v10, %v7366_v19  ;;  %v4014_v11 = vmul.f32 %v5506_v37, %v3822_v23  ;;  %v3599_v52 = vrot.slane %v3598_v56, 2  ;;  %v3615_v38 = vrot.slane %v3256_v25, 4 }
 0x341   : > { %5519 = vrcp.f32 %v3698_v61  ;;  %v3613_v48 = vrot.slane %v3612_v35, 1  ;;  %v3603_v34 = vrot.slane %v3254_v5, 4  ;;  %v4782_v39 = vadd.f32 %v7716_v44, %v7715_v7 }
 0x342   : > { %v5508_v24 = vpop.eup %5507  ;;  %4144 = vst [vmem:[%s6628_s10 + $0x198] sm:$0xff] %v4080_v40  ;;  %v4078_v46 = vmul.f32 %v4014_v11, %v7370_v30  ;;  %5521 = vrsqrt.f32 %v3890_v21  ;;  %v3600_v16 = vadd.f32 %v3599_v52, %v3598_v56  ;;  %v3616_v55 = vadd.f32 %v3615_v38, %v3256_v25  ;;  %v7719_v30 = vld [vmem:[#allocation48_spill] sm:$0xff]  ;;  %v7721_v25 = vld [vmem:[#allocation47_spill] sm:$0xff] }
 0x343   : > { %v5510_v22 = vpop.eup %5509  ;;  %v3827_v19 = vmul.f32 %v5508_v24, %v7457_v31  ;;  %v7509_v41 = vadd.f32 %v3613_v48, %v3612_v35  ;;  %v3604_v13 = vadd.f32 %v3603_v34, %v3254_v5  ;;  %v7512_v59 = vadd.f32 %v4782_v39, %v7717_v15  ;;  %v7722_v39 = vld [vmem:[#allocation49_spill] sm:$0xff] }
 0x344   : > { %v5512_v17 = vpop.eup %5511  ;;  %4142 = vst [vmem:[%s6628_s10 + $0x188] sm:$0xff] %v4078_v46  ;;  %v3601_v6 = vrot.slane %v3600_v16, 1  ;;  %v3617_v3 = vrot.slane %v3616_v55, 2  ;;  %v7517_v2 = vadd.f32 %v7434_v26, %v7718_v33  ;;  %v4784_v36 = vadd.f32 %v7720_v9, %v7719_v30 }
 0x345   : > { %v5514_v8 = vpop.eup %5513  ;;  %v4019_v51 = vmul.f32 %v5510_v22, %v3827_v19  ;;  %v3825_v31 = vmul.f32 %v5512_v17, %v7464_v47  ;;  %v3703_v32 = vadd.f32 1.0, %v7509_v41  ;;  %v3895_v43 = vadd.f32 1e-16, %v7509_v41 }
 0x346   : > { %v5516_v54 = vpop.eup %5515  ;;  %v7524_v49 = vadd.f32 %v3601_v6, %v3600_v16  ;;  %v3618_v4 = vadd.f32 %v3617_v3, %v3616_v55  ;;  %v3605_v18 = vrot.slane %v3604_v13, 2  ;;  %v3259_v26 = vmul.f32 %v7512_v59, %v7512_v59 }
 0x347   : > { %v5518_v14 = vpop.eup %5517  ;;  %v4083_v60 = vmul.f32 %v4019_v51, %v7402_v53  ;;  %v4017_v29 = vmul.f32 %v5514_v8, %v3825_v31  ;;  %v3828_v58 = vmul.f32 %v5516_v54, %v7472_v57  ;;  %5523 = vrcp.f32 %v3703_v32 }
 0x348   : > { %5525 = vrsqrt.f32 %v3895_v43  ;;  %v3701_v47 = vadd.f32 1.0, %v7524_v49  ;;  %v3893_v45 = vadd.f32 1e-16, %v7524_v49  ;;  %v3619_v62 = vrot.slane %v3618_v4, 1 }
 0x349   : > { %4147 = vst [vmem:[%s6628_s10 + $0x1b0] sm:$0xff] %v4083_v60  ;;  %v4081_v37 = vmul.f32 %v4017_v29, %v7413_v63  ;;  %v4020_v10 = vmul.f32 %v5518_v14, %v3828_v58  ;;  %v3606_v23 = vadd.f32 %v3605_v18, %v3604_v13  ;;  %v3633_v56 = vrot.slane %v3259_v26, 4 }
 0x34a   : > { %5527 = vrcp.f32 %v3701_v47  ;;  %v7534_v53 = vadd.f32 %v3619_v62, %v3618_v4  ;;  %v3257_v57 = vmul.f32 %v7517_v2, %v7517_v2  ;;  %v7539_v61 = vadd.f32 %v4784_v36, %v7721_v25 }
 0x34b   : > { %v5520_v21 = vpop.eup %5519  ;;  %4145 = vst [vmem:[%s6628_s10 + $0x1a0] sm:$0xff] %v4081_v37  ;;  %v4084_v35 = vmul.f32 %v4020_v10, %v7424_v27  ;;  %5529 = vrsqrt.f32 %v3893_v45  ;;  %v3607_v5 = vrot.slane %v3606_v23, 1  ;;  %v3634_v63 = vadd.f32 %v3633_v56, %v3259_v26 }
 0x34c   : > { %v5522_v40 = vpop.eup %5521  ;;  %v3826_v11 = vmul.f32 %v5520_v21, %v7490_v1  ;;  %v3704_v52 = vadd.f32 1.0, %v7534_v53  ;;  %v3896_v38 = vadd.f32 1e-16, %v7534_v53  ;;  %v3621_v48 = vrot.slane %v3257_v57, 4 }
 0x34d   : > { %4148 = vst [vmem:[%s6628_s10 + $0x1b8] sm:$0xff] %v4084_v35  ;;  %v3608_v34 = vadd.f32 %v3607_v5, %v3606_v23  ;;  %v3635_v7 = vrot.slane %v3634_v63, 2  ;;  %v3260_v44 = vmul.f32 %v7539_v61, %v7539_v61  ;;  %v7551_v27 = vadd.f32 %v7483_v0, %v7722_v39 }
 0x34e   : > { %v4018_v24 = vmul.f32 %v5522_v40, %v3826_v11  ;;  %5531 = vrcp.f32 %v3704_v52  ;;  %v3622_v46 = vadd.f32 %v3621_v48, %v3257_v57 }
 0x34f   : > { %5533 = vrsqrt.f32 %v3896_v38  ;;  %v3702_v1 = vadd.f32 1.0, %v3608_v34  ;;  %v3894_v16 = vadd.f32 1e-16, %v3608_v34  ;;  %v3636_v55 = vadd.f32 %v3635_v7, %v3634_v63 }
 0x350   : > { %v4082_v22 = vmul.f32 %v4018_v24, %v7428_v28  ;;  %v3623_v19 = vrot.slane %v3622_v46, 2  ;;  %v3639_v13 = vrot.slane %v3260_v44, 4  ;;  %v3258_v15 = vmul.f32 %v7551_v27, %v7551_v27 }
 0x351   : > { %v5524_v17 = vpop.eup %5523  ;;  %5535 = vrcp.f32 %v3702_v1  ;;  %v3637_v6 = vrot.slane %v3636_v55, 1 }
 0x352   : > { %v5526_v0 = vpop.eup %5525  ;;  %4146 = vst [vmem:[%s6628_s10 + $0x1a8] sm:$0xff] %v4082_v22  ;;  %v3831_v3 = vmul.f32 %v5524_v17, %v7509_v41  ;;  %v3624_v33 = vadd.f32 %v3623_v19, %v3622_v46  ;;  %v3640_v30 = vadd.f32 %v3639_v13, %v3260_v44  ;;  %5537 = vrsqrt.f32 %v3894_v16 }
 0x353   : > { %v3638_v9 = vadd.f32 %v3637_v6, %v3636_v55  ;;  %v3627_v36 = vrot.slane %v3258_v15, 4 }
 0x354   : > { %v5528_v8 = vpop.eup %5527  ;;  %v4023_v28 = vmul.f32 %v5526_v0, %v3831_v3  ;;  %v3625_v51 = vrot.slane %v3624_v33, 1  ;;  %v3641_v31 = vrot.slane %v3640_v30, 2 }
 0x355   : > { %v5530_v32 = vpop.eup %5529  ;;  %v3829_v43 = vmul.f32 %v5528_v8, %v7524_v49  ;;  %v3707_v54 = vadd.f32 1.0, %v3638_v9  ;;  %v3899_v4 = vadd.f32 1e-16, %v3638_v9  ;;  %v3628_v18 = vadd.f32 %v3627_v36, %v3258_v15 }
 0x356   : > { %v4087_v26 = vmul.f32 %v4023_v28, %v7443_v42  ;;  %v3626_v14 = vadd.f32 %v3625_v51, %v3624_v33  ;;  %v3642_v41 = vadd.f32 %v3641_v31, %v3640_v30 }
 0x357   : > { %v4021_v60 = vmul.f32 %v5530_v32, %v3829_v43  ;;  %5539 = vrcp.f32 %v3707_v54  ;;  %v3629_v29 = vrot.slane %v3628_v18, 2 }
 0x358   : > { %v5532_v58 = vpop.eup %5531  ;;  %4151 = vst [vmem:[%s6628_s10 + $0x1d0] sm:$0xff] %v4087_v26  ;;  %v3705_v47 = vadd.f32 1.0, %v3626_v14  ;;  %v3897_v45 = vadd.f32 1e-16, %v3626_v14  ;;  %v3643_v62 = vrot.slane %v3642_v41, 1  ;;  %5541 = vrsqrt.f32 %v3899_v4 }
 0x359   : > { %v5534_v37 = vpop.eup %5533  ;;  %v4085_v10 = vmul.f32 %v4021_v60, %v7447_v12  ;;  %v3832_v49 = vmul.f32 %v5532_v58, %v7534_v53  ;;  %v3630_v23 = vadd.f32 %v3629_v29, %v3628_v18 }
 0x35a   : > { %5543 = vrcp.f32 %v3705_v47  ;;  %v3644_v42 = vadd.f32 %v3643_v62, %v3642_v41 }
 0x35b   : > { %v5536_v56 = vpop.eup %5535  ;;  %4149 = vst [vmem:[%s6628_s10 + $0x1c0] sm:$0xff] %v4085_v10  ;;  %v4024_v57 = vmul.f32 %v5534_v37, %v3832_v49  ;;  %v3631_v25 = vrot.slane %v3630_v23, 1  ;;  %5545 = vrsqrt.f32 %v3897_v45 }
 0x35c   : > { %v3830_v21 = vmul.f32 %v5536_v56, %v3608_v34  ;;  %v3708_v35 = vadd.f32 1.0, %v3644_v42  ;;  %v3900_v5 = vadd.f32 1e-16, %v3644_v42  ;;  %v5538_v63 = vpop.eup %5537 }
 0x35d   : > { %v4088_v40 = vmul.f32 %v4024_v57, %v7488_v20  ;;  %v3632_v12 = vadd.f32 %v3631_v25, %v3630_v23 }
 0x35e   : > { %v4022_v11 = vmul.f32 %v5538_v63, %v3830_v21  ;;  %5547 = vrcp.f32 %v3708_v35 }
 0x35f   : > { %4152 = vst [vmem:[%s6628_s10 + $0x1d8] sm:$0xff] %v4088_v40  ;;  %v3706_v53 = vadd.f32 1.0, %v3632_v12  ;;  %v3898_v52 = vadd.f32 1e-16, %v3632_v12  ;;  %5549 = vrsqrt.f32 %v3900_v5 }
 0x360   : > { %v4086_v38 = vmul.f32 %v4022_v11, %v7494_v50 }
 0x361   : > { %v5540_v48 = vpop.eup %5539  ;;  %5551 = vrcp.f32 %v3706_v53 }
 0x362   : > { %4150 = vst [vmem:[%s6628_s10 + $0x1c8] sm:$0xff] %v4086_v38  ;;  %v3835_v34 = vmul.f32 %v5540_v48, %v3638_v9  ;;  %v5542_v7 = vpop.eup %5541  ;;  %5553 = vrsqrt.f32 %v3898_v52 }
 0x364   : > { %v5544_v44 = vpop.eup %5543  ;;  %v4027_v39 = vmul.f32 %v5542_v7, %v3835_v34 }
 0x365   : > { %v3833_v20 = vmul.f32 %v5544_v44, %v3626_v14  ;;  %v5546_v24 = vpop.eup %5545 }
 0x366   : > { %v4091_v46 = vmul.f32 %v4027_v39, %v7512_v59 }
 0x367   : > { %v4025_v1 = vmul.f32 %v5546_v24, %v3833_v20 }
 0x368   : > { %v5548_v16 = vpop.eup %5547  ;;  %4155 = vst [vmem:[%s6628_s10 + $0x1f0] sm:$0xff] %v4091_v46 }
 0x369   : > { %v4089_v50 = vmul.f32 %v4025_v1, %v7517_v2  ;;  %v3836_v55 = vmul.f32 %v5548_v16, %v3644_v42  ;;  %v5550_v22 = vpop.eup %5549 }
 0x36b   : > { %v5552_v19 = vpop.eup %5551  ;;  %4153 = vst [vmem:[%s6628_s10 + $0x1e0] sm:$0xff] %v4089_v50  ;;  %v4028_v13 = vmul.f32 %v5550_v22, %v3836_v55 }
 0x36c   : > { %v3834_v15 = vmul.f32 %v5552_v19, %v3632_v12  ;;  %v5554_v17 = vpop.eup %5553 }
 0x36d   : > { %v4092_v6 = vmul.f32 %v4028_v13, %v7539_v61 }
 0x36e   : > { %v4026_v0 = vmul.f32 %v5554_v17, %v3834_v15 }
 0x36f   : > { %4156 = vst [vmem:[%s6628_s10 + $0x1f8] sm:$0xff] %v4092_v6 }
 0x370   : > { %v4090_v3 = vmul.f32 %v4026_v0, %v7551_v27 }
 0x372   : > { %4154 = vst [vmem:[%s6628_s10 + $0x1e8] sm:$0xff] %v4090_v3 }
 0x373 PF: > { %s13_s12 = sadd.s32 1, %s5561_s12  }
 0x374   : > { %p10_p4 = scmp.ge.s32.totalorder %s13_s12, 4  }
 0x376   :  { %12 = sbr.rel (!%p10_p4) target bundleno = 1 (0x1), region = 62 }

</bundles_post_ra>
